<compile_context>
chip_gen: v7x
topology: tpu7x:2x2x1
jax: 0.10.0
libtpu: 0.0.40
codegen_flags: <defaults>
</compile_context>

<pallas_src>
import jax
import jax.numpy as jnp
from jax.experimental import pallas as pl
from jax.experimental.pallas import tpu as pltpu

SELU_ALPHA = 1.6732632423543772
SELU_SCALE = 1.0507009873554805
_K = 16                      # kernel_size of every 'same' conv in the model

# MXU operand dtype.  float32 keeps exact parity with the PyTorch module;
# switch to jnp.bfloat16 on v6e/v7x for native-rate MXU once accuracy allows.
_MATMUL_DTYPE = jnp.float32


# ----------------------------------------------------------------------------
# Fused Pallas kernel (one grid step == one batch element)
# ----------------------------------------------------------------------------
def _unet_kernel(x_ref,
                 w1, b1, w2, b2, w3, b3,
                 wa2, ba2, wa1, ba1,
                 wt2a, wt2b, bt2, wu2, bu2,
                 wt1a, wt1b, bt1, wu1, bu1,
                 wo, bo,
                 o_ref,
                 pad_ref, patch_ref):
    f32 = jnp.float32

    def mm(a, b):
        return jnp.dot(a.astype(_MATMUL_DTYPE), b.astype(_MATMUL_DTYPE),
                       preferred_element_type=f32)

    def selu(v):
        # exp argument clamped so the discarded branch stays finite.
        return SELU_SCALE * jnp.where(
            v > 0.0, v, SELU_ALPHA * (jnp.exp(jnp.minimum(v, 0.0)) - 1.0))

    def sigmoid(v):
        # divide goes to the EUP slot (approx reciprocal) instead of VALU
        return pl.reciprocal(1.0 + jnp.exp(-v), approx=True)

    def conv_same_selu(x, w_ref, b_ref):
        """Conv1d(kernel=16, padding='same') + folded BN + SELU via im2col."""
        c_in, lx = x.shape
        pad_l = (_K - 1) // 2                      # PyTorch 'same': 7 left, 8 right
        # stage zero-padded input in VMEM
        pad_ref[...] = jnp.zeros(pad_ref.shape, f32)
        pad_ref[0:c_in, pad_l:pad_l + lx] = x
        # im2col: row-block k of the patch matrix is the k-shifted window
        for k in range(_K):
            patch_ref[k * c_in:(k + 1) * c_in, 0:lx] = pad_ref[0:c_in, k:k + lx]
        acc = mm(w_ref[...], patch_ref[0:_K * c_in, 0:lx]) + b_ref[...]
        return selu(acc)

    def conv1x1(x, w_ref, b_ref):
        return mm(w_ref[...], x) + b_ref[...]

    def _half_mats(lx):                            # (lx, lx//2) even/odd pickers
        r = jax.lax.broadcasted_iota(jnp.int32, (lx, lx // 2), 0)
        c = jax.lax.broadcasted_iota(jnp.int32, (lx, lx // 2), 1)
        return (r == 2 * c).astype(f32), (r == 2 * c + 1).astype(f32)

    def maxpool2(x):                               # MaxPool1d(2)
        pe, po = _half_mats(x.shape[1])
        return jnp.maximum(mm(x, pe), mm(x, po))

    def _scatter_mats(lx):                         # (lx, 2*lx) even/odd scatter
        r = jax.lax.broadcasted_iota(jnp.int32, (lx, 2 * lx), 0)
        c = jax.lax.broadcasted_iota(jnp.int32, (lx, 2 * lx), 1)
        return (c == 2 * r).astype(f32), (c == 2 * r + 1).astype(f32)

    def deconv2x(x, wa_ref, wb_ref, b_ref):        # ConvTranspose1d(k=2, s=2)
        y0 = mm(wa_ref[...], x) + b_ref[...]       # goes to even output lanes
        y1 = mm(wb_ref[...], x) + b_ref[...]       # goes to odd output lanes
        se, so = _scatter_mats(x.shape[1])
        return mm(y0, se) + mm(y1, so)

    x0 = x_ref[...]                                # (1, L)
    x1 = conv_same_selu(x0, w1, b1)                # (8, L)
    x2 = conv_same_selu(maxpool2(x1), w2, b2)      # (16, L/2)
    x3 = conv_same_selu(maxpool2(x2), w3, b3)      # (24, L/4)

    x_att2 = sigmoid(conv1x1(x2, wa2, ba2))        # (16, L/2)
    x_att1 = sigmoid(conv1x1(x1, wa1, ba1))        # (8, L)

    # up2: ConvTranspose -> ConvSELU -> (interpolate == identity) -> gate
    up2 = conv_same_selu(deconv2x(x3, wt2a, wt2b, bt2), wu2, bu2)   # (16, L/2)
    # TODO(synk): F.interpolate(mode='nearest') is an identity here (L % 4 == 0)
    up2 = up2 * x_att2

    up1 = conv_same_selu(deconv2x(up2, wt1a, wt1b, bt1), wu1, bu1)  # (8, L)
    up1 = up1 * x_att1

    logits = conv1x1(up1, wo, bo)                  # (3, L)
    m = jnp.max(logits, axis=0, keepdims=True)     # softmax over channel axis
    e = jnp.exp(logits - m)
    o_ref[...] = (e / jnp.sum(e, axis=0, keepdims=True)).astype(o_ref.dtype)


# ----------------------------------------------------------------------------
# Wrapper: BN folding + lane-dense weight packing + single pallas_call
# ----------------------------------------------------------------------------
def _fold_bn(w, b, gamma, beta, mean, var, eps=1e-5):
    s = gamma / jnp.sqrt(var + eps)
    return w * s[:, None, None], (b - mean) * s + beta


def _pack_conv(w, b):
    """(C_out, C_in, K), (C_out,) -> lane-dense (C_out, K*C_in), (C_out, 1)."""
    c_out, c_in, k = w.shape
    w2 = jnp.transpose(w, (0, 2, 1)).reshape(c_out, k * c_in)
    return w2, b.reshape(c_out, 1)


def attention_unet_forward(params, x):
    n, c_in, length = x.shape
    assert c_in == 1 and length % 4 == 0, (c_in, length)

    def conv_bn(name):
        w, b, g, be, m, v = params[name]
        return _pack_conv(*_fold_bn(w, b, g, be, m, v))

    w1, b1 = conv_bn("conv1")
    w2, b2 = conv_bn("conv2")
    w3, b3 = conv_bn("conv3")
    wa2, ba2 = conv_bn("att2")
    wa1, ba1 = conv_bn("att1")
    wu2, bu2 = conv_bn("up2_c")
    wu1, bu1 = conv_bn("up1_c")
    wo, bo = _pack_conv(*params["out"])

    wt2, bt2v = params["up2_t"]                    # (24, 16, 2), (16,)
    wt2a, wt2b = wt2[:, :, 0].T, wt2[:, :, 1].T    # (16, 24) each
    bt2 = bt2v.reshape(-1, 1)
    wt1, bt1v = params["up1_t"]                    # (16, 8, 2), (8,)
    wt1a, wt1b = wt1[:, :, 0].T, wt1[:, :, 1].T    # (8, 16) each
    bt1 = bt1v.reshape(-1, 1)

    weights = (w1, b1, w2, b2, w3, b3,
               wa2, ba2, wa1, ba1,
               wt2a, wt2b, bt2, wu2, bu2,
               wt1a, wt1b, bt1, wu1, bu1,
               wo, bo)

    def whole(a):  # full-array block, fetched once (block index never changes)
        return pl.BlockSpec(a.shape, lambda i: (0,) * a.ndim)

    return pl.pallas_call(
        _unet_kernel,
        out_shape=jax.ShapeDtypeStruct((n, 3, length), jnp.float32),
        grid=(n,),
        in_specs=[pl.BlockSpec((None, 1, length), lambda i: (i, 0, 0))]
                 + [whole(wgt) for wgt in weights],
        out_specs=pl.BlockSpec((None, 3, length), lambda i: (i, 0, 0)),
        scratch_shapes=[
            pltpu.VMEM((16, length + _K), jnp.float32),    # padded-input stage
            pltpu.VMEM((16 * _K, length), jnp.float32),    # im2col patch matrix
        ],
        compiler_params=pltpu.CompilerParams(
            dimension_semantics=("parallel",)),
    )(x, *weights)


# ----------------------------------------------------------------------------
# Parameters (deterministic synthetic init, PyTorch shapes)
# ----------------------------------------------------------------------------
def _uniform(key, shape, bound):
    return jax.random.uniform(key, shape, jnp.float32, -bound, bound)


def init_params(key):
    def conv_p(k, c_out, c_in, ks):
        k1, k2 = jax.random.split(k)
        bound = 1.0 / (c_in * ks) ** 0.5
        return (_uniform(k1, (c_out, c_in, ks), bound),
                _uniform(k2, (c_out,), bound))

    def deconv_p(k, c_in, c_out, ks):
        k1, k2 = jax.random.split(k)
        bound = 1.0 / (c_out * ks) ** 0.5
        return (_uniform(k1, (c_in, c_out, ks), bound),
                _uniform(k2, (c_out,), bound))

    def bn_p(c):
        # PyTorch defaults: weight=1, bias=0, running_mean=0, running_var=1
        return (jnp.ones((c,)), jnp.zeros((c,)), jnp.zeros((c,)), jnp.ones((c,)))

    ks = jax.random.split(key, 10)
    p = {}
    p["conv1"] = conv_p(ks[0], 8, 1, 16) + bn_p(8)
    p["conv2"] = conv_p(ks[1], 16, 8, 16) + bn_p(16)
    p["conv3"] = conv_p(ks[2], 24, 16, 16) + bn_p(24)
    p["att2"] = conv_p(ks[3], 16, 16, 1) + bn_p(16)
    p["att1"] = conv_p(ks[4], 8, 8, 1) + bn_p(8)
    p["up2_t"] = deconv_p(ks[5], 24, 16, 2)
    p["up2_c"] = conv_p(ks[6], 16, 16, 16) + bn_p(16)
    p["up1_t"] = deconv_p(ks[7], 16, 8, 2)
    p["up1_c"] = conv_p(ks[8], 8, 8, 16) + bn_p(8)
    p["out"] = conv_p(ks[9], 3, 8, 1)
    return p


if __name__ == "__main__":
    key = jax.random.PRNGKey(0)
    pkey, xkey = jax.random.split(key)
    params = init_params(pkey)
    x = jax.random.normal(xkey, (2, 1, 128), jnp.float32)   # (N, C=1, L)

    fwd = jax.jit(attention_unet_forward)
    out = jax.block_until_ready(fwd(params, x))

    assert out.shape == (2, 3, 128), out.shape
    assert bool(jnp.all(jnp.isfinite(out)))
    # softmax over channel axis must sum to 1
    assert bool(jnp.allclose(out.sum(axis=1), 1.0, atol=1e-4))
    print("KERNEL_OK")
</pallas_src>

<mosaic_0001>
module attributes {stable_mosaic.version = 11 : i64} {
  func.func @_unet_kernel(%arg0: i32, %arg1: memref<1x1x128xf32, #tpu.memory_space<vmem>>, %arg2: memref<8x16xf32, #tpu.memory_space<vmem>>, %arg3: memref<8x1xf32, #tpu.memory_space<vmem>>, %arg4: memref<16x128xf32, #tpu.memory_space<vmem>>, %arg5: memref<16x1xf32, #tpu.memory_space<vmem>>, %arg6: memref<24x256xf32, #tpu.memory_space<vmem>>, %arg7: memref<24x1xf32, #tpu.memory_space<vmem>>, %arg8: memref<16x16xf32, #tpu.memory_space<vmem>>, %arg9: memref<16x1xf32, #tpu.memory_space<vmem>>, %arg10: memref<8x8xf32, #tpu.memory_space<vmem>>, %arg11: memref<8x1xf32, #tpu.memory_space<vmem>>, %arg12: memref<16x24xf32, #tpu.memory_space<vmem>>, %arg13: memref<16x24xf32, #tpu.memory_space<vmem>>, %arg14: memref<16x1xf32, #tpu.memory_space<vmem>>, %arg15: memref<16x256xf32, #tpu.memory_space<vmem>>, %arg16: memref<16x1xf32, #tpu.memory_space<vmem>>, %arg17: memref<8x16xf32, #tpu.memory_space<vmem>>, %arg18: memref<8x16xf32, #tpu.memory_space<vmem>>, %arg19: memref<8x1xf32, #tpu.memory_space<vmem>>, %arg20: memref<8x128xf32, #tpu.memory_space<vmem>>, %arg21: memref<8x1xf32, #tpu.memory_space<vmem>>, %arg22: memref<3x8xf32, #tpu.memory_space<vmem>>, %arg23: memref<3x1xf32, #tpu.memory_space<vmem>>, %arg24: memref<1x3x128xf32, #tpu.memory_space<vmem>>, %arg25: memref<16x144xf32, #tpu.memory_space<vmem>>, %arg26: memref<256x128xf32, #tpu.memory_space<vmem>>) attributes {dimension_semantics = [#tpu.dimension_semantics<parallel>], iteration_bounds = array<i64: 2>, scalar_prefetch = 0 : i64, scratch_operands = 2 : i64, tpu.core_type = #tpu.core_type<tc>, window_params = [{transform_indices = @transform_0, window_bounds = array<i64: 1, 1, 128>}, {pipeline_mode = #tpu.pipeline_mode<synchronous>, transform_indices = @transform_1, window_bounds = array<i64: 8, 16>}, {pipeline_mode = #tpu.pipeline_mode<synchronous>, transform_indices = @transform_2, window_bounds = array<i64: 8, 1>}, {pipeline_mode = #tpu.pipeline_mode<synchronous>, transform_indices = @transform_3, window_bounds = array<i64: 16, 128>}, {pipeline_mode = #tpu.pipeline_mode<synchronous>, transform_indices = @transform_4, window_bounds = array<i64: 16, 1>}, {pipeline_mode = #tpu.pipeline_mode<synchronous>, transform_indices = @transform_5, window_bounds = array<i64: 24, 256>}, {pipeline_mode = #tpu.pipeline_mode<synchronous>, transform_indices = @transform_6, window_bounds = array<i64: 24, 1>}, {pipeline_mode = #tpu.pipeline_mode<synchronous>, transform_indices = @transform_7, window_bounds = array<i64: 16, 16>}, {pipeline_mode = #tpu.pipeline_mode<synchronous>, transform_indices = @transform_8, window_bounds = array<i64: 16, 1>}, {pipeline_mode = #tpu.pipeline_mode<synchronous>, transform_indices = @transform_9, window_bounds = array<i64: 8, 8>}, {pipeline_mode = #tpu.pipeline_mode<synchronous>, transform_indices = @transform_10, window_bounds = array<i64: 8, 1>}, {pipeline_mode = #tpu.pipeline_mode<synchronous>, transform_indices = @transform_11, window_bounds = array<i64: 16, 24>}, {pipeline_mode = #tpu.pipeline_mode<synchronous>, transform_indices = @transform_12, window_bounds = array<i64: 16, 24>}, {pipeline_mode = #tpu.pipeline_mode<synchronous>, transform_indices = @transform_13, window_bounds = array<i64: 16, 1>}, {pipeline_mode = #tpu.pipeline_mode<synchronous>, transform_indices = @transform_14, window_bounds = array<i64: 16, 256>}, {pipeline_mode = #tpu.pipeline_mode<synchronous>, transform_indices = @transform_15, window_bounds = array<i64: 16, 1>}, {pipeline_mode = #tpu.pipeline_mode<synchronous>, transform_indices = @transform_16, window_bounds = array<i64: 8, 16>}, {pipeline_mode = #tpu.pipeline_mode<synchronous>, transform_indices = @transform_17, window_bounds = array<i64: 8, 16>}, {pipeline_mode = #tpu.pipeline_mode<synchronous>, transform_indices = @transform_18, window_bounds = array<i64: 8, 1>}, {pipeline_mode = #tpu.pipeline_mode<synchronous>, transform_indices = @transform_19, window_bounds = array<i64: 8, 128>}, {pipeline_mode = #tpu.pipeline_mode<synchronous>, transform_indices = @transform_20, window_bounds = array<i64: 8, 1>}, {pipeline_mode = #tpu.pipeline_mode<synchronous>, transform_indices = @transform_21, window_bounds = array<i64: 3, 8>}, {pipeline_mode = #tpu.pipeline_mode<synchronous>, transform_indices = @transform_22, window_bounds = array<i64: 3, 1>}, {transform_indices = @transform_23, window_bounds = array<i64: 1, 3, 128>}]} {
    %c0 = arith.constant 0 : index
    %c0_0 = arith.constant 0 : index
    %c0_1 = arith.constant 0 : index
    %0 = vector.load %arg1[%c0, %c0_0, %c0_1] : memref<1x1x128xf32, #tpu.memory_space<vmem>>, vector<1x1x128xf32>
    %1 = vector.shape_cast %0 : vector<1x1x128xf32> to vector<1x128xf32>
    %cst = arith.constant 0.000000e+00 : f32
    %2 = vector.broadcast %cst : f32 to vector<16x144xf32>
    %c0_2 = arith.constant 0 : index
    %c0_3 = arith.constant 0 : index
    %3 = vector.load %arg25[%c0_2, %c0_3] : memref<16x144xf32, #tpu.memory_space<vmem>>, vector<16x144xf32>
    tpu.vector_store %arg25[%c0_2, %c0_3], %2 {strides = array<i32>} : memref<16x144xf32, #tpu.memory_space<vmem>>, vector<16x144xf32>,
    %c0_4 = arith.constant 0 : index
    %c7 = arith.constant 7 : index
    %4 = vector.load %arg25[%c0_4, %c7] : memref<16x144xf32, #tpu.memory_space<vmem>>, vector<1x128xf32>
    tpu.vector_store %arg25[%c0_4, %c7], %1 {strides = array<i32>} : memref<16x144xf32, #tpu.memory_space<vmem>>, vector<1x128xf32>,
    %c0_5 = arith.constant 0 : index
    %c0_6 = arith.constant 0 : index
    %5 = vector.load %arg25[%c0_5, %c0_6] : memref<16x144xf32, #tpu.memory_space<vmem>>, vector<1x128xf32>
    %c0_7 = arith.constant 0 : index
    %c0_8 = arith.constant 0 : index
    %6 = vector.load %arg26[%c0_7, %c0_8] : memref<256x128xf32, #tpu.memory_space<vmem>>, vector<1x128xf32>
    tpu.vector_store %arg26[%c0_7, %c0_8], %5 {strides = array<i32>} : memref<256x128xf32, #tpu.memory_space<vmem>>, vector<1x128xf32>,
    %c0_9 = arith.constant 0 : index
    %c1 = arith.constant 1 : index
    %7 = vector.load %arg25[%c0_9, %c1] : memref<16x144xf32, #tpu.memory_space<vmem>>, vector<1x128xf32>
    %c1_10 = arith.constant 1 : index
    %c0_11 = arith.constant 0 : index
    %8 = vector.load %arg26[%c1_10, %c0_11] : memref<256x128xf32, #tpu.memory_space<vmem>>, vector<1x128xf32>
    tpu.vector_store %arg26[%c1_10, %c0_11], %7 {strides = array<i32>} : memref<256x128xf32, #tpu.memory_space<vmem>>, vector<1x128xf32>,
    %c0_12 = arith.constant 0 : index
    %c2 = arith.constant 2 : index
    %9 = vector.load %arg25[%c0_12, %c2] : memref<16x144xf32, #tpu.memory_space<vmem>>, vector<1x128xf32>
    %c2_13 = arith.constant 2 : index
    %c0_14 = arith.constant 0 : index
    %10 = vector.load %arg26[%c2_13, %c0_14] : memref<256x128xf32, #tpu.memory_space<vmem>>, vector<1x128xf32>
    tpu.vector_store %arg26[%c2_13, %c0_14], %9 {strides = array<i32>} : memref<256x128xf32, #tpu.memory_space<vmem>>, vector<1x128xf32>,
    %c0_15 = arith.constant 0 : index
    %c3 = arith.constant 3 : index
    %11 = vector.load %arg25[%c0_15, %c3] : memref<16x144xf32, #tpu.memory_space<vmem>>, vector<1x128xf32>
    %c3_16 = arith.constant 3 : index
    %c0_17 = arith.constant 0 : index
    %12 = vector.load %arg26[%c3_16, %c0_17] : memref<256x128xf32, #tpu.memory_space<vmem>>, vector<1x128xf32>
    tpu.vector_store %arg26[%c3_16, %c0_17], %11 {strides = array<i32>} : memref<256x128xf32, #tpu.memory_space<vmem>>, vector<1x128xf32>,
    %c0_18 = arith.constant 0 : index
    %c4 = arith.constant 4 : index
    %13 = vector.load %arg25[%c0_18, %c4] : memref<16x144xf32, #tpu.memory_space<vmem>>, vector<1x128xf32>
    %c4_19 = arith.constant 4 : index
    %c0_20 = arith.constant 0 : index
    %14 = vector.load %arg26[%c4_19, %c0_20] : memref<256x128xf32, #tpu.memory_space<vmem>>, vector<1x128xf32>
    tpu.vector_store %arg26[%c4_19, %c0_20], %13 {strides = array<i32>} : memref<256x128xf32, #tpu.memory_space<vmem>>, vector<1x128xf32>,
    %c0_21 = arith.constant 0 : index
    %c5 = arith.constant 5 : index
    %15 = vector.load %arg25[%c0_21, %c5] : memref<16x144xf32, #tpu.memory_space<vmem>>, vector<1x128xf32>
    %c5_22 = arith.constant 5 : index
    %c0_23 = arith.constant 0 : index
    %16 = vector.load %arg26[%c5_22, %c0_23] : memref<256x128xf32, #tpu.memory_space<vmem>>, vector<1x128xf32>
    tpu.vector_store %arg26[%c5_22, %c0_23], %15 {strides = array<i32>} : memref<256x128xf32, #tpu.memory_space<vmem>>, vector<1x128xf32>,
    %c0_24 = arith.constant 0 : index
    %c6 = arith.constant 6 : index
    %17 = vector.load %arg25[%c0_24, %c6] : memref<16x144xf32, #tpu.memory_space<vmem>>, vector<1x128xf32>
    %c6_25 = arith.constant 6 : index
    %c0_26 = arith.constant 0 : index
    %18 = vector.load %arg26[%c6_25, %c0_26] : memref<256x128xf32, #tpu.memory_space<vmem>>, vector<1x128xf32>
    tpu.vector_store %arg26[%c6_25, %c0_26], %17 {strides = array<i32>} : memref<256x128xf32, #tpu.memory_space<vmem>>, vector<1x128xf32>,
    %c0_27 = arith.constant 0 : index
    %c7_28 = arith.constant 7 : index
    %19 = vector.load %arg25[%c0_27, %c7_28] : memref<16x144xf32, #tpu.memory_space<vmem>>, vector<1x128xf32>
    %c7_29 = arith.constant 7 : index
    %c0_30 = arith.constant 0 : index
    %20 = vector.load %arg26[%c7_29, %c0_30] : memref<256x128xf32, #tpu.memory_space<vmem>>, vector<1x128xf32>
    tpu.vector_store %arg26[%c7_29, %c0_30], %19 {strides = array<i32>} : memref<256x128xf32, #tpu.memory_space<vmem>>, vector<1x128xf32>,
    %c0_31 = arith.constant 0 : index
    %c8 = arith.constant 8 : index
    %21 = vector.load %arg25[%c0_31, %c8] : memref<16x144xf32, #tpu.memory_space<vmem>>, vector<1x128xf32>
    %c8_32 = arith.constant 8 : index
    %c0_33 = arith.constant 0 : index
    %22 = vector.load %arg26[%c8_32, %c0_33] : memref<256x128xf32, #tpu.memory_space<vmem>>, vector<1x128xf32>
    tpu.vector_store %arg26[%c8_32, %c0_33], %21 {strides = array<i32>} : memref<256x128xf32, #tpu.memory_space<vmem>>, vector<1x128xf32>,
    %c0_34 = arith.constant 0 : index
    %c9 = arith.constant 9 : index
    %23 = vector.load %arg25[%c0_34, %c9] : memref<16x144xf32, #tpu.memory_space<vmem>>, vector<1x128xf32>
    %c9_35 = arith.constant 9 : index
    %c0_36 = arith.constant 0 : index
    %24 = vector.load %arg26[%c9_35, %c0_36] : memref<256x128xf32, #tpu.memory_space<vmem>>, vector<1x128xf32>
    tpu.vector_store %arg26[%c9_35, %c0_36], %23 {strides = array<i32>} : memref<256x128xf32, #tpu.memory_space<vmem>>, vector<1x128xf32>,
    %c0_37 = arith.constant 0 : index
    %c10 = arith.constant 10 : index
    %25 = vector.load %arg25[%c0_37, %c10] : memref<16x144xf32, #tpu.memory_space<vmem>>, vector<1x128xf32>
    %c10_38 = arith.constant 10 : index
    %c0_39 = arith.constant 0 : index
    %26 = vector.load %arg26[%c10_38, %c0_39] : memref<256x128xf32, #tpu.memory_space<vmem>>, vector<1x128xf32>
    tpu.vector_store %arg26[%c10_38, %c0_39], %25 {strides = array<i32>} : memref<256x128xf32, #tpu.memory_space<vmem>>, vector<1x128xf32>,
    %c0_40 = arith.constant 0 : index
    %c11 = arith.constant 11 : index
    %27 = vector.load %arg25[%c0_40, %c11] : memref<16x144xf32, #tpu.memory_space<vmem>>, vector<1x128xf32>
    %c11_41 = arith.constant 11 : index
    %c0_42 = arith.constant 0 : index
    %28 = vector.load %arg26[%c11_41, %c0_42] : memref<256x128xf32, #tpu.memory_space<vmem>>, vector<1x128xf32>
    tpu.vector_store %arg26[%c11_41, %c0_42], %27 {strides = array<i32>} : memref<256x128xf32, #tpu.memory_space<vmem>>, vector<1x128xf32>,
    %c0_43 = arith.constant 0 : index
    %c12 = arith.constant 12 : index
    %29 = vector.load %arg25[%c0_43, %c12] : memref<16x144xf32, #tpu.memory_space<vmem>>, vector<1x128xf32>
    %c12_44 = arith.constant 12 : index
    %c0_45 = arith.constant 0 : index
    %30 = vector.load %arg26[%c12_44, %c0_45] : memref<256x128xf32, #tpu.memory_space<vmem>>, vector<1x128xf32>
    tpu.vector_store %arg26[%c12_44, %c0_45], %29 {strides = array<i32>} : memref<256x128xf32, #tpu.memory_space<vmem>>, vector<1x128xf32>,
    %c0_46 = arith.constant 0 : index
    %c13 = arith.constant 13 : index
    %31 = vector.load %arg25[%c0_46, %c13] : memref<16x144xf32, #tpu.memory_space<vmem>>, vector<1x128xf32>
    %c13_47 = arith.constant 13 : index
    %c0_48 = arith.constant 0 : index
    %32 = vector.load %arg26[%c13_47, %c0_48] : memref<256x128xf32, #tpu.memory_space<vmem>>, vector<1x128xf32>
    tpu.vector_store %arg26[%c13_47, %c0_48], %31 {strides = array<i32>} : memref<256x128xf32, #tpu.memory_space<vmem>>, vector<1x128xf32>,
    %c0_49 = arith.constant 0 : index
    %c14 = arith.constant 14 : index
    %33 = vector.load %arg25[%c0_49, %c14] : memref<16x144xf32, #tpu.memory_space<vmem>>, vector<1x128xf32>
    %c14_50 = arith.constant 14 : index
    %c0_51 = arith.constant 0 : index
    %34 = vector.load %arg26[%c14_50, %c0_51] : memref<256x128xf32, #tpu.memory_space<vmem>>, vector<1x128xf32>
    tpu.vector_store %arg26[%c14_50, %c0_51], %33 {strides = array<i32>} : memref<256x128xf32, #tpu.memory_space<vmem>>, vector<1x128xf32>,
    %c0_52 = arith.constant 0 : index
    %c15 = arith.constant 15 : index
    %35 = vector.load %arg25[%c0_52, %c15] : memref<16x144xf32, #tpu.memory_space<vmem>>, vector<1x128xf32>
    %c15_53 = arith.constant 15 : index
    %c0_54 = arith.constant 0 : index
    %36 = vector.load %arg26[%c15_53, %c0_54] : memref<256x128xf32, #tpu.memory_space<vmem>>, vector<1x128xf32>
    tpu.vector_store %arg26[%c15_53, %c0_54], %35 {strides = array<i32>} : memref<256x128xf32, #tpu.memory_space<vmem>>, vector<1x128xf32>,
    %c0_55 = arith.constant 0 : index
    %c0_56 = arith.constant 0 : index
    %37 = vector.load %arg2[%c0_55, %c0_56] : memref<8x16xf32, #tpu.memory_space<vmem>>, vector<8x16xf32>
    %c0_57 = arith.constant 0 : index
    %c0_58 = arith.constant 0 : index
    %38 = vector.load %arg26[%c0_57, %c0_58] : memref<256x128xf32, #tpu.memory_space<vmem>>, vector<16x128xf32>
    %cst_59 = arith.constant dense<0.000000e+00> : vector<8x128xf32>
    %39 = tpu.matmul %37, %38, %cst_59 {dimension_numbers = #tpu.dot_dimension_numbers<[1], [0], [0], [1], [0, 0, 1, 1], [], []>} : vector<8x16xf32>, vector<16x128xf32>, vector<8x128xf32> -> vector<8x128xf32>
    %c0_60 = arith.constant 0 : index
    %c0_61 = arith.constant 0 : index
    %40 = vector.load %arg3[%c0_60, %c0_61] : memref<8x1xf32, #tpu.memory_space<vmem>>, vector<8x1xf32>
    %41 = vector.broadcast %40 : vector<8x1xf32> to vector<8x128xf32>
    %42 = arith.addf %39, %41 : vector<8x128xf32>
    %cst_62 = arith.constant 0.000000e+00 : f32
    %43 = vector.broadcast %cst_62 : f32 to vector<8x128xf32>
    %44 = arith.cmpf ogt, %42, %43 : vector<8x128xf32>
    %cst_63 = arith.constant 0.000000e+00 : f32
    %45 = vector.broadcast %cst_63 : f32 to vector<8x128xf32>
    %46 = arith.minimumf %42, %45 : vector<8x128xf32>
    %47 = math.exp %46 : vector<8x128xf32>
    %cst_64 = arith.constant 1.000000e+00 : f32
    %48 = vector.broadcast %cst_64 : f32 to vector<8x128xf32>
    %49 = arith.subf %47, %48 : vector<8x128xf32>
    %cst_65 = arith.constant 1.67326319 : f32
    %50 = vector.broadcast %cst_65 : f32 to vector<8x128xf32>
    %51 = arith.mulf %50, %49 : vector<8x128xf32>
    %52 = arith.select %44, %42, %51 : vector<8x128xi1>, vector<8x128xf32>
    %cst_66 = arith.constant 1.05070102 : f32
    %53 = vector.broadcast %cst_66 : f32 to vector<8x128xf32>
    %54 = arith.mulf %53, %52 : vector<8x128xf32>
    %55 = tpu.iota {dimensions = array<i32: 0>} : vector<128x64xi32>
    %56 = tpu.iota {dimensions = array<i32: 1>} : vector<128x64xi32>
    %c2_i32 = arith.constant 2 : i32
    %57 = vector.broadcast %c2_i32 : i32 to vector<128x64xi32>
    %58 = arith.muli %57, %56 : vector<128x64xi32>
    %59 = arith.cmpi eq, %55, %58 : vector<128x64xi32>
    %60 = arith.extui %59 : vector<128x64xi1> to vector<128x64xi32>
    %61 = arith.sitofp %60 : vector<128x64xi32> to vector<128x64xf32>
    %c2_i32_67 = arith.constant 2 : i32
    %62 = vector.broadcast %c2_i32_67 : i32 to vector<128x64xi32>
    %63 = arith.muli %62, %56 : vector<128x64xi32>
    %c1_i32 = arith.constant 1 : i32
    %64 = vector.broadcast %c1_i32 : i32 to vector<128x64xi32>
    %65 = arith.addi %63, %64 : vector<128x64xi32>
    %66 = arith.cmpi eq, %55, %65 : vector<128x64xi32>
    %67 = arith.extui %66 : vector<128x64xi1> to vector<128x64xi32>
    %68 = arith.sitofp %67 : vector<128x64xi32> to vector<128x64xf32>
    %cst_68 = arith.constant dense<0.000000e+00> : vector<8x64xf32>
    %69 = tpu.matmul %54, %61, %cst_68 {dimension_numbers = #tpu.dot_dimension_numbers<[1], [0], [0], [1], [0, 0, 1, 1], [], []>} : vector<8x128xf32>, vector<128x64xf32>, vector<8x64xf32> -> vector<8x64xf32>
    %cst_69 = arith.constant dense<0.000000e+00> : vector<8x64xf32>
    %70 = tpu.matmul %54, %68, %cst_69 {dimension_numbers = #tpu.dot_dimension_numbers<[1], [0], [0], [1], [0, 0, 1, 1], [], []>} : vector<8x128xf32>, vector<128x64xf32>, vector<8x64xf32> -> vector<8x64xf32>
    %71 = arith.maximumf %69, %70 : vector<8x64xf32>
    %cst_70 = arith.constant 0.000000e+00 : f32
    %72 = vector.broadcast %cst_70 : f32 to vector<16x144xf32>
    %c0_71 = arith.constant 0 : index
    %c0_72 = arith.constant 0 : index
    %73 = vector.load %arg25[%c0_71, %c0_72] : memref<16x144xf32, #tpu.memory_space<vmem>>, vector<16x144xf32>
    tpu.vector_store %arg25[%c0_71, %c0_72], %72 {strides = array<i32>} : memref<16x144xf32, #tpu.memory_space<vmem>>, vector<16x144xf32>,
    %c0_73 = arith.constant 0 : index
    %c7_74 = arith.constant 7 : index
    %74 = vector.load %arg25[%c0_73, %c7_74] : memref<16x144xf32, #tpu.memory_space<vmem>>, vector<8x64xf32>
    tpu.vector_store %arg25[%c0_73, %c7_74], %71 {strides = array<i32>} : memref<16x144xf32, #tpu.memory_space<vmem>>, vector<8x64xf32>,
    %c0_75 = arith.constant 0 : index
    %c0_76 = arith.constant 0 : index
    %75 = vector.load %arg25[%c0_75, %c0_76] : memref<16x144xf32, #tpu.memory_space<vmem>>, vector<8x64xf32>
    %c0_77 = arith.constant 0 : index
    %c0_78 = arith.constant 0 : index
    %76 = vector.load %arg26[%c0_77, %c0_78] : memref<256x128xf32, #tpu.memory_space<vmem>>, vector<8x64xf32>
    tpu.vector_store %arg26[%c0_77, %c0_78], %75 {strides = array<i32>} : memref<256x128xf32, #tpu.memory_space<vmem>>, vector<8x64xf32>,
    %c0_79 = arith.constant 0 : index
    %c1_80 = arith.constant 1 : index
    %77 = vector.load %arg25[%c0_79, %c1_80] : memref<16x144xf32, #tpu.memory_space<vmem>>, vector<8x64xf32>
    %c8_81 = arith.constant 8 : index
    %c0_82 = arith.constant 0 : index
    %78 = vector.load %arg26[%c8_81, %c0_82] : memref<256x128xf32, #tpu.memory_space<vmem>>, vector<8x64xf32>
    tpu.vector_store %arg26[%c8_81, %c0_82], %77 {strides = array<i32>} : memref<256x128xf32, #tpu.memory_space<vmem>>, vector<8x64xf32>,
    %c0_83 = arith.constant 0 : index
    %c2_84 = arith.constant 2 : index
    %79 = vector.load %arg25[%c0_83, %c2_84] : memref<16x144xf32, #tpu.memory_space<vmem>>, vector<8x64xf32>
    %c16 = arith.constant 16 : index
    %c0_85 = arith.constant 0 : index
    %80 = vector.load %arg26[%c16, %c0_85] : memref<256x128xf32, #tpu.memory_space<vmem>>, vector<8x64xf32>
    tpu.vector_store %arg26[%c16, %c0_85], %79 {strides = array<i32>} : memref<256x128xf32, #tpu.memory_space<vmem>>, vector<8x64xf32>,
    %c0_86 = arith.constant 0 : index
    %c3_87 = arith.constant 3 : index
    %81 = vector.load %arg25[%c0_86, %c3_87] : memref<16x144xf32, #tpu.memory_space<vmem>>, vector<8x64xf32>
    %c24 = arith.constant 24 : index
    %c0_88 = arith.constant 0 : index
    %82 = vector.load %arg26[%c24, %c0_88] : memref<256x128xf32, #tpu.memory_space<vmem>>, vector<8x64xf32>
    tpu.vector_store %arg26[%c24, %c0_88], %81 {strides = array<i32>} : memref<256x128xf32, #tpu.memory_space<vmem>>, vector<8x64xf32>,
    %c0_89 = arith.constant 0 : index
    %c4_90 = arith.constant 4 : index
    %83 = vector.load %arg25[%c0_89, %c4_90] : memref<16x144xf32, #tpu.memory_space<vmem>>, vector<8x64xf32>
    %c32 = arith.constant 32 : index
    %c0_91 = arith.constant 0 : index
    %84 = vector.load %arg26[%c32, %c0_91] : memref<256x128xf32, #tpu.memory_space<vmem>>, vector<8x64xf32>
    tpu.vector_store %arg26[%c32, %c0_91], %83 {strides = array<i32>} : memref<256x128xf32, #tpu.memory_space<vmem>>, vector<8x64xf32>,
    %c0_92 = arith.constant 0 : index
    %c5_93 = arith.constant 5 : index
    %85 = vector.load %arg25[%c0_92, %c5_93] : memref<16x144xf32, #tpu.memory_space<vmem>>, vector<8x64xf32>
    %c40 = arith.constant 40 : index
    %c0_94 = arith.constant 0 : index
    %86 = vector.load %arg26[%c40, %c0_94] : memref<256x128xf32, #tpu.memory_space<vmem>>, vector<8x64xf32>
    tpu.vector_store %arg26[%c40, %c0_94], %85 {strides = array<i32>} : memref<256x128xf32, #tpu.memory_space<vmem>>, vector<8x64xf32>,
    %c0_95 = arith.constant 0 : index
    %c6_96 = arith.constant 6 : index
    %87 = vector.load %arg25[%c0_95, %c6_96] : memref<16x144xf32, #tpu.memory_space<vmem>>, vector<8x64xf32>
    %c48 = arith.constant 48 : index
    %c0_97 = arith.constant 0 : index
    %88 = vector.load %arg26[%c48, %c0_97] : memref<256x128xf32, #tpu.memory_space<vmem>>, vector<8x64xf32>
    tpu.vector_store %arg26[%c48, %c0_97], %87 {strides = array<i32>} : memref<256x128xf32, #tpu.memory_space<vmem>>, vector<8x64xf32>,
    %c0_98 = arith.constant 0 : index
    %c7_99 = arith.constant 7 : index
    %89 = vector.load %arg25[%c0_98, %c7_99] : memref<16x144xf32, #tpu.memory_space<vmem>>, vector<8x64xf32>
    %c56 = arith.constant 56 : index
    %c0_100 = arith.constant 0 : index
    %90 = vector.load %arg26[%c56, %c0_100] : memref<256x128xf32, #tpu.memory_space<vmem>>, vector<8x64xf32>
    tpu.vector_store %arg26[%c56, %c0_100], %89 {strides = array<i32>} : memref<256x128xf32, #tpu.memory_space<vmem>>, vector<8x64xf32>,
    %c0_101 = arith.constant 0 : index
    %c8_102 = arith.constant 8 : index
    %91 = vector.load %arg25[%c0_101, %c8_102] : memref<16x144xf32, #tpu.memory_space<vmem>>, vector<8x64xf32>
    %c64 = arith.constant 64 : index
    %c0_103 = arith.constant 0 : index
    %92 = vector.load %arg26[%c64, %c0_103] : memref<256x128xf32, #tpu.memory_space<vmem>>, vector<8x64xf32>
    tpu.vector_store %arg26[%c64, %c0_103], %91 {strides = array<i32>} : memref<256x128xf32, #tpu.memory_space<vmem>>, vector<8x64xf32>,
    %c0_104 = arith.constant 0 : index
    %c9_105 = arith.constant 9 : index
    %93 = vector.load %arg25[%c0_104, %c9_105] : memref<16x144xf32, #tpu.memory_space<vmem>>, vector<8x64xf32>
    %c72 = arith.constant 72 : index
    %c0_106 = arith.constant 0 : index
    %94 = vector.load %arg26[%c72, %c0_106] : memref<256x128xf32, #tpu.memory_space<vmem>>, vector<8x64xf32>
    tpu.vector_store %arg26[%c72, %c0_106], %93 {strides = array<i32>} : memref<256x128xf32, #tpu.memory_space<vmem>>, vector<8x64xf32>,
    %c0_107 = arith.constant 0 : index
    %c10_108 = arith.constant 10 : index
    %95 = vector.load %arg25[%c0_107, %c10_108] : memref<16x144xf32, #tpu.memory_space<vmem>>, vector<8x64xf32>
    %c80 = arith.constant 80 : index
    %c0_109 = arith.constant 0 : index
    %96 = vector.load %arg26[%c80, %c0_109] : memref<256x128xf32, #tpu.memory_space<vmem>>, vector<8x64xf32>
    tpu.vector_store %arg26[%c80, %c0_109], %95 {strides = array<i32>} : memref<256x128xf32, #tpu.memory_space<vmem>>, vector<8x64xf32>,
    %c0_110 = arith.constant 0 : index
    %c11_111 = arith.constant 11 : index
    %97 = vector.load %arg25[%c0_110, %c11_111] : memref<16x144xf32, #tpu.memory_space<vmem>>, vector<8x64xf32>
    %c88 = arith.constant 88 : index
    %c0_112 = arith.constant 0 : index
    %98 = vector.load %arg26[%c88, %c0_112] : memref<256x128xf32, #tpu.memory_space<vmem>>, vector<8x64xf32>
    tpu.vector_store %arg26[%c88, %c0_112], %97 {strides = array<i32>} : memref<256x128xf32, #tpu.memory_space<vmem>>, vector<8x64xf32>,
    %c0_113 = arith.constant 0 : index
    %c12_114 = arith.constant 12 : index
    %99 = vector.load %arg25[%c0_113, %c12_114] : memref<16x144xf32, #tpu.memory_space<vmem>>, vector<8x64xf32>
    %c96 = arith.constant 96 : index
    %c0_115 = arith.constant 0 : index
    %100 = vector.load %arg26[%c96, %c0_115] : memref<256x128xf32, #tpu.memory_space<vmem>>, vector<8x64xf32>
    tpu.vector_store %arg26[%c96, %c0_115], %99 {strides = array<i32>} : memref<256x128xf32, #tpu.memory_space<vmem>>, vector<8x64xf32>,
    %c0_116 = arith.constant 0 : index
    %c13_117 = arith.constant 13 : index
    %101 = vector.load %arg25[%c0_116, %c13_117] : memref<16x144xf32, #tpu.memory_space<vmem>>, vector<8x64xf32>
    %c104 = arith.constant 104 : index
    %c0_118 = arith.constant 0 : index
    %102 = vector.load %arg26[%c104, %c0_118] : memref<256x128xf32, #tpu.memory_space<vmem>>, vector<8x64xf32>
    tpu.vector_store %arg26[%c104, %c0_118], %101 {strides = array<i32>} : memref<256x128xf32, #tpu.memory_space<vmem>>, vector<8x64xf32>,
    %c0_119 = arith.constant 0 : index
    %c14_120 = arith.constant 14 : index
    %103 = vector.load %arg25[%c0_119, %c14_120] : memref<16x144xf32, #tpu.memory_space<vmem>>, vector<8x64xf32>
    %c112 = arith.constant 112 : index
    %c0_121 = arith.constant 0 : index
    %104 = vector.load %arg26[%c112, %c0_121] : memref<256x128xf32, #tpu.memory_space<vmem>>, vector<8x64xf32>
    tpu.vector_store %arg26[%c112, %c0_121], %103 {strides = array<i32>} : memref<256x128xf32, #tpu.memory_space<vmem>>, vector<8x64xf32>,
    %c0_122 = arith.constant 0 : index
    %c15_123 = arith.constant 15 : index
    %105 = vector.load %arg25[%c0_122, %c15_123] : memref<16x144xf32, #tpu.memory_space<vmem>>, vector<8x64xf32>
    %c120 = arith.constant 120 : index
    %c0_124 = arith.constant 0 : index
    %106 = vector.load %arg26[%c120, %c0_124] : memref<256x128xf32, #tpu.memory_space<vmem>>, vector<8x64xf32>
    tpu.vector_store %arg26[%c120, %c0_124], %105 {strides = array<i32>} : memref<256x128xf32, #tpu.memory_space<vmem>>, vector<8x64xf32>,
    %c0_125 = arith.constant 0 : index
    %c0_126 = arith.constant 0 : index
    %107 = vector.load %arg4[%c0_125, %c0_126] : memref<16x128xf32, #tpu.memory_space<vmem>>, vector<16x128xf32>
    %c0_127 = arith.constant 0 : index
    %c0_128 = arith.constant 0 : index
    %108 = vector.load %arg26[%c0_127, %c0_128] : memref<256x128xf32, #tpu.memory_space<vmem>>, vector<128x64xf32>
    %cst_129 = arith.constant dense<0.000000e+00> : vector<16x64xf32>
    %109 = tpu.matmul %107, %108, %cst_129 {dimension_numbers = #tpu.dot_dimension_numbers<[1], [0], [0], [1], [0, 0, 1, 1], [], []>} : vector<16x128xf32>, vector<128x64xf32>, vector<16x64xf32> -> vector<16x64xf32>
    %c0_130 = arith.constant 0 : index
    %c0_131 = arith.constant 0 : index
    %110 = vector.load %arg5[%c0_130, %c0_131] : memref<16x1xf32, #tpu.memory_space<vmem>>, vector<16x1xf32>
    %111 = vector.broadcast %110 : vector<16x1xf32> to vector<16x64xf32>
    %112 = arith.addf %109, %111 : vector<16x64xf32>
    %cst_132 = arith.constant 0.000000e+00 : f32
    %113 = vector.broadcast %cst_132 : f32 to vector<16x64xf32>
    %114 = arith.cmpf ogt, %112, %113 : vector<16x64xf32>
    %cst_133 = arith.constant 0.000000e+00 : f32
    %115 = vector.broadcast %cst_133 : f32 to vector<16x64xf32>
    %116 = arith.minimumf %112, %115 : vector<16x64xf32>
    %117 = math.exp %116 : vector<16x64xf32>
    %cst_134 = arith.constant 1.000000e+00 : f32
    %118 = vector.broadcast %cst_134 : f32 to vector<16x64xf32>
    %119 = arith.subf %117, %118 : vector<16x64xf32>
    %cst_135 = arith.constant 1.67326319 : f32
    %120 = vector.broadcast %cst_135 : f32 to vector<16x64xf32>
    %121 = arith.mulf %120, %119 : vector<16x64xf32>
    %122 = arith.select %114, %112, %121 : vector<16x64xi1>, vector<16x64xf32>
    %cst_136 = arith.constant 1.05070102 : f32
    %123 = vector.broadcast %cst_136 : f32 to vector<16x64xf32>
    %124 = arith.mulf %123, %122 : vector<16x64xf32>
    %125 = tpu.iota {dimensions = array<i32: 0>} : vector<64x32xi32>
    %126 = tpu.iota {dimensions = array<i32: 1>} : vector<64x32xi32>
    %c2_i32_137 = arith.constant 2 : i32
    %127 = vector.broadcast %c2_i32_137 : i32 to vector<64x32xi32>
    %128 = arith.muli %127, %126 : vector<64x32xi32>
    %129 = arith.cmpi eq, %125, %128 : vector<64x32xi32>
    %130 = arith.extui %129 : vector<64x32xi1> to vector<64x32xi32>
    %131 = arith.sitofp %130 : vector<64x32xi32> to vector<64x32xf32>
    %c2_i32_138 = arith.constant 2 : i32
    %132 = vector.broadcast %c2_i32_138 : i32 to vector<64x32xi32>
    %133 = arith.muli %132, %126 : vector<64x32xi32>
    %c1_i32_139 = arith.constant 1 : i32
    %134 = vector.broadcast %c1_i32_139 : i32 to vector<64x32xi32>
    %135 = arith.addi %133, %134 : vector<64x32xi32>
    %136 = arith.cmpi eq, %125, %135 : vector<64x32xi32>
    %137 = arith.extui %136 : vector<64x32xi1> to vector<64x32xi32>
    %138 = arith.sitofp %137 : vector<64x32xi32> to vector<64x32xf32>
    %cst_140 = arith.constant dense<0.000000e+00> : vector<16x32xf32>
    %139 = tpu.matmul %124, %131, %cst_140 {dimension_numbers = #tpu.dot_dimension_numbers<[1], [0], [0], [1], [0, 0, 1, 1], [], []>} : vector<16x64xf32>, vector<64x32xf32>, vector<16x32xf32> -> vector<16x32xf32>
    %cst_141 = arith.constant dense<0.000000e+00> : vector<16x32xf32>
    %140 = tpu.matmul %124, %138, %cst_141 {dimension_numbers = #tpu.dot_dimension_numbers<[1], [0], [0], [1], [0, 0, 1, 1], [], []>} : vector<16x64xf32>, vector<64x32xf32>, vector<16x32xf32> -> vector<16x32xf32>
    %141 = arith.maximumf %139, %140 : vector<16x32xf32>
    %cst_142 = arith.constant 0.000000e+00 : f32
    %142 = vector.broadcast %cst_142 : f32 to vector<16x144xf32>
    %c0_143 = arith.constant 0 : index
    %c0_144 = arith.constant 0 : index
    %143 = vector.load %arg25[%c0_143, %c0_144] : memref<16x144xf32, #tpu.memory_space<vmem>>, vector<16x144xf32>
    tpu.vector_store %arg25[%c0_143, %c0_144], %142 {strides = array<i32>} : memref<16x144xf32, #tpu.memory_space<vmem>>, vector<16x144xf32>,
    %c0_145 = arith.constant 0 : index
    %c7_146 = arith.constant 7 : index
    %144 = vector.load %arg25[%c0_145, %c7_146] : memref<16x144xf32, #tpu.memory_space<vmem>>, vector<16x32xf32>
    tpu.vector_store %arg25[%c0_145, %c7_146], %141 {strides = array<i32>} : memref<16x144xf32, #tpu.memory_space<vmem>>, vector<16x32xf32>,
    %c0_147 = arith.constant 0 : index
    %c0_148 = arith.constant 0 : index
    %145 = vector.load %arg25[%c0_147, %c0_148] : memref<16x144xf32, #tpu.memory_space<vmem>>, vector<16x32xf32>
    %c0_149 = arith.constant 0 : index
    %c0_150 = arith.constant 0 : index
    %146 = vector.load %arg26[%c0_149, %c0_150] : memref<256x128xf32, #tpu.memory_space<vmem>>, vector<16x32xf32>
    tpu.vector_store %arg26[%c0_149, %c0_150], %145 {strides = array<i32>} : memref<256x128xf32, #tpu.memory_space<vmem>>, vector<16x32xf32>,
    %c0_151 = arith.constant 0 : index
    %c1_152 = arith.constant 1 : index
    %147 = vector.load %arg25[%c0_151, %c1_152] : memref<16x144xf32, #tpu.memory_space<vmem>>, vector<16x32xf32>
    %c16_153 = arith.constant 16 : index
    %c0_154 = arith.constant 0 : index
    %148 = vector.load %arg26[%c16_153, %c0_154] : memref<256x128xf32, #tpu.memory_space<vmem>>, vector<16x32xf32>
    tpu.vector_store %arg26[%c16_153, %c0_154], %147 {strides = array<i32>} : memref<256x128xf32, #tpu.memory_space<vmem>>, vector<16x32xf32>,
    %c0_155 = arith.constant 0 : index
    %c2_156 = arith.constant 2 : index
    %149 = vector.load %arg25[%c0_155, %c2_156] : memref<16x144xf32, #tpu.memory_space<vmem>>, vector<16x32xf32>
    %c32_157 = arith.constant 32 : index
    %c0_158 = arith.constant 0 : index
    %150 = vector.load %arg26[%c32_157, %c0_158] : memref<256x128xf32, #tpu.memory_space<vmem>>, vector<16x32xf32>
    tpu.vector_store %arg26[%c32_157, %c0_158], %149 {strides = array<i32>} : memref<256x128xf32, #tpu.memory_space<vmem>>, vector<16x32xf32>,
    %c0_159 = arith.constant 0 : index
    %c3_160 = arith.constant 3 : index
    %151 = vector.load %arg25[%c0_159, %c3_160] : memref<16x144xf32, #tpu.memory_space<vmem>>, vector<16x32xf32>
    %c48_161 = arith.constant 48 : index
    %c0_162 = arith.constant 0 : index
    %152 = vector.load %arg26[%c48_161, %c0_162] : memref<256x128xf32, #tpu.memory_space<vmem>>, vector<16x32xf32>
    tpu.vector_store %arg26[%c48_161, %c0_162], %151 {strides = array<i32>} : memref<256x128xf32, #tpu.memory_space<vmem>>, vector<16x32xf32>,
    %c0_163 = arith.constant 0 : index
    %c4_164 = arith.constant 4 : index
    %153 = vector.load %arg25[%c0_163, %c4_164] : memref<16x144xf32, #tpu.memory_space<vmem>>, vector<16x32xf32>
    %c64_165 = arith.constant 64 : index
    %c0_166 = arith.constant 0 : index
    %154 = vector.load %arg26[%c64_165, %c0_166] : memref<256x128xf32, #tpu.memory_space<vmem>>, vector<16x32xf32>
    tpu.vector_store %arg26[%c64_165, %c0_166], %153 {strides = array<i32>} : memref<256x128xf32, #tpu.memory_space<vmem>>, vector<16x32xf32>,
    %c0_167 = arith.constant 0 : index
    %c5_168 = arith.constant 5 : index
    %155 = vector.load %arg25[%c0_167, %c5_168] : memref<16x144xf32, #tpu.memory_space<vmem>>, vector<16x32xf32>
    %c80_169 = arith.constant 80 : index
    %c0_170 = arith.constant 0 : index
    %156 = vector.load %arg26[%c80_169, %c0_170] : memref<256x128xf32, #tpu.memory_space<vmem>>, vector<16x32xf32>
    tpu.vector_store %arg26[%c80_169, %c0_170], %155 {strides = array<i32>} : memref<256x128xf32, #tpu.memory_space<vmem>>, vector<16x32xf32>,
    %c0_171 = arith.constant 0 : index
    %c6_172 = arith.constant 6 : index
    %157 = vector.load %arg25[%c0_171, %c6_172] : memref<16x144xf32, #tpu.memory_space<vmem>>, vector<16x32xf32>
    %c96_173 = arith.constant 96 : index
    %c0_174 = arith.constant 0 : index
    %158 = vector.load %arg26[%c96_173, %c0_174] : memref<256x128xf32, #tpu.memory_space<vmem>>, vector<16x32xf32>
    tpu.vector_store %arg26[%c96_173, %c0_174], %157 {strides = array<i32>} : memref<256x128xf32, #tpu.memory_space<vmem>>, vector<16x32xf32>,
    %c0_175 = arith.constant 0 : index
    %c7_176 = arith.constant 7 : index
    %159 = vector.load %arg25[%c0_175, %c7_176] : memref<16x144xf32, #tpu.memory_space<vmem>>, vector<16x32xf32>
    %c112_177 = arith.constant 112 : index
    %c0_178 = arith.constant 0 : index
    %160 = vector.load %arg26[%c112_177, %c0_178] : memref<256x128xf32, #tpu.memory_space<vmem>>, vector<16x32xf32>
    tpu.vector_store %arg26[%c112_177, %c0_178], %159 {strides = array<i32>} : memref<256x128xf32, #tpu.memory_space<vmem>>, vector<16x32xf32>,
    %c0_179 = arith.constant 0 : index
    %c8_180 = arith.constant 8 : index
    %161 = vector.load %arg25[%c0_179, %c8_180] : memref<16x144xf32, #tpu.memory_space<vmem>>, vector<16x32xf32>
    %c128 = arith.constant 128 : index
    %c0_181 = arith.constant 0 : index
    %162 = vector.load %arg26[%c128, %c0_181] : memref<256x128xf32, #tpu.memory_space<vmem>>, vector<16x32xf32>
    tpu.vector_store %arg26[%c128, %c0_181], %161 {strides = array<i32>} : memref<256x128xf32, #tpu.memory_space<vmem>>, vector<16x32xf32>,
    %c0_182 = arith.constant 0 : index
    %c9_183 = arith.constant 9 : index
    %163 = vector.load %arg25[%c0_182, %c9_183] : memref<16x144xf32, #tpu.memory_space<vmem>>, vector<16x32xf32>
    %c144 = arith.constant 144 : index
    %c0_184 = arith.constant 0 : index
    %164 = vector.load %arg26[%c144, %c0_184] : memref<256x128xf32, #tpu.memory_space<vmem>>, vector<16x32xf32>
    tpu.vector_store %arg26[%c144, %c0_184], %163 {strides = array<i32>} : memref<256x128xf32, #tpu.memory_space<vmem>>, vector<16x32xf32>,
    %c0_185 = arith.constant 0 : index
    %c10_186 = arith.constant 10 : index
    %165 = vector.load %arg25[%c0_185, %c10_186] : memref<16x144xf32, #tpu.memory_space<vmem>>, vector<16x32xf32>
    %c160 = arith.constant 160 : index
    %c0_187 = arith.constant 0 : index
    %166 = vector.load %arg26[%c160, %c0_187] : memref<256x128xf32, #tpu.memory_space<vmem>>, vector<16x32xf32>
    tpu.vector_store %arg26[%c160, %c0_187], %165 {strides = array<i32>} : memref<256x128xf32, #tpu.memory_space<vmem>>, vector<16x32xf32>,
    %c0_188 = arith.constant 0 : index
    %c11_189 = arith.constant 11 : index
    %167 = vector.load %arg25[%c0_188, %c11_189] : memref<16x144xf32, #tpu.memory_space<vmem>>, vector<16x32xf32>
    %c176 = arith.constant 176 : index
    %c0_190 = arith.constant 0 : index
    %168 = vector.load %arg26[%c176, %c0_190] : memref<256x128xf32, #tpu.memory_space<vmem>>, vector<16x32xf32>
    tpu.vector_store %arg26[%c176, %c0_190], %167 {strides = array<i32>} : memref<256x128xf32, #tpu.memory_space<vmem>>, vector<16x32xf32>,
    %c0_191 = arith.constant 0 : index
    %c12_192 = arith.constant 12 : index
    %169 = vector.load %arg25[%c0_191, %c12_192] : memref<16x144xf32, #tpu.memory_space<vmem>>, vector<16x32xf32>
    %c192 = arith.constant 192 : index
    %c0_193 = arith.constant 0 : index
    %170 = vector.load %arg26[%c192, %c0_193] : memref<256x128xf32, #tpu.memory_space<vmem>>, vector<16x32xf32>
    tpu.vector_store %arg26[%c192, %c0_193], %169 {strides = array<i32>} : memref<256x128xf32, #tpu.memory_space<vmem>>, vector<16x32xf32>,
    %c0_194 = arith.constant 0 : index
    %c13_195 = arith.constant 13 : index
    %171 = vector.load %arg25[%c0_194, %c13_195] : memref<16x144xf32, #tpu.memory_space<vmem>>, vector<16x32xf32>
    %c208 = arith.constant 208 : index
    %c0_196 = arith.constant 0 : index
    %172 = vector.load %arg26[%c208, %c0_196] : memref<256x128xf32, #tpu.memory_space<vmem>>, vector<16x32xf32>
    tpu.vector_store %arg26[%c208, %c0_196], %171 {strides = array<i32>} : memref<256x128xf32, #tpu.memory_space<vmem>>, vector<16x32xf32>,
    %c0_197 = arith.constant 0 : index
    %c14_198 = arith.constant 14 : index
    %173 = vector.load %arg25[%c0_197, %c14_198] : memref<16x144xf32, #tpu.memory_space<vmem>>, vector<16x32xf32>
    %c224 = arith.constant 224 : index
    %c0_199 = arith.constant 0 : index
    %174 = vector.load %arg26[%c224, %c0_199] : memref<256x128xf32, #tpu.memory_space<vmem>>, vector<16x32xf32>
    tpu.vector_store %arg26[%c224, %c0_199], %173 {strides = array<i32>} : memref<256x128xf32, #tpu.memory_space<vmem>>, vector<16x32xf32>,
    %c0_200 = arith.constant 0 : index
    %c15_201 = arith.constant 15 : index
    %175 = vector.load %arg25[%c0_200, %c15_201] : memref<16x144xf32, #tpu.memory_space<vmem>>, vector<16x32xf32>
    %c240 = arith.constant 240 : index
    %c0_202 = arith.constant 0 : index
    %176 = vector.load %arg26[%c240, %c0_202] : memref<256x128xf32, #tpu.memory_space<vmem>>, vector<16x32xf32>
    tpu.vector_store %arg26[%c240, %c0_202], %175 {strides = array<i32>} : memref<256x128xf32, #tpu.memory_space<vmem>>, vector<16x32xf32>,
    %c0_203 = arith.constant 0 : index
    %c0_204 = arith.constant 0 : index
    %177 = vector.load %arg6[%c0_203, %c0_204] : memref<24x256xf32, #tpu.memory_space<vmem>>, vector<24x256xf32>
    %c0_205 = arith.constant 0 : index
    %c0_206 = arith.constant 0 : index
    %178 = vector.load %arg26[%c0_205, %c0_206] : memref<256x128xf32, #tpu.memory_space<vmem>>, vector<256x32xf32>
    %cst_207 = arith.constant dense<0.000000e+00> : vector<24x32xf32>
    %179 = tpu.matmul %177, %178, %cst_207 {dimension_numbers = #tpu.dot_dimension_numbers<[1], [0], [0], [1], [0, 0, 1, 1], [], []>} : vector<24x256xf32>, vector<256x32xf32>, vector<24x32xf32> -> vector<24x32xf32>
    %c0_208 = arith.constant 0 : index
    %c0_209 = arith.constant 0 : index
    %180 = vector.load %arg7[%c0_208, %c0_209] : memref<24x1xf32, #tpu.memory_space<vmem>>, vector<24x1xf32>
    %181 = vector.broadcast %180 : vector<24x1xf32> to vector<24x32xf32>
    %182 = arith.addf %179, %181 : vector<24x32xf32>
    %cst_210 = arith.constant 0.000000e+00 : f32
    %183 = vector.broadcast %cst_210 : f32 to vector<24x32xf32>
    %184 = arith.cmpf ogt, %182, %183 : vector<24x32xf32>
    %cst_211 = arith.constant 0.000000e+00 : f32
    %185 = vector.broadcast %cst_211 : f32 to vector<24x32xf32>
    %186 = arith.minimumf %182, %185 : vector<24x32xf32>
    %187 = math.exp %186 : vector<24x32xf32>
    %cst_212 = arith.constant 1.000000e+00 : f32
    %188 = vector.broadcast %cst_212 : f32 to vector<24x32xf32>
    %189 = arith.subf %187, %188 : vector<24x32xf32>
    %cst_213 = arith.constant 1.67326319 : f32
    %190 = vector.broadcast %cst_213 : f32 to vector<24x32xf32>
    %191 = arith.mulf %190, %189 : vector<24x32xf32>
    %192 = arith.select %184, %182, %191 : vector<24x32xi1>, vector<24x32xf32>
    %cst_214 = arith.constant 1.05070102 : f32
    %193 = vector.broadcast %cst_214 : f32 to vector<24x32xf32>
    %194 = arith.mulf %193, %192 : vector<24x32xf32>
    %c0_215 = arith.constant 0 : index
    %c0_216 = arith.constant 0 : index
    %195 = vector.load %arg8[%c0_215, %c0_216] : memref<16x16xf32, #tpu.memory_space<vmem>>, vector<16x16xf32>
    %cst_217 = arith.constant dense<0.000000e+00> : vector<16x64xf32>
    %196 = tpu.matmul %195, %124, %cst_217 {dimension_numbers = #tpu.dot_dimension_numbers<[1], [0], [0], [1], [0, 0, 1, 1], [], []>} : vector<16x16xf32>, vector<16x64xf32>, vector<16x64xf32> -> vector<16x64xf32>
    %c0_218 = arith.constant 0 : index
    %c0_219 = arith.constant 0 : index
    %197 = vector.load %arg9[%c0_218, %c0_219] : memref<16x1xf32, #tpu.memory_space<vmem>>, vector<16x1xf32>
    %198 = vector.broadcast %197 : vector<16x1xf32> to vector<16x64xf32>
    %199 = arith.addf %196, %198 : vector<16x64xf32>
    %cst_220 = arith.constant 0.000000e+00 : f32
    %200 = vector.broadcast %cst_220 : f32 to vector<16x64xf32>
    %201 = arith.subf %200, %199 : vector<16x64xf32>
    %202 = math.exp %201 : vector<16x64xf32>
    %cst_221 = arith.constant 1.000000e+00 : f32
    %203 = vector.broadcast %cst_221 : f32 to vector<16x64xf32>
    %204 = arith.addf %203, %202 : vector<16x64xf32>
    %205 = tpu.reciprocal %204 {approx = true} : vector<16x64xf32> -> vector<16x64xf32>
    %c0_222 = arith.constant 0 : index
    %c0_223 = arith.constant 0 : index
    %206 = vector.load %arg10[%c0_222, %c0_223] : memref<8x8xf32, #tpu.memory_space<vmem>>, vector<8x8xf32>
    %cst_224 = arith.constant dense<0.000000e+00> : vector<8x128xf32>
    %207 = tpu.matmul %206, %54, %cst_224 {dimension_numbers = #tpu.dot_dimension_numbers<[1], [0], [0], [1], [0, 0, 1, 1], [], []>} : vector<8x8xf32>, vector<8x128xf32>, vector<8x128xf32> -> vector<8x128xf32>
    %c0_225 = arith.constant 0 : index
    %c0_226 = arith.constant 0 : index
    %208 = vector.load %arg11[%c0_225, %c0_226] : memref<8x1xf32, #tpu.memory_space<vmem>>, vector<8x1xf32>
    %209 = vector.broadcast %208 : vector<8x1xf32> to vector<8x128xf32>
    %210 = arith.addf %207, %209 : vector<8x128xf32>
    %cst_227 = arith.constant 0.000000e+00 : f32
    %211 = vector.broadcast %cst_227 : f32 to vector<8x128xf32>
    %212 = arith.subf %211, %210 : vector<8x128xf32>
    %213 = math.exp %212 : vector<8x128xf32>
    %cst_228 = arith.constant 1.000000e+00 : f32
    %214 = vector.broadcast %cst_228 : f32 to vector<8x128xf32>
    %215 = arith.addf %214, %213 : vector<8x128xf32>
    %216 = tpu.reciprocal %215 {approx = true} : vector<8x128xf32> -> vector<8x128xf32>
    %c0_229 = arith.constant 0 : index
    %c0_230 = arith.constant 0 : index
    %217 = vector.load %arg12[%c0_229, %c0_230] : memref<16x24xf32, #tpu.memory_space<vmem>>, vector<16x24xf32>
    %cst_231 = arith.constant dense<0.000000e+00> : vector<16x32xf32>
    %218 = tpu.matmul %217, %194, %cst_231 {dimension_numbers = #tpu.dot_dimension_numbers<[1], [0], [0], [1], [0, 0, 1, 1], [], []>} : vector<16x24xf32>, vector<24x32xf32>, vector<16x32xf32> -> vector<16x32xf32>
    %c0_232 = arith.constant 0 : index
    %c0_233 = arith.constant 0 : index
    %219 = vector.load %arg14[%c0_232, %c0_233] : memref<16x1xf32, #tpu.memory_space<vmem>>, vector<16x1xf32>
    %220 = vector.broadcast %219 : vector<16x1xf32> to vector<16x32xf32>
    %221 = arith.addf %218, %220 : vector<16x32xf32>
    %c0_234 = arith.constant 0 : index
    %c0_235 = arith.constant 0 : index
    %222 = vector.load %arg13[%c0_234, %c0_235] : memref<16x24xf32, #tpu.memory_space<vmem>>, vector<16x24xf32>
    %cst_236 = arith.constant dense<0.000000e+00> : vector<16x32xf32>
    %223 = tpu.matmul %222, %194, %cst_236 {dimension_numbers = #tpu.dot_dimension_numbers<[1], [0], [0], [1], [0, 0, 1, 1], [], []>} : vector<16x24xf32>, vector<24x32xf32>, vector<16x32xf32> -> vector<16x32xf32>
    %c0_237 = arith.constant 0 : index
    %c0_238 = arith.constant 0 : index
    %224 = vector.load %arg14[%c0_237, %c0_238] : memref<16x1xf32, #tpu.memory_space<vmem>>, vector<16x1xf32>
    %225 = vector.broadcast %224 : vector<16x1xf32> to vector<16x32xf32>
    %226 = arith.addf %223, %225 : vector<16x32xf32>
    %227 = tpu.iota {dimensions = array<i32: 0>} : vector<32x64xi32>
    %228 = tpu.iota {dimensions = array<i32: 1>} : vector<32x64xi32>
    %c2_i32_239 = arith.constant 2 : i32
    %229 = vector.broadcast %c2_i32_239 : i32 to vector<32x64xi32>
    %230 = arith.muli %229, %227 : vector<32x64xi32>
    %231 = arith.cmpi eq, %228, %230 : vector<32x64xi32>
    %232 = arith.extui %231 : vector<32x64xi1> to vector<32x64xi32>
    %233 = arith.sitofp %232 : vector<32x64xi32> to vector<32x64xf32>
    %c2_i32_240 = arith.constant 2 : i32
    %234 = vector.broadcast %c2_i32_240 : i32 to vector<32x64xi32>
    %235 = arith.muli %234, %227 : vector<32x64xi32>
    %c1_i32_241 = arith.constant 1 : i32
    %236 = vector.broadcast %c1_i32_241 : i32 to vector<32x64xi32>
    %237 = arith.addi %235, %236 : vector<32x64xi32>
    %238 = arith.cmpi eq, %228, %237 : vector<32x64xi32>
    %239 = arith.extui %238 : vector<32x64xi1> to vector<32x64xi32>
    %240 = arith.sitofp %239 : vector<32x64xi32> to vector<32x64xf32>
    %cst_242 = arith.constant dense<0.000000e+00> : vector<16x64xf32>
    %241 = tpu.matmul %221, %233, %cst_242 {dimension_numbers = #tpu.dot_dimension_numbers<[1], [0], [0], [1], [0, 0, 1, 1], [], []>} : vector<16x32xf32>, vector<32x64xf32>, vector<16x64xf32> -> vector<16x64xf32>
    %cst_243 = arith.constant dense<0.000000e+00> : vector<16x64xf32>
    %242 = tpu.matmul %226, %240, %cst_243 {dimension_numbers = #tpu.dot_dimension_numbers<[1], [0], [0], [1], [0, 0, 1, 1], [], []>} : vector<16x32xf32>, vector<32x64xf32>, vector<16x64xf32> -> vector<16x64xf32>
    %243 = arith.addf %241, %242 : vector<16x64xf32>
    %cst_244 = arith.constant 0.000000e+00 : f32
    %244 = vector.broadcast %cst_244 : f32 to vector<16x144xf32>
    %c0_245 = arith.constant 0 : index
    %c0_246 = arith.constant 0 : index
    %245 = vector.load %arg25[%c0_245, %c0_246] : memref<16x144xf32, #tpu.memory_space<vmem>>, vector<16x144xf32>
    tpu.vector_store %arg25[%c0_245, %c0_246], %244 {strides = array<i32>} : memref<16x144xf32, #tpu.memory_space<vmem>>, vector<16x144xf32>,
    %c0_247 = arith.constant 0 : index
    %c7_248 = arith.constant 7 : index
    %246 = vector.load %arg25[%c0_247, %c7_248] : memref<16x144xf32, #tpu.memory_space<vmem>>, vector<16x64xf32>
    tpu.vector_store %arg25[%c0_247, %c7_248], %243 {strides = array<i32>} : memref<16x144xf32, #tpu.memory_space<vmem>>, vector<16x64xf32>,
    %c0_249 = arith.constant 0 : index
    %c0_250 = arith.constant 0 : index
    %247 = vector.load %arg25[%c0_249, %c0_250] : memref<16x144xf32, #tpu.memory_space<vmem>>, vector<16x64xf32>
    %c0_251 = arith.constant 0 : index
    %c0_252 = arith.constant 0 : index
    %248 = vector.load %arg26[%c0_251, %c0_252] : memref<256x128xf32, #tpu.memory_space<vmem>>, vector<16x64xf32>
    tpu.vector_store %arg26[%c0_251, %c0_252], %247 {strides = array<i32>} : memref<256x128xf32, #tpu.memory_space<vmem>>, vector<16x64xf32>,
    %c0_253 = arith.constant 0 : index
    %c1_254 = arith.constant 1 : index
    %249 = vector.load %arg25[%c0_253, %c1_254] : memref<16x144xf32, #tpu.memory_space<vmem>>, vector<16x64xf32>
    %c16_255 = arith.constant 16 : index
    %c0_256 = arith.constant 0 : index
    %250 = vector.load %arg26[%c16_255, %c0_256] : memref<256x128xf32, #tpu.memory_space<vmem>>, vector<16x64xf32>
    tpu.vector_store %arg26[%c16_255, %c0_256], %249 {strides = array<i32>} : memref<256x128xf32, #tpu.memory_space<vmem>>, vector<16x64xf32>,
    %c0_257 = arith.constant 0 : index
    %c2_258 = arith.constant 2 : index
    %251 = vector.load %arg25[%c0_257, %c2_258] : memref<16x144xf32, #tpu.memory_space<vmem>>, vector<16x64xf32>
    %c32_259 = arith.constant 32 : index
    %c0_260 = arith.constant 0 : index
    %252 = vector.load %arg26[%c32_259, %c0_260] : memref<256x128xf32, #tpu.memory_space<vmem>>, vector<16x64xf32>
    tpu.vector_store %arg26[%c32_259, %c0_260], %251 {strides = array<i32>} : memref<256x128xf32, #tpu.memory_space<vmem>>, vector<16x64xf32>,
    %c0_261 = arith.constant 0 : index
    %c3_262 = arith.constant 3 : index
    %253 = vector.load %arg25[%c0_261, %c3_262] : memref<16x144xf32, #tpu.memory_space<vmem>>, vector<16x64xf32>
    %c48_263 = arith.constant 48 : index
    %c0_264 = arith.constant 0 : index
    %254 = vector.load %arg26[%c48_263, %c0_264] : memref<256x128xf32, #tpu.memory_space<vmem>>, vector<16x64xf32>
    tpu.vector_store %arg26[%c48_263, %c0_264], %253 {strides = array<i32>} : memref<256x128xf32, #tpu.memory_space<vmem>>, vector<16x64xf32>,
    %c0_265 = arith.constant 0 : index
    %c4_266 = arith.constant 4 : index
    %255 = vector.load %arg25[%c0_265, %c4_266] : memref<16x144xf32, #tpu.memory_space<vmem>>, vector<16x64xf32>
    %c64_267 = arith.constant 64 : index
    %c0_268 = arith.constant 0 : index
    %256 = vector.load %arg26[%c64_267, %c0_268] : memref<256x128xf32, #tpu.memory_space<vmem>>, vector<16x64xf32>
    tpu.vector_store %arg26[%c64_267, %c0_268], %255 {strides = array<i32>} : memref<256x128xf32, #tpu.memory_space<vmem>>, vector<16x64xf32>,
    %c0_269 = arith.constant 0 : index
    %c5_270 = arith.constant 5 : index
    %257 = vector.load %arg25[%c0_269, %c5_270] : memref<16x144xf32, #tpu.memory_space<vmem>>, vector<16x64xf32>
    %c80_271 = arith.constant 80 : index
    %c0_272 = arith.constant 0 : index
    %258 = vector.load %arg26[%c80_271, %c0_272] : memref<256x128xf32, #tpu.memory_space<vmem>>, vector<16x64xf32>
    tpu.vector_store %arg26[%c80_271, %c0_272], %257 {strides = array<i32>} : memref<256x128xf32, #tpu.memory_space<vmem>>, vector<16x64xf32>,
    %c0_273 = arith.constant 0 : index
    %c6_274 = arith.constant 6 : index
    %259 = vector.load %arg25[%c0_273, %c6_274] : memref<16x144xf32, #tpu.memory_space<vmem>>, vector<16x64xf32>
    %c96_275 = arith.constant 96 : index
    %c0_276 = arith.constant 0 : index
    %260 = vector.load %arg26[%c96_275, %c0_276] : memref<256x128xf32, #tpu.memory_space<vmem>>, vector<16x64xf32>
    tpu.vector_store %arg26[%c96_275, %c0_276], %259 {strides = array<i32>} : memref<256x128xf32, #tpu.memory_space<vmem>>, vector<16x64xf32>,
    %c0_277 = arith.constant 0 : index
    %c7_278 = arith.constant 7 : index
    %261 = vector.load %arg25[%c0_277, %c7_278] : memref<16x144xf32, #tpu.memory_space<vmem>>, vector<16x64xf32>
    %c112_279 = arith.constant 112 : index
    %c0_280 = arith.constant 0 : index
    %262 = vector.load %arg26[%c112_279, %c0_280] : memref<256x128xf32, #tpu.memory_space<vmem>>, vector<16x64xf32>
    tpu.vector_store %arg26[%c112_279, %c0_280], %261 {strides = array<i32>} : memref<256x128xf32, #tpu.memory_space<vmem>>, vector<16x64xf32>,
    %c0_281 = arith.constant 0 : index
    %c8_282 = arith.constant 8 : index
    %263 = vector.load %arg25[%c0_281, %c8_282] : memref<16x144xf32, #tpu.memory_space<vmem>>, vector<16x64xf32>
    %c128_283 = arith.constant 128 : index
    %c0_284 = arith.constant 0 : index
    %264 = vector.load %arg26[%c128_283, %c0_284] : memref<256x128xf32, #tpu.memory_space<vmem>>, vector<16x64xf32>
    tpu.vector_store %arg26[%c128_283, %c0_284], %263 {strides = array<i32>} : memref<256x128xf32, #tpu.memory_space<vmem>>, vector<16x64xf32>,
    %c0_285 = arith.constant 0 : index
    %c9_286 = arith.constant 9 : index
    %265 = vector.load %arg25[%c0_285, %c9_286] : memref<16x144xf32, #tpu.memory_space<vmem>>, vector<16x64xf32>
    %c144_287 = arith.constant 144 : index
    %c0_288 = arith.constant 0 : index
    %266 = vector.load %arg26[%c144_287, %c0_288] : memref<256x128xf32, #tpu.memory_space<vmem>>, vector<16x64xf32>
    tpu.vector_store %arg26[%c144_287, %c0_288], %265 {strides = array<i32>} : memref<256x128xf32, #tpu.memory_space<vmem>>, vector<16x64xf32>,
    %c0_289 = arith.constant 0 : index
    %c10_290 = arith.constant 10 : index
    %267 = vector.load %arg25[%c0_289, %c10_290] : memref<16x144xf32, #tpu.memory_space<vmem>>, vector<16x64xf32>
    %c160_291 = arith.constant 160 : index
    %c0_292 = arith.constant 0 : index
    %268 = vector.load %arg26[%c160_291, %c0_292] : memref<256x128xf32, #tpu.memory_space<vmem>>, vector<16x64xf32>
    tpu.vector_store %arg26[%c160_291, %c0_292], %267 {strides = array<i32>} : memref<256x128xf32, #tpu.memory_space<vmem>>, vector<16x64xf32>,
    %c0_293 = arith.constant 0 : index
    %c11_294 = arith.constant 11 : index
    %269 = vector.load %arg25[%c0_293, %c11_294] : memref<16x144xf32, #tpu.memory_space<vmem>>, vector<16x64xf32>
    %c176_295 = arith.constant 176 : index
    %c0_296 = arith.constant 0 : index
    %270 = vector.load %arg26[%c176_295, %c0_296] : memref<256x128xf32, #tpu.memory_space<vmem>>, vector<16x64xf32>
    tpu.vector_store %arg26[%c176_295, %c0_296], %269 {strides = array<i32>} : memref<256x128xf32, #tpu.memory_space<vmem>>, vector<16x64xf32>,
    %c0_297 = arith.constant 0 : index
    %c12_298 = arith.constant 12 : index
    %271 = vector.load %arg25[%c0_297, %c12_298] : memref<16x144xf32, #tpu.memory_space<vmem>>, vector<16x64xf32>
    %c192_299 = arith.constant 192 : index
    %c0_300 = arith.constant 0 : index
    %272 = vector.load %arg26[%c192_299, %c0_300] : memref<256x128xf32, #tpu.memory_space<vmem>>, vector<16x64xf32>
    tpu.vector_store %arg26[%c192_299, %c0_300], %271 {strides = array<i32>} : memref<256x128xf32, #tpu.memory_space<vmem>>, vector<16x64xf32>,
    %c0_301 = arith.constant 0 : index
    %c13_302 = arith.constant 13 : index
    %273 = vector.load %arg25[%c0_301, %c13_302] : memref<16x144xf32, #tpu.memory_space<vmem>>, vector<16x64xf32>
    %c208_303 = arith.constant 208 : index
    %c0_304 = arith.constant 0 : index
    %274 = vector.load %arg26[%c208_303, %c0_304] : memref<256x128xf32, #tpu.memory_space<vmem>>, vector<16x64xf32>
    tpu.vector_store %arg26[%c208_303, %c0_304], %273 {strides = array<i32>} : memref<256x128xf32, #tpu.memory_space<vmem>>, vector<16x64xf32>,
    %c0_305 = arith.constant 0 : index
    %c14_306 = arith.constant 14 : index
    %275 = vector.load %arg25[%c0_305, %c14_306] : memref<16x144xf32, #tpu.memory_space<vmem>>, vector<16x64xf32>
    %c224_307 = arith.constant 224 : index
    %c0_308 = arith.constant 0 : index
    %276 = vector.load %arg26[%c224_307, %c0_308] : memref<256x128xf32, #tpu.memory_space<vmem>>, vector<16x64xf32>
    tpu.vector_store %arg26[%c224_307, %c0_308], %275 {strides = array<i32>} : memref<256x128xf32, #tpu.memory_space<vmem>>, vector<16x64xf32>,
    %c0_309 = arith.constant 0 : index
    %c15_310 = arith.constant 15 : index
    %277 = vector.load %arg25[%c0_309, %c15_310] : memref<16x144xf32, #tpu.memory_space<vmem>>, vector<16x64xf32>
    %c240_311 = arith.constant 240 : index
    %c0_312 = arith.constant 0 : index
    %278 = vector.load %arg26[%c240_311, %c0_312] : memref<256x128xf32, #tpu.memory_space<vmem>>, vector<16x64xf32>
    tpu.vector_store %arg26[%c240_311, %c0_312], %277 {strides = array<i32>} : memref<256x128xf32, #tpu.memory_space<vmem>>, vector<16x64xf32>,
    %c0_313 = arith.constant 0 : index
    %c0_314 = arith.constant 0 : index
    %279 = vector.load %arg15[%c0_313, %c0_314] : memref<16x256xf32, #tpu.memory_space<vmem>>, vector<16x256xf32>
    %c0_315 = arith.constant 0 : index
    %c0_316 = arith.constant 0 : index
    %280 = vector.load %arg26[%c0_315, %c0_316] : memref<256x128xf32, #tpu.memory_space<vmem>>, vector<256x64xf32>
    %cst_317 = arith.constant dense<0.000000e+00> : vector<16x64xf32>
    %281 = tpu.matmul %279, %280, %cst_317 {dimension_numbers = #tpu.dot_dimension_numbers<[1], [0], [0], [1], [0, 0, 1, 1], [], []>} : vector<16x256xf32>, vector<256x64xf32>, vector<16x64xf32> -> vector<16x64xf32>
    %c0_318 = arith.constant 0 : index
    %c0_319 = arith.constant 0 : index
    %282 = vector.load %arg16[%c0_318, %c0_319] : memref<16x1xf32, #tpu.memory_space<vmem>>, vector<16x1xf32>
    %283 = vector.broadcast %282 : vector<16x1xf32> to vector<16x64xf32>
    %284 = arith.addf %281, %283 : vector<16x64xf32>
    %cst_320 = arith.constant 0.000000e+00 : f32
    %285 = vector.broadcast %cst_320 : f32 to vector<16x64xf32>
    %286 = arith.cmpf ogt, %284, %285 : vector<16x64xf32>
    %cst_321 = arith.constant 0.000000e+00 : f32
    %287 = vector.broadcast %cst_321 : f32 to vector<16x64xf32>
    %288 = arith.minimumf %284, %287 : vector<16x64xf32>
    %289 = math.exp %288 : vector<16x64xf32>
    %cst_322 = arith.constant 1.000000e+00 : f32
    %290 = vector.broadcast %cst_322 : f32 to vector<16x64xf32>
    %291 = arith.subf %289, %290 : vector<16x64xf32>
    %cst_323 = arith.constant 1.67326319 : f32
    %292 = vector.broadcast %cst_323 : f32 to vector<16x64xf32>
    %293 = arith.mulf %292, %291 : vector<16x64xf32>
    %294 = arith.select %286, %284, %293 : vector<16x64xi1>, vector<16x64xf32>
    %cst_324 = arith.constant 1.05070102 : f32
    %295 = vector.broadcast %cst_324 : f32 to vector<16x64xf32>
    %296 = arith.mulf %295, %294 : vector<16x64xf32>
    %297 = arith.mulf %296, %205 : vector<16x64xf32>
    %c0_325 = arith.constant 0 : index
    %c0_326 = arith.constant 0 : index
    %298 = vector.load %arg17[%c0_325, %c0_326] : memref<8x16xf32, #tpu.memory_space<vmem>>, vector<8x16xf32>
    %cst_327 = arith.constant dense<0.000000e+00> : vector<8x64xf32>
    %299 = tpu.matmul %298, %297, %cst_327 {dimension_numbers = #tpu.dot_dimension_numbers<[1], [0], [0], [1], [0, 0, 1, 1], [], []>} : vector<8x16xf32>, vector<16x64xf32>, vector<8x64xf32> -> vector<8x64xf32>
    %c0_328 = arith.constant 0 : index
    %c0_329 = arith.constant 0 : index
    %300 = vector.load %arg19[%c0_328, %c0_329] : memref<8x1xf32, #tpu.memory_space<vmem>>, vector<8x1xf32>
    %301 = vector.broadcast %300 : vector<8x1xf32> to vector<8x64xf32>
    %302 = arith.addf %299, %301 : vector<8x64xf32>
    %c0_330 = arith.constant 0 : index
    %c0_331 = arith.constant 0 : index
    %303 = vector.load %arg18[%c0_330, %c0_331] : memref<8x16xf32, #tpu.memory_space<vmem>>, vector<8x16xf32>
    %cst_332 = arith.constant dense<0.000000e+00> : vector<8x64xf32>
    %304 = tpu.matmul %303, %297, %cst_332 {dimension_numbers = #tpu.dot_dimension_numbers<[1], [0], [0], [1], [0, 0, 1, 1], [], []>} : vector<8x16xf32>, vector<16x64xf32>, vector<8x64xf32> -> vector<8x64xf32>
    %c0_333 = arith.constant 0 : index
    %c0_334 = arith.constant 0 : index
    %305 = vector.load %arg19[%c0_333, %c0_334] : memref<8x1xf32, #tpu.memory_space<vmem>>, vector<8x1xf32>
    %306 = vector.broadcast %305 : vector<8x1xf32> to vector<8x64xf32>
    %307 = arith.addf %304, %306 : vector<8x64xf32>
    %308 = tpu.iota {dimensions = array<i32: 0>} : vector<64x128xi32>
    %309 = tpu.iota {dimensions = array<i32: 1>} : vector<64x128xi32>
    %c2_i32_335 = arith.constant 2 : i32
    %310 = vector.broadcast %c2_i32_335 : i32 to vector<64x128xi32>
    %311 = arith.muli %310, %308 : vector<64x128xi32>
    %312 = arith.cmpi eq, %309, %311 : vector<64x128xi32>
    %313 = arith.extui %312 : vector<64x128xi1> to vector<64x128xi32>
    %314 = arith.sitofp %313 : vector<64x128xi32> to vector<64x128xf32>
    %c2_i32_336 = arith.constant 2 : i32
    %315 = vector.broadcast %c2_i32_336 : i32 to vector<64x128xi32>
    %316 = arith.muli %315, %308 : vector<64x128xi32>
    %c1_i32_337 = arith.constant 1 : i32
    %317 = vector.broadcast %c1_i32_337 : i32 to vector<64x128xi32>
    %318 = arith.addi %316, %317 : vector<64x128xi32>
    %319 = arith.cmpi eq, %309, %318 : vector<64x128xi32>
    %320 = arith.extui %319 : vector<64x128xi1> to vector<64x128xi32>
    %321 = arith.sitofp %320 : vector<64x128xi32> to vector<64x128xf32>
    %cst_338 = arith.constant dense<0.000000e+00> : vector<8x128xf32>
    %322 = tpu.matmul %302, %314, %cst_338 {dimension_numbers = #tpu.dot_dimension_numbers<[1], [0], [0], [1], [0, 0, 1, 1], [], []>} : vector<8x64xf32>, vector<64x128xf32>, vector<8x128xf32> -> vector<8x128xf32>
    %cst_339 = arith.constant dense<0.000000e+00> : vector<8x128xf32>
    %323 = tpu.matmul %307, %321, %cst_339 {dimension_numbers = #tpu.dot_dimension_numbers<[1], [0], [0], [1], [0, 0, 1, 1], [], []>} : vector<8x64xf32>, vector<64x128xf32>, vector<8x128xf32> -> vector<8x128xf32>
    %324 = arith.addf %322, %323 : vector<8x128xf32>
    %cst_340 = arith.constant 0.000000e+00 : f32
    %325 = vector.broadcast %cst_340 : f32 to vector<16x144xf32>
    %c0_341 = arith.constant 0 : index
    %c0_342 = arith.constant 0 : index
    %326 = vector.load %arg25[%c0_341, %c0_342] : memref<16x144xf32, #tpu.memory_space<vmem>>, vector<16x144xf32>
    tpu.vector_store %arg25[%c0_341, %c0_342], %325 {strides = array<i32>} : memref<16x144xf32, #tpu.memory_space<vmem>>, vector<16x144xf32>,
    %c0_343 = arith.constant 0 : index
    %c7_344 = arith.constant 7 : index
    %327 = vector.load %arg25[%c0_343, %c7_344] : memref<16x144xf32, #tpu.memory_space<vmem>>, vector<8x128xf32>
    tpu.vector_store %arg25[%c0_343, %c7_344], %324 {strides = array<i32>} : memref<16x144xf32, #tpu.memory_space<vmem>>, vector<8x128xf32>,
    %c0_345 = arith.constant 0 : index
    %c0_346 = arith.constant 0 : index
    %328 = vector.load %arg25[%c0_345, %c0_346] : memref<16x144xf32, #tpu.memory_space<vmem>>, vector<8x128xf32>
    %c0_347 = arith.constant 0 : index
    %c0_348 = arith.constant 0 : index
    %329 = vector.load %arg26[%c0_347, %c0_348] : memref<256x128xf32, #tpu.memory_space<vmem>>, vector<8x128xf32>
    tpu.vector_store %arg26[%c0_347, %c0_348], %328 {strides = array<i32>} : memref<256x128xf32, #tpu.memory_space<vmem>>, vector<8x128xf32>,
    %c0_349 = arith.constant 0 : index
    %c1_350 = arith.constant 1 : index
    %330 = vector.load %arg25[%c0_349, %c1_350] : memref<16x144xf32, #tpu.memory_space<vmem>>, vector<8x128xf32>
    %c8_351 = arith.constant 8 : index
    %c0_352 = arith.constant 0 : index
    %331 = vector.load %arg26[%c8_351, %c0_352] : memref<256x128xf32, #tpu.memory_space<vmem>>, vector<8x128xf32>
    tpu.vector_store %arg26[%c8_351, %c0_352], %330 {strides = array<i32>} : memref<256x128xf32, #tpu.memory_space<vmem>>, vector<8x128xf32>,
    %c0_353 = arith.constant 0 : index
    %c2_354 = arith.constant 2 : index
    %332 = vector.load %arg25[%c0_353, %c2_354] : memref<16x144xf32, #tpu.memory_space<vmem>>, vector<8x128xf32>
    %c16_355 = arith.constant 16 : index
    %c0_356 = arith.constant 0 : index
    %333 = vector.load %arg26[%c16_355, %c0_356] : memref<256x128xf32, #tpu.memory_space<vmem>>, vector<8x128xf32>
    tpu.vector_store %arg26[%c16_355, %c0_356], %332 {strides = array<i32>} : memref<256x128xf32, #tpu.memory_space<vmem>>, vector<8x128xf32>,
    %c0_357 = arith.constant 0 : index
    %c3_358 = arith.constant 3 : index
    %334 = vector.load %arg25[%c0_357, %c3_358] : memref<16x144xf32, #tpu.memory_space<vmem>>, vector<8x128xf32>
    %c24_359 = arith.constant 24 : index
    %c0_360 = arith.constant 0 : index
    %335 = vector.load %arg26[%c24_359, %c0_360] : memref<256x128xf32, #tpu.memory_space<vmem>>, vector<8x128xf32>
    tpu.vector_store %arg26[%c24_359, %c0_360], %334 {strides = array<i32>} : memref<256x128xf32, #tpu.memory_space<vmem>>, vector<8x128xf32>,
    %c0_361 = arith.constant 0 : index
    %c4_362 = arith.constant 4 : index
    %336 = vector.load %arg25[%c0_361, %c4_362] : memref<16x144xf32, #tpu.memory_space<vmem>>, vector<8x128xf32>
    %c32_363 = arith.constant 32 : index
    %c0_364 = arith.constant 0 : index
    %337 = vector.load %arg26[%c32_363, %c0_364] : memref<256x128xf32, #tpu.memory_space<vmem>>, vector<8x128xf32>
    tpu.vector_store %arg26[%c32_363, %c0_364], %336 {strides = array<i32>} : memref<256x128xf32, #tpu.memory_space<vmem>>, vector<8x128xf32>,
    %c0_365 = arith.constant 0 : index
    %c5_366 = arith.constant 5 : index
    %338 = vector.load %arg25[%c0_365, %c5_366] : memref<16x144xf32, #tpu.memory_space<vmem>>, vector<8x128xf32>
    %c40_367 = arith.constant 40 : index
    %c0_368 = arith.constant 0 : index
    %339 = vector.load %arg26[%c40_367, %c0_368] : memref<256x128xf32, #tpu.memory_space<vmem>>, vector<8x128xf32>
    tpu.vector_store %arg26[%c40_367, %c0_368], %338 {strides = array<i32>} : memref<256x128xf32, #tpu.memory_space<vmem>>, vector<8x128xf32>,
    %c0_369 = arith.constant 0 : index
    %c6_370 = arith.constant 6 : index
    %340 = vector.load %arg25[%c0_369, %c6_370] : memref<16x144xf32, #tpu.memory_space<vmem>>, vector<8x128xf32>
    %c48_371 = arith.constant 48 : index
    %c0_372 = arith.constant 0 : index
    %341 = vector.load %arg26[%c48_371, %c0_372] : memref<256x128xf32, #tpu.memory_space<vmem>>, vector<8x128xf32>
    tpu.vector_store %arg26[%c48_371, %c0_372], %340 {strides = array<i32>} : memref<256x128xf32, #tpu.memory_space<vmem>>, vector<8x128xf32>,
    %c0_373 = arith.constant 0 : index
    %c7_374 = arith.constant 7 : index
    %342 = vector.load %arg25[%c0_373, %c7_374] : memref<16x144xf32, #tpu.memory_space<vmem>>, vector<8x128xf32>
    %c56_375 = arith.constant 56 : index
    %c0_376 = arith.constant 0 : index
    %343 = vector.load %arg26[%c56_375, %c0_376] : memref<256x128xf32, #tpu.memory_space<vmem>>, vector<8x128xf32>
    tpu.vector_store %arg26[%c56_375, %c0_376], %342 {strides = array<i32>} : memref<256x128xf32, #tpu.memory_space<vmem>>, vector<8x128xf32>,
    %c0_377 = arith.constant 0 : index
    %c8_378 = arith.constant 8 : index
    %344 = vector.load %arg25[%c0_377, %c8_378] : memref<16x144xf32, #tpu.memory_space<vmem>>, vector<8x128xf32>
    %c64_379 = arith.constant 64 : index
    %c0_380 = arith.constant 0 : index
    %345 = vector.load %arg26[%c64_379, %c0_380] : memref<256x128xf32, #tpu.memory_space<vmem>>, vector<8x128xf32>
    tpu.vector_store %arg26[%c64_379, %c0_380], %344 {strides = array<i32>} : memref<256x128xf32, #tpu.memory_space<vmem>>, vector<8x128xf32>,
    %c0_381 = arith.constant 0 : index
    %c9_382 = arith.constant 9 : index
    %346 = vector.load %arg25[%c0_381, %c9_382] : memref<16x144xf32, #tpu.memory_space<vmem>>, vector<8x128xf32>
    %c72_383 = arith.constant 72 : index
    %c0_384 = arith.constant 0 : index
    %347 = vector.load %arg26[%c72_383, %c0_384] : memref<256x128xf32, #tpu.memory_space<vmem>>, vector<8x128xf32>
    tpu.vector_store %arg26[%c72_383, %c0_384], %346 {strides = array<i32>} : memref<256x128xf32, #tpu.memory_space<vmem>>, vector<8x128xf32>,
    %c0_385 = arith.constant 0 : index
    %c10_386 = arith.constant 10 : index
    %348 = vector.load %arg25[%c0_385, %c10_386] : memref<16x144xf32, #tpu.memory_space<vmem>>, vector<8x128xf32>
    %c80_387 = arith.constant 80 : index
    %c0_388 = arith.constant 0 : index
    %349 = vector.load %arg26[%c80_387, %c0_388] : memref<256x128xf32, #tpu.memory_space<vmem>>, vector<8x128xf32>
    tpu.vector_store %arg26[%c80_387, %c0_388], %348 {strides = array<i32>} : memref<256x128xf32, #tpu.memory_space<vmem>>, vector<8x128xf32>,
    %c0_389 = arith.constant 0 : index
    %c11_390 = arith.constant 11 : index
    %350 = vector.load %arg25[%c0_389, %c11_390] : memref<16x144xf32, #tpu.memory_space<vmem>>, vector<8x128xf32>
    %c88_391 = arith.constant 88 : index
    %c0_392 = arith.constant 0 : index
    %351 = vector.load %arg26[%c88_391, %c0_392] : memref<256x128xf32, #tpu.memory_space<vmem>>, vector<8x128xf32>
    tpu.vector_store %arg26[%c88_391, %c0_392], %350 {strides = array<i32>} : memref<256x128xf32, #tpu.memory_space<vmem>>, vector<8x128xf32>,
    %c0_393 = arith.constant 0 : index
    %c12_394 = arith.constant 12 : index
    %352 = vector.load %arg25[%c0_393, %c12_394] : memref<16x144xf32, #tpu.memory_space<vmem>>, vector<8x128xf32>
    %c96_395 = arith.constant 96 : index
    %c0_396 = arith.constant 0 : index
    %353 = vector.load %arg26[%c96_395, %c0_396] : memref<256x128xf32, #tpu.memory_space<vmem>>, vector<8x128xf32>
    tpu.vector_store %arg26[%c96_395, %c0_396], %352 {strides = array<i32>} : memref<256x128xf32, #tpu.memory_space<vmem>>, vector<8x128xf32>,
    %c0_397 = arith.constant 0 : index
    %c13_398 = arith.constant 13 : index
    %354 = vector.load %arg25[%c0_397, %c13_398] : memref<16x144xf32, #tpu.memory_space<vmem>>, vector<8x128xf32>
    %c104_399 = arith.constant 104 : index
    %c0_400 = arith.constant 0 : index
    %355 = vector.load %arg26[%c104_399, %c0_400] : memref<256x128xf32, #tpu.memory_space<vmem>>, vector<8x128xf32>
    tpu.vector_store %arg26[%c104_399, %c0_400], %354 {strides = array<i32>} : memref<256x128xf32, #tpu.memory_space<vmem>>, vector<8x128xf32>,
    %c0_401 = arith.constant 0 : index
    %c14_402 = arith.constant 14 : index
    %356 = vector.load %arg25[%c0_401, %c14_402] : memref<16x144xf32, #tpu.memory_space<vmem>>, vector<8x128xf32>
    %c112_403 = arith.constant 112 : index
    %c0_404 = arith.constant 0 : index
    %357 = vector.load %arg26[%c112_403, %c0_404] : memref<256x128xf32, #tpu.memory_space<vmem>>, vector<8x128xf32>
    tpu.vector_store %arg26[%c112_403, %c0_404], %356 {strides = array<i32>} : memref<256x128xf32, #tpu.memory_space<vmem>>, vector<8x128xf32>,
    %c0_405 = arith.constant 0 : index
    %c15_406 = arith.constant 15 : index
    %358 = vector.load %arg25[%c0_405, %c15_406] : memref<16x144xf32, #tpu.memory_space<vmem>>, vector<8x128xf32>
    %c120_407 = arith.constant 120 : index
    %c0_408 = arith.constant 0 : index
    %359 = vector.load %arg26[%c120_407, %c0_408] : memref<256x128xf32, #tpu.memory_space<vmem>>, vector<8x128xf32>
    tpu.vector_store %arg26[%c120_407, %c0_408], %358 {strides = array<i32>} : memref<256x128xf32, #tpu.memory_space<vmem>>, vector<8x128xf32>,
    %c0_409 = arith.constant 0 : index
    %c0_410 = arith.constant 0 : index
    %360 = vector.load %arg20[%c0_409, %c0_410] : memref<8x128xf32, #tpu.memory_space<vmem>>, vector<8x128xf32>
    %c0_411 = arith.constant 0 : index
    %c0_412 = arith.constant 0 : index
    %361 = vector.load %arg26[%c0_411, %c0_412] : memref<256x128xf32, #tpu.memory_space<vmem>>, vector<128x128xf32>
    %cst_413 = arith.constant dense<0.000000e+00> : vector<8x128xf32>
    %362 = tpu.matmul %360, %361, %cst_413 {dimension_numbers = #tpu.dot_dimension_numbers<[1], [0], [0], [1], [0, 0, 1, 1], [], []>} : vector<8x128xf32>, vector<128x128xf32>, vector<8x128xf32> -> vector<8x128xf32>
    %c0_414 = arith.constant 0 : index
    %c0_415 = arith.constant 0 : index
    %363 = vector.load %arg21[%c0_414, %c0_415] : memref<8x1xf32, #tpu.memory_space<vmem>>, vector<8x1xf32>
    %364 = vector.broadcast %363 : vector<8x1xf32> to vector<8x128xf32>
    %365 = arith.addf %362, %364 : vector<8x128xf32>
    %cst_416 = arith.constant 0.000000e+00 : f32
    %366 = vector.broadcast %cst_416 : f32 to vector<8x128xf32>
    %367 = arith.cmpf ogt, %365, %366 : vector<8x128xf32>
    %cst_417 = arith.constant 0.000000e+00 : f32
    %368 = vector.broadcast %cst_417 : f32 to vector<8x128xf32>
    %369 = arith.minimumf %365, %368 : vector<8x128xf32>
    %370 = math.exp %369 : vector<8x128xf32>
    %cst_418 = arith.constant 1.000000e+00 : f32
    %371 = vector.broadcast %cst_418 : f32 to vector<8x128xf32>
    %372 = arith.subf %370, %371 : vector<8x128xf32>
    %cst_419 = arith.constant 1.67326319 : f32
    %373 = vector.broadcast %cst_419 : f32 to vector<8x128xf32>
    %374 = arith.mulf %373, %372 : vector<8x128xf32>
    %375 = arith.select %367, %365, %374 : vector<8x128xi1>, vector<8x128xf32>
    %cst_420 = arith.constant 1.05070102 : f32
    %376 = vector.broadcast %cst_420 : f32 to vector<8x128xf32>
    %377 = arith.mulf %376, %375 : vector<8x128xf32>
    %378 = arith.mulf %377, %216 : vector<8x128xf32>
    %c0_421 = arith.constant 0 : index
    %c0_422 = arith.constant 0 : index
    %379 = vector.load %arg22[%c0_421, %c0_422] : memref<3x8xf32, #tpu.memory_space<vmem>>, vector<3x8xf32>
    %cst_423 = arith.constant dense<0.000000e+00> : vector<3x128xf32>
    %380 = tpu.matmul %379, %378, %cst_423 {dimension_numbers = #tpu.dot_dimension_numbers<[1], [0], [0], [1], [0, 0, 1, 1], [], []>} : vector<3x8xf32>, vector<8x128xf32>, vector<3x128xf32> -> vector<3x128xf32>
    %c0_424 = arith.constant 0 : index
    %c0_425 = arith.constant 0 : index
    %381 = vector.load %arg23[%c0_424, %c0_425] : memref<3x1xf32, #tpu.memory_space<vmem>>, vector<3x1xf32>
    %382 = vector.broadcast %381 : vector<3x1xf32> to vector<3x128xf32>
    %383 = arith.addf %380, %382 : vector<3x128xf32>
    %cst_426 = arith.constant dense<0xFF800000> : vector<128xf32>
    %384 = vector.multi_reduction <maximumf>, %383, %cst_426 [0] : vector<3x128xf32> to vector<128xf32>
    %385 = vector.shape_cast %384 : vector<128xf32> to vector<1x128xf32>
    %386 = vector.broadcast %385 : vector<1x128xf32> to vector<3x128xf32>
    %387 = arith.subf %383, %386 : vector<3x128xf32>
    %388 = math.exp %387 : vector<3x128xf32>
    %cst_427 = arith.constant dense<0.000000e+00> : vector<128xf32>
    %389 = vector.multi_reduction <add>, %388, %cst_427 [0] : vector<3x128xf32> to vector<128xf32>
    %390 = vector.shape_cast %389 : vector<128xf32> to vector<1x128xf32>
    %391 = vector.broadcast %390 : vector<1x128xf32> to vector<3x128xf32>
    %392 = arith.divf %388, %391 : vector<3x128xf32>
    %c0_428 = arith.constant 0 : index
    %c0_429 = arith.constant 0 : index
    %c0_430 = arith.constant 0 : index
    %393 = vector.load %arg24[%c0_428, %c0_429, %c0_430] : memref<1x3x128xf32, #tpu.memory_space<vmem>>, vector<1x3x128xf32>
    %394 = vector.shape_cast %393 : vector<1x3x128xf32> to vector<3x128xf32>
    %395 = vector.shape_cast %392 : vector<3x128xf32> to vector<1x3x128xf32>
    tpu.vector_store %arg24[%c0_428, %c0_429, %c0_430], %395 {strides = array<i32>} : memref<1x3x128xf32, #tpu.memory_space<vmem>>, vector<1x3x128xf32>,
    return
  }
  func.func @transform_0(%arg0: i32) -> (i32, i32, i32) {
    %c0_i32 = arith.constant 0 : i32
    %c0_i32_0 = arith.constant 0 : i32
    %c0_i32_1 = arith.constant 0 : i32
    return %arg0, %c0_i32, %c0_i32_0 : i32, i32, i32
  }
  func.func @transform_1(%arg0: i32) -> (i32, i32) {
    %c0_i32 = arith.constant 0 : i32
    %c0_i32_0 = arith.constant 0 : i32
    %c0_i32_1 = arith.constant 0 : i32
    return %c0_i32, %c0_i32_0 : i32, i32
  }
  func.func @transform_2(%arg0: i32) -> (i32, i32) {
    %c0_i32 = arith.constant 0 : i32
    %c0_i32_0 = arith.constant 0 : i32
    %c0_i32_1 = arith.constant 0 : i32
    return %c0_i32, %c0_i32_0 : i32, i32
  }
  func.func @transform_3(%arg0: i32) -> (i32, i32) {
    %c0_i32 = arith.constant 0 : i32
    %c0_i32_0 = arith.constant 0 : i32
    %c0_i32_1 = arith.constant 0 : i32
    return %c0_i32, %c0_i32_0 : i32, i32
  }
  func.func @transform_4(%arg0: i32) -> (i32, i32) {
    %c0_i32 = arith.constant 0 : i32
    %c0_i32_0 = arith.constant 0 : i32
    %c0_i32_1 = arith.constant 0 : i32
    return %c0_i32, %c0_i32_0 : i32, i32
  }
  func.func @transform_5(%arg0: i32) -> (i32, i32) {
    %c0_i32 = arith.constant 0 : i32
    %c0_i32_0 = arith.constant 0 : i32
    %c0_i32_1 = arith.constant 0 : i32
    return %c0_i32, %c0_i32_0 : i32, i32
  }
  func.func @transform_6(%arg0: i32) -> (i32, i32) {
    %c0_i32 = arith.constant 0 : i32
    %c0_i32_0 = arith.constant 0 : i32
    %c0_i32_1 = arith.constant 0 : i32
    return %c0_i32, %c0_i32_0 : i32, i32
  }
  func.func @transform_7(%arg0: i32) -> (i32, i32) {
    %c0_i32 = arith.constant 0 : i32
    %c0_i32_0 = arith.constant 0 : i32
    %c0_i32_1 = arith.constant 0 : i32
    return %c0_i32, %c0_i32_0 : i32, i32
  }
  func.func @transform_8(%arg0: i32) -> (i32, i32) {
    %c0_i32 = arith.constant 0 : i32
    %c0_i32_0 = arith.constant 0 : i32
    %c0_i32_1 = arith.constant 0 : i32
    return %c0_i32, %c0_i32_0 : i32, i32
  }
  func.func @transform_9(%arg0: i32) -> (i32, i32) {
    %c0_i32 = arith.constant 0 : i32
    %c0_i32_0 = arith.constant 0 : i32
    %c0_i32_1 = arith.constant 0 : i32
    return %c0_i32, %c0_i32_0 : i32, i32
  }
  func.func @transform_10(%arg0: i32) -> (i32, i32) {
    %c0_i32 = arith.constant 0 : i32
    %c0_i32_0 = arith.constant 0 : i32
    %c0_i32_1 = arith.constant 0 : i32
    return %c0_i32, %c0_i32_0 : i32, i32
  }
  func.func @transform_11(%arg0: i32) -> (i32, i32) {
    %c0_i32 = arith.constant 0 : i32
    %c0_i32_0 = arith.constant 0 : i32
    %c0_i32_1 = arith.constant 0 : i32
    return %c0_i32, %c0_i32_0 : i32, i32
  }
  func.func @transform_12(%arg0: i32) -> (i32, i32) {
    %c0_i32 = arith.constant 0 : i32
    %c0_i32_0 = arith.constant 0 : i32
    %c0_i32_1 = arith.constant 0 : i32
    return %c0_i32, %c0_i32_0 : i32, i32
  }
  func.func @transform_13(%arg0: i32) -> (i32, i32) {
    %c0_i32 = arith.constant 0 : i32
    %c0_i32_0 = arith.constant 0 : i32
    %c0_i32_1 = arith.constant 0 : i32
    return %c0_i32, %c0_i32_0 : i32, i32
  }
  func.func @transform_14(%arg0: i32) -> (i32, i32) {
    %c0_i32 = arith.constant 0 : i32
    %c0_i32_0 = arith.constant 0 : i32
    %c0_i32_1 = arith.constant 0 : i32
    return %c0_i32, %c0_i32_0 : i32, i32
  }
  func.func @transform_15(%arg0: i32) -> (i32, i32) {
    %c0_i32 = arith.constant 0 : i32
    %c0_i32_0 = arith.constant 0 : i32
    %c0_i32_1 = arith.constant 0 : i32
    return %c0_i32, %c0_i32_0 : i32, i32
  }
  func.func @transform_16(%arg0: i32) -> (i32, i32) {
    %c0_i32 = arith.constant 0 : i32
    %c0_i32_0 = arith.constant 0 : i32
    %c0_i32_1 = arith.constant 0 : i32
    return %c0_i32, %c0_i32_0 : i32, i32
  }
  func.func @transform_17(%arg0: i32) -> (i32, i32) {
    %c0_i32 = arith.constant 0 : i32
    %c0_i32_0 = arith.constant 0 : i32
    %c0_i32_1 = arith.constant 0 : i32
    return %c0_i32, %c0_i32_0 : i32, i32
  }
  func.func @transform_18(%arg0: i32) -> (i32, i32) {
    %c0_i32 = arith.constant 0 : i32
    %c0_i32_0 = arith.constant 0 : i32
    %c0_i32_1 = arith.constant 0 : i32
    return %c0_i32, %c0_i32_0 : i32, i32
  }
  func.func @transform_19(%arg0: i32) -> (i32, i32) {
    %c0_i32 = arith.constant 0 : i32
    %c0_i32_0 = arith.constant 0 : i32
    %c0_i32_1 = arith.constant 0 : i32
    return %c0_i32, %c0_i32_0 : i32, i32
  }
  func.func @transform_20(%arg0: i32) -> (i32, i32) {
    %c0_i32 = arith.constant 0 : i32
    %c0_i32_0 = arith.constant 0 : i32
    %c0_i32_1 = arith.constant 0 : i32
    return %c0_i32, %c0_i32_0 : i32, i32
  }
  func.func @transform_21(%arg0: i32) -> (i32, i32) {
    %c0_i32 = arith.constant 0 : i32
    %c0_i32_0 = arith.constant 0 : i32
    %c0_i32_1 = arith.constant 0 : i32
    return %c0_i32, %c0_i32_0 : i32, i32
  }
  func.func @transform_22(%arg0: i32) -> (i32, i32) {
    %c0_i32 = arith.constant 0 : i32
    %c0_i32_0 = arith.constant 0 : i32
    %c0_i32_1 = arith.constant 0 : i32
    return %c0_i32, %c0_i32_0 : i32, i32
  }
  func.func @transform_23(%arg0: i32) -> (i32, i32, i32) {
    %c0_i32 = arith.constant 0 : i32
    %c0_i32_0 = arith.constant 0 : i32
    %c0_i32_1 = arith.constant 0 : i32
    return %arg0, %c0_i32, %c0_i32_0 : i32, i32, i32
  }
}

</mosaic_0001>

<bundles_post_ra>
// kernel: attention_unet_forward.1
= control target key start
LH: loop header
LB: loop body
LE: loop exit
PB: predicated region body
PF: predicated region fallthrough
CT: control target
= control target key end

     0   :  { %s5619_s0 = inlined_call_operand.vmem [shape: f32[2,1,128], index: 0, kind: input, shape index: {}]   ;;  %s5620_s1 = inlined_call_operand.vmem [shape: f32[8,16], index: 1, kind: input, shape index: {}]   ;;  %s5621_s2 = inlined_call_operand.vmem [shape: f32[8,1], index: 2, kind: input, shape index: {}]   ;;  %s5622_s3 = inlined_call_operand.vmem [shape: f32[16,128], index: 3, kind: input, shape index: {}]   ;;  %s5623_s4 = inlined_call_operand.vmem [shape: f32[16,1], index: 4, kind: input, shape index: {}]   ;;  %s5624_s5 = inlined_call_operand.vmem [shape: f32[24,256], index: 5, kind: input, shape index: {}]   ;;  %s5625_s6 = inlined_call_operand.vmem [shape: f32[24,1], index: 6, kind: input, shape index: {}]   ;;  %s5626_s7 = inlined_call_operand.vmem [shape: f32[16,16], index: 7, kind: input, shape index: {}]   ;;  %s5627_s8 = inlined_call_operand.vmem [shape: f32[16,1], index: 8, kind: input, shape index: {}]   ;;  %s5628_s9 = inlined_call_operand.vmem [shape: f32[8,8], index: 9, kind: input, shape index: {}]   ;;  %s5629_s10 = inlined_call_operand.vmem [shape: f32[8,1], index: 10, kind: input, shape index: {}]   ;;  %s5630_s11 = inlined_call_operand.vmem [shape: f32[16,24], index: 11, kind: input, shape index: {}]   ;;  %s5631_s12 = inlined_call_operand.vmem [shape: f32[16,24], index: 12, kind: input, shape index: {}]   ;;  %s5632_s13 = inlined_call_operand.vmem [shape: f32[16,1], index: 13, kind: input, shape index: {}]   ;;  %s5633_s14 = inlined_call_operand.vmem [shape: f32[16,256], index: 14, kind: input, shape index: {}]   ;;  %s5634_s15 = inlined_call_operand.vmem [shape: f32[16,1], index: 15, kind: input, shape index: {}]   ;;  %s5635_s16 = inlined_call_operand.vmem [shape: f32[8,16], index: 16, kind: input, shape index: {}]   ;;  %s5636_s17 = inlined_call_operand.vmem [shape: f32[8,16], index: 17, kind: input, shape index: {}]   ;;  %s5637_s18 = inlined_call_operand.vmem [shape: f32[8,1], index: 18, kind: input, shape index: {}]   ;;  %s5638_s19 = inlined_call_operand.vmem [shape: f32[8,128], index: 19, kind: input, shape index: {}]   ;;  %s5639_s20 = inlined_call_operand.vmem [shape: f32[8,1], index: 20, kind: input, shape index: {}]   ;;  %s5640_s21 = inlined_call_operand.vmem [shape: f32[3,8], index: 21, kind: input, shape index: {}]   ;;  %s5641_s22 = inlined_call_operand.vmem [shape: f32[3,1], index: 22, kind: input, shape index: {}]   ;;  %s5642_s23 = inlined_call_operand.vmem [shape: f32[2,3,128], index: 23, kind: output, shape index: {}]  }
   0x1   :  { %5708 = sst [smem:[#allocation6_spill]] %s5619_s0 }
   0x2   :  { %5709 = sst [smem:[#allocation7_spill]] %s5620_s1 }
   0x3   :  { %5710 = sst [smem:[#allocation8_spill]] %s5621_s2 }
   0x4   :  { %5711 = sst [smem:[#allocation9_spill]] %s5622_s3 }
   0x5   :  { %5712 = sst [smem:[#allocation10_spill]] %s5623_s4  ;;  %s4817_s4 = smov 0  }
   0x6   :  { %5713 = sst [smem:[#allocation11_spill]] %s5624_s5 }
   0x7   :  { %5714 = sst [smem:[#allocation12_spill]] %s5625_s6 }
   0x8   :  { %5715 = sst [smem:[#allocation13_spill]] %s5626_s7 }
   0x9   :  { %5716 = sst [smem:[#allocation14_spill]] %s5627_s8 }
   0xa   :  { %5717 = sst [smem:[#allocation15_spill]] %s5628_s9 }
   0xb   :  { %5718 = sst [smem:[#allocation16_spill]] %s5629_s10 }
   0xc   :  { %5719 = sst [smem:[#allocation17_spill]] %s5630_s11 }
   0xd   :  { %5720 = sst [smem:[#allocation18_spill]] %s5631_s12 }
   0xe   :  { %5721 = sst [smem:[#allocation19_spill]] %s5632_s13 }
   0xf   :  { %5722 = sst [smem:[#allocation20_spill]] %s5634_s15 }
  0x10   :  { %5723 = sst [smem:[#allocation21_spill]] %s5635_s16 }
  0x11   :  { %5724 = sst [smem:[#allocation22_spill]] %s5636_s17 }
  0x12   :  { %5725 = sst [smem:[#allocation23_spill]] %s5637_s18 }
  0x13   :  { %5726 = sst [smem:[#allocation24_spill]] %s5638_s19 }
  0x14   :  { %5727 = sst [smem:[#allocation25_spill]] %s5639_s20 }
  0x15   :  { %5728 = sst [smem:[#allocation26_spill]] %s5640_s21 }
  0x16   :  { %5729 = sst [smem:[#allocation27_spill]] %s5641_s22 }
  0x17   :  { %5730 = sst [smem:[#allocation28_spill]] %s5642_s23 }
  0x18 LB: > { %5731 = sst [smem:[#allocation4_spill]] %s4674_s4  ;;  %s3660_s30 = sadd.s32 4294967295, %s4674_s4   ;;  %s4674_s4 = sphi %s4817_s4, %s33_s4  }
  0x19   : > { %p3664_p0 = scmp.ge.s32.totalorder %s4674_s4, 1  ;;  %p635_p1 = scmp.lt.s32.totalorder %s4674_s4, 3 }
  0x1b   : > { %p636_p2 = pnand %p3664_p0, %p635_p1 }
  0x1d   : > { %639 = sbr.rel (%p636_p2) target bundleno = 4365 (0x110d), region = 112 }
  0x24   : > { %p696_p3 = scmp.lt.s32.totalorder %s3660_s30, 1  ;;  %vm5677_vm0 = vcmask 130048   ;;  %v4676_v0 = vmov 0.0   ;;  %s5733_s5 = sld [smem:[#allocation6_spill]]  ;;  %vm717_vm1 = vcmask 1040440   ;;  %vm719_vm2 = vcmask 49152  }
  0x25   : > { %704 = vst [vmem:[#allocation2] sm:$0xff] %v4676_v0  ;;  %706 = vst.msk [vmem:[#allocation2 + $0x8] sm:$0xff] %vm5677_vm0, %v4676_v0  ;;  %s5690_s26 = smov 7   ;;  %s5682_s2 = smov 127   ;;  %v4690_v5 = vmov 0.0|0.0   ;;  %vm5675_vm3 = vmmov 0   ;;  %v993_v7 = vlaneseq }
  0x26   : > { %1635 = vst [vmem:[#allocation2 + $0x10] sm:$0xff] %v4676_v0  ;;  %s5826_s30 = smov (!%p696_p3, %s3660_s30), 1  ;;  %s5680_s6 = smov 126   ;;  %4338 = vmatprep.subr.bf16.mxu0 %v4690_v5  ;;  %4341 = vmatprep.subr.bf16.mxu1 %v4690_v5  ;;  %v4695_v8 = vmov 0   ;;  %v4696_v16 = vmov 1.0|1.0  }
  0x27   : > { %5732 = sst [smem:[#allocation5_spill]] %s5826_s30  ;;  %s5686_s27 = smov 125   ;;  %4048 = vmatprep.mubr.msk.f32.mxu0 %vm5675_vm3, %v4676_v0  ;;  %4083 = vmatprep.mubr.msk.f32.mxu1 %vm5675_vm3, %v4676_v0  ;;  %v4884_v9 = vshrl.u32 %v993_v7, 7  ;;  %v4886_v10 = vand.u32 127, %v993_v7  ;;  %vm5674_vm10 = vcmask 1039360   ;;  %vm5673_vm11 = vcmask 1031168  }
  0x28   : > { %s5684_s7 = smov 124   ;;  %s5692_s28 = smov 123   ;;  %4632 = vset.pattern.permute.xlu1 %v4695_v8  ;;  %4633 = vset.pattern.permute.xlu0 %v4695_v8  ;;  %vm5672_vm12 = vcmask 1022976   ;;  %vm5671_vm13 = vcmask 1014784   ;;  %vm5670_vm14 = vcmask 1006592   ;;  %vm5669_vm15 = vcmask 998400  }
  0x29   : > { %s5688_s29 = smov 122   ;;  %s5656_s3 = smov 121   ;;  %v4889_v11 = vadd.s32 8, %v4884_v9  ;;  %v4892_v12 = vmul.u32 2, %v4886_v10  ;;  %v4895_v13 = vadd.s32 16, %v4884_v9  ;;  %v4898_v14 = vadd.s32 24, %v4884_v9 }
  0x2a   : > { %s698_s1 = scalar_lea.vmem %s5733_s5, %s5826_s30  ;;  %s5694_s0 = smov 120   ;;  %v4974_v8 = vadd.s32 32, %v4884_v9 }
  0x2b   : > { %v3666_v1 = vld [vmem:[%s698_s1] ss:$0 sm:$0xff]  ;;  %s5648_s24 = smov 119   ;;  %s5650_s25 = smov 118   ;;  %vm1013_vm4 = vcmp.eq.s32.totalorder %v4884_v9, %v4892_v12  ;;  %vm1014_vm5 = vcmp.eq.s32.totalorder %v4889_v11, %v4892_v12  ;;  %vm1015_vm6 = vcmp.eq.s32.totalorder %v4895_v13, %v4892_v12  ;;  %vm1016_vm8 = vcmp.eq.s32.totalorder %v4898_v14, %v4892_v12 }
  0x2c   : > { %714 = vrot.lane.b32.xlu0 %v3666_v1, %s5690_s26  ;;  %s5652_s5 = smov 117   ;;  %s5654_s1 = smov 116   ;;  %vm4906_vm7 = vmpackc.low %vm1014_vm5, %vm1013_vm4  ;;  %vm5660_vm4 = vcmask 973824   ;;  %vm5661_vm5 = vcmask 965632   ;;  %v4940_v63 = vadd.s32 1, %v4892_v12 }
  0x2d   : > { %4343 = vmatpush3.bf16.msk.msra.mxu1 %vm4906_vm7, %v4696_v16  ;;  %vm4916_vm9 = vmpackc.low %vm1016_vm8, %vm1015_vm6  ;;  %vm5662_vm6 = vcmask 957440   ;;  %vm5664_vm8 = vcmask 949248   ;;  %s5759_s4 = sld [smem:[#allocation10_spill]]  ;;  %s5766_s21 = smov 7  }
  0x2e   : > { %4344 = vmatprep.subr.bf16.mxu1 %v4690_v5  ;;  %s5768_s30 = smov 127   ;;  %s5775_s22 = sld [smem:[#allocation11_spill]] }
  0x2f   : > { %s5777_s13 = sld [smem:[#allocation19_spill]]  ;;  %s5778_s9 = sld [smem:[#allocation15_spill]] }
  0x30   : > { %s5779_s11 = sld [smem:[#allocation17_spill]]  ;;  %s5780_s12 = sld [smem:[#allocation18_spill]] }
  0x31   : > { %4346 = vmatpush3.bf16.msk.msra.mxu1 %vm4916_vm9, %v4696_v16  ;;  %s5789_s8 = smov 114   ;;  %s5790_s16 = smov 121  }
  0x32   : > { %4347 = vmatprep.subr.bf16.mxu1 %v4690_v5  ;;  %s5791_s20 = sld [smem:[#allocation14_spill]]  ;;  %s5793_s17 = sld [smem:[#allocation23_spill]] }
  0x33   : > { %s5760_s23 = smov %s5759_s4  ;;  %s5794_s15 = sld [smem:[#allocation21_spill]] }
  0x34   : > { %s5823_s19 = sld [smem:[#allocation28_spill]] }
  0x9e   : > { %v715_v2 = vpop.permute.xlu0 %714 }
  0x9f   : > { %718 = vst.msk [vmem:[#allocation2] sm:$0x1] %vm717_vm1, %v715_v2  ;;  %vm5668_vm1 = vcmask 990208  }
  0xa0   : > { %720 = vst.msk [vmem:[#allocation2 + $0x8] sm:$0x1] %vm719_vm2, %v715_v2  ;;  %vm5667_vm2 = vcmask 982016  }
  0xa6   : > { %v723_v4 = vld [vmem:[#allocation2] ss:$0 sm:$0xff] }
  0xa7   : > { %v724_v3 = vld [vmem:[#allocation2 + $0x8] ss:$0 sm:$0xff]  ;;  %727 = vrot.lane.b32.xlu0 %v723_v4, %s5682_s2  ;;  %722 = vst [vmem:[#allocation3] sm:$0x1] %v723_v4  ;;  %1251 = vst [vmem:[#allocation2] sm:$0xff] %v4676_v0 }
  0xa8   : > { %729 = vrot.lane.b32.xlu1 %v724_v3, %s5682_s2  ;;  %1252 = vst.msk [vmem:[#allocation2 + $0x8] sm:$0xff] %vm5677_vm0, %v4676_v0 }
  0xa9   : > { %1634 = vst.msk [vmem:[#allocation2 + $0x8] sm:$0xff] %vm5677_vm0, %v4676_v0 }
  0xaa   : > { %2558 = vst.msk [vmem:[#allocation2 + $0x8] sm:$0xff] %vm5677_vm0, %v4676_v0 }
  0xab   : > { %3229 = vst.msk [vmem:[#allocation2 + $0x8] sm:$0xff] %vm5677_vm0, %v4676_v0  ;;  %741 = vrot.lane.b32.xlu0 %v724_v3, %s5680_s6 }
  0xac   : > { %739 = vrot.lane.b32.xlu1 %v723_v4, %s5680_s6 }
  0xaf   : > { %753 = vrot.lane.b32.xlu0 %v724_v3, %s5686_s27 }
  0xb0   : > { %751 = vrot.lane.b32.xlu1 %v723_v4, %s5686_s27 }
  0xb3   : > { %765 = vrot.lane.b32.xlu0 %v724_v3, %s5684_s7 }
  0xb4   : > { %763 = vrot.lane.b32.xlu1 %v723_v4, %s5684_s7 }
  0xb7   : > { %777 = vrot.lane.b32.xlu0 %v724_v3, %s5692_s28 }
  0xb8   : > { %775 = vrot.lane.b32.xlu1 %v723_v4, %s5692_s28 }
  0xbb   : > { %789 = vrot.lane.b32.xlu0 %v724_v3, %s5688_s29 }
  0xbc   : > { %787 = vrot.lane.b32.xlu1 %v723_v4, %s5688_s29 }
  0xbf   : > { %801 = vrot.lane.b32.xlu0 %v724_v3, %s5656_s3 }
  0xc0   : > { %799 = vrot.lane.b32.xlu1 %v723_v4, %s5656_s3  ;;  %s5752_s3 = smov 121  }
  0xc3   : > { %813 = vrot.lane.b32.xlu0 %v724_v3, %s5694_s0 }
  0xc4   : > { %811 = vrot.lane.b32.xlu1 %v723_v4, %s5694_s0 }
  0xc7   : > { %825 = vrot.lane.b32.xlu0 %v724_v3, %s5648_s24 }
  0xc8   : > { %823 = vrot.lane.b32.xlu1 %v723_v4, %s5648_s24  ;;  %s5658_s24 = smov 115  }
  0xcb   : > { %837 = vrot.lane.b32.xlu0 %v724_v3, %s5650_s25 }
  0xcc   : > { %835 = vrot.lane.b32.xlu1 %v723_v4, %s5650_s25  ;;  %s5703_s25 = smov 114  }
  0xcf   : > { %849 = vrot.lane.b32.xlu0 %v724_v3, %s5652_s5 }
  0xd0   : > { %847 = vrot.lane.b32.xlu1 %v723_v4, %s5652_s5  ;;  %s5698_s5 = smov 113  }
  0xd3   : > { %861 = vrot.lane.b32.xlu0 %v724_v3, %s5654_s1 }
  0xd4   : > { %859 = vrot.lane.b32.xlu1 %v723_v4, %s5654_s1  ;;  %s5739_s1 = sld [smem:[#allocation7_spill]] }
  0xd7   : > { %873 = vrot.lane.b32.xlu0 %v724_v3, %s5658_s24 }
  0xd8   : > { %871 = vrot.lane.b32.xlu1 %v723_v4, %s5658_s24  ;;  %s5734_s24 = sld [smem:[#allocation8_spill]] }
  0xdb   : > { %885 = vrot.lane.b32.xlu0 %v724_v3, %s5703_s25 }
  0xdc   : > { %883 = vrot.lane.b32.xlu1 %v723_v4, %s5703_s25 }
  0xde   : > { %v906_v6 = vld [vmem:[%s5734_s24] sm:$0xff]  ;;  %s5753_s24 = smov 118  }
  0xdf   : > { %897 = vrot.lane.b32.xlu0 %v724_v3, %s5698_s5 }
  0xe0   : > { %895 = vrot.lane.b32.xlu1 %v723_v4, %s5698_s5  ;;  %v903_v4 = vld [vmem:[%s5739_s1] sm:$0xff]  ;;  %s5754_s1 = smov 119  }
  0xe4   : > { %909 = vperm.xlu1 %4632, %v906_v6  }
 0x119   : > { %v728_v19 = vpop.permute.xlu0 %727 }
 0x11a   : > { %v730_v18 = vpop.permute.xlu1 %729 }
 0x11b   : > { %v732_v20 = vsel %vm5674_vm10, %v728_v19, %v730_v18  ;;  %v4977_v18 = vadd.s32 40, %v4884_v9 }
 0x11c   : > { %734 = vst [vmem:[#allocation3 + $0x1] sm:$0x1] %v732_v20 }
 0x11d   : > { %v742_v22 = vpop.permute.xlu0 %741 }
 0x11e   : > { %v740_v21 = vpop.permute.xlu1 %739 }
 0x11f   : > { %v744_v23 = vsel %vm5673_vm11, %v740_v21, %v742_v22  ;;  %v4999_v21 = vadd.s32 48, %v4884_v9  ;;  %v5002_v22 = vadd.s32 56, %v4884_v9 }
 0x120   : > { %746 = vst [vmem:[#allocation3 + $0x2] sm:$0x1] %v744_v23 }
 0x121   : > { %v754_v25 = vpop.permute.xlu0 %753 }
 0x122   : > { %v752_v24 = vpop.permute.xlu1 %751 }
 0x123   : > { %v756_v26 = vsel %vm5672_vm12, %v752_v24, %v754_v25  ;;  %v5750_v24 = vmov 0  ;;  %v1002_v25 = vadd.s32 64, %v4884_v9 }
 0x124   : > { %758 = vst [vmem:[#allocation3 + $0x3] sm:$0x1] %v756_v26  ;;  %v1003_v26 = vadd.s32 72, %v4884_v9 }
 0x125   : > { %v766_v28 = vpop.permute.xlu0 %765 }
 0x126   : > { %v764_v27 = vpop.permute.xlu1 %763 }
 0x127   : > { %v768_v29 = vsel %vm5671_vm13, %v764_v27, %v766_v28  ;;  %v1004_v27 = vadd.s32 80, %v4884_v9  ;;  %v1005_v28 = vadd.s32 88, %v4884_v9 }
 0x128   : > { %770 = vst [vmem:[#allocation3 + $0x4] sm:$0x1] %v768_v29  ;;  %v1006_v29 = vadd.s32 96, %v4884_v9 }
 0x129   : > { %v778_v31 = vpop.permute.xlu0 %777 }
 0x12a   : > { %v776_v30 = vpop.permute.xlu1 %775 }
 0x12b   : > { %v780_v32 = vsel %vm5670_vm14, %v776_v30, %v778_v31  ;;  %v1007_v30 = vadd.s32 104, %v4884_v9  ;;  %v1008_v31 = vadd.s32 112, %v4884_v9 }
 0x12c   : > { %782 = vst [vmem:[#allocation3 + $0x5] sm:$0x1] %v780_v32  ;;  %v1009_v32 = vadd.s32 120, %v4884_v9 }
 0x12d   : > { %v790_v34 = vpop.permute.xlu0 %789 }
 0x12e   : > { %v788_v33 = vpop.permute.xlu1 %787 }
 0x12f   : > { %v792_v35 = vsel %vm5669_vm15, %v788_v33, %v790_v34 }
 0x130   : > { %794 = vst [vmem:[#allocation3 + $0x6] sm:$0x1] %v792_v35 }
 0x131   : > { %v802_v37 = vpop.permute.xlu0 %801 }
 0x132   : > { %v800_v36 = vpop.permute.xlu1 %799 }
 0x133   : > { %v804_v38 = vsel %vm5668_vm1, %v800_v36, %v802_v37  ;;  %vm1067_vm1 = vcmp.eq.s32.totalorder %v4977_v18, %v4940_v63 }
 0x134   : > { %806 = vst [vmem:[#allocation3 + $0x7] sm:$0x1] %v804_v38 }
 0x135   : > { %v814_v40 = vpop.permute.xlu0 %813 }
 0x136   : > { %v812_v39 = vpop.permute.xlu1 %811 }
 0x137   : > { %v816_v41 = vsel %vm5667_vm2, %v812_v39, %v814_v40  ;;  %vm1065_vm2 = vcmp.eq.s32.totalorder %v4898_v14, %v4940_v63 }
 0x138   : > { %818 = vst [vmem:[#allocation3 + $0x8] sm:$0x1] %v816_v41 }
 0x139   : > { %v826_v43 = vpop.permute.xlu0 %825 }
 0x13a   : > { %v824_v42 = vpop.permute.xlu1 %823 }
 0x13b   : > { %v828_v44 = vsel %vm5660_vm4, %v824_v42, %v826_v43  ;;  %vm5663_vm4 = vcmask 941056   ;;  %v904_v1 = vld [vmem:[#allocation3] sm:$0xff] }
 0x13c   : > { %830 = vst [vmem:[#allocation3 + $0x9] sm:$0x1] %v828_v44 }
 0x13d   : > { %v838_v46 = vpop.permute.xlu0 %837 }
 0x13e   : > { %v836_v45 = vpop.permute.xlu1 %835 }
 0x13f   : > { %v840_v47 = vsel %vm5661_vm5, %v836_v45, %v838_v46  ;;  %vm5666_vm5 = vcmask 932864  }
 0x140   : > { %842 = vst [vmem:[#allocation3 + $0xa] sm:$0x1] %v840_v47 }
 0x141   : > { %v850_v49 = vpop.permute.xlu0 %849 }
 0x142   : > { %v848_v48 = vpop.permute.xlu1 %847 }
 0x143   : > { %v852_v50 = vsel %vm5662_vm6, %v848_v48, %v850_v49  ;;  %vm5665_vm6 = vcmask 924672   ;;  %v1373_v49 = vld [vmem:[%s5759_s4 + $0x8] sm:$0xff]  ;;  %s5767_s4 = smov 120  }
 0x144   : > { %854 = vst [vmem:[#allocation3 + $0xb] sm:$0x1] %v852_v50  ;;  %v1372_v50 = vld [vmem:[%s5760_s23] sm:$0xff]  ;;  %s5773_s23 = smov 122  }
 0x145   : > { %v862_v52 = vpop.permute.xlu0 %861 }
 0x146   : > { %v860_v51 = vpop.permute.xlu1 %859 }
 0x147   : > { %v864_v53 = vsel %vm5664_vm8, %v860_v51, %v862_v52  ;;  %vm1063_vm8 = vcmp.eq.s32.totalorder %v4889_v11, %v4940_v63 }
 0x148   : > { %866 = vst [vmem:[#allocation3 + $0xc] sm:$0x1] %v864_v53 }
 0x149   : > { %v874_v55 = vpop.permute.xlu0 %873 }
 0x14a   : > { %v872_v54 = vpop.permute.xlu1 %871 }
 0x14b   : > { %v876_v56 = vsel %vm5663_vm4, %v872_v54, %v874_v55  ;;  %vm1062_vm4 = vcmp.eq.s32.totalorder %v4884_v9, %v4940_v63 }
 0x14c   : > { %878 = vst [vmem:[#allocation3 + $0xd] sm:$0x1] %v876_v56 }
 0x14d   : > { %v886_v58 = vpop.permute.xlu0 %885 }
 0x14e   : > { %v884_v57 = vpop.permute.xlu1 %883 }
 0x14f   : > { %v888_v59 = vsel %vm5666_vm5, %v884_v57, %v886_v58  ;;  %vm1064_vm5 = vcmp.eq.s32.totalorder %v4895_v13, %v4940_v63 }
 0x150   : > { %890 = vst [vmem:[#allocation3 + $0xe] sm:$0x1] %v888_v59 }
 0x151   : > { %v898_v61 = vpop.permute.xlu0 %897 }
 0x152   : > { %v896_v60 = vpop.permute.xlu1 %895 }
 0x153   : > { %v900_v62 = vsel %vm5665_vm6, %v896_v60, %v898_v61  ;;  %vm4950_vm6 = vmpackc.low %vm1063_vm8, %vm1062_vm4  ;;  %vm1017_vm8 = vcmp.eq.s32.totalorder %v4974_v8, %v4892_v12 }
 0x154   : > { %902 = vst [vmem:[#allocation3 + $0xf] sm:$0x1] %v900_v62  ;;  %vm4965_vm4 = vmpackc.low %vm1065_vm2, %vm1064_vm5  ;;  %vm1018_vm2 = vcmp.eq.s32.totalorder %v4977_v18, %v4892_v12  ;;  %vm1066_vm5 = vcmp.eq.s32.totalorder %v4974_v8, %v4940_v63 }
 0x155   : > { %vm4987_vm15 = vmpackc.low %vm1018_vm2, %vm1017_vm8  ;;  %vm1020_vm8 = vcmp.eq.s32.totalorder %v5002_v22, %v4892_v12  ;;  %vm1068_vm2 = vcmp.eq.s32.totalorder %v4999_v21, %v4940_v63 }
 0x156   : > { %4349 = vmatpush3.bf16.msk.msra.mxu1 %vm4987_vm15, %v4696_v16  ;;  %vm4994_vm14 = vmpackc.low %vm1067_vm1, %vm1066_vm5  ;;  %vm1019_vm1 = vcmp.eq.s32.totalorder %v4999_v21, %v4892_v12  ;;  %vm1069_vm5 = vcmp.eq.s32.totalorder %v5002_v22, %v4940_v63 }
 0x157   : > { %4350 = vmatprep.subr.bf16.mxu1 %v4690_v5  ;;  %vm5017_vm13 = vmpackc.low %vm1020_vm8, %vm1019_vm1  ;;  %vm1021_vm1 = vcmp.eq.s32.totalorder %v1002_v25, %v4892_v12  ;;  %vm1022_vm8 = vcmp.eq.s32.totalorder %v1003_v26, %v4892_v12 }
 0x158   : > { %vm5024_vm12 = vmpackc.low %vm1069_vm5, %vm1068_vm2  ;;  %vm1070_vm2 = vcmp.eq.s32.totalorder %v1002_v25, %v4940_v63  ;;  %vm1071_vm5 = vcmp.eq.s32.totalorder %v1003_v26, %v4940_v63 }
 0x159   : > { %v5751_v24 = vsel %vm5024_vm12, 4294967295, %v5750_v24  ;;  %vm4354_vm11 = vmpackc.low %vm1022_vm8, %vm1021_vm1  ;;  %vm1073_vm1 = vcmp.eq.s32.totalorder %v1005_v28, %v4940_v63 }
 0x15a   : > { %4352 = vmatpush3.bf16.msk.msra.mxu1 %vm5017_vm13, %v4696_v16  ;;  %vm4378_vm10 = vmpackc.low %vm1071_vm5, %vm1070_vm2  ;;  %vm1026_vm2 = vcmp.eq.s32.totalorder %v1007_v30, %v4892_v12  ;;  %vm1074_vm5 = vcmp.eq.s32.totalorder %v1006_v29, %v4940_v63 }
 0x15b   : > { %v905_v2 = vld [vmem:[#allocation3 + $0x8] sm:$0xff]  ;;  %4353 = vmatprep.subr.bf16.mxu1 %v4690_v5 }
 0x15c   : > { %v4339_v3 = vpack.c.bf16 %v905_v2, %v904_v1 }
 0x15e   : > { %4340 = vmatpush3.bf16.msra.mxu0 %v4339_v3  ;;  %4355 = vmatpush3.bf16.msk.msra.mxu1 %vm4354_vm11, %v4696_v16 }
 0x15f   : > { %4365 = vmatprep.subr.bf16.mxu0 %v4690_v5  ;;  %4356 = vmatprep.subr.bf16.mxu1 %v4690_v5 }
 0x161   : > { %4049 = vmatmul.mubr.msk.f32.vlgmr.msra.gmra.mrb[0].mxu0 %vm5677_vm0, %v903_v4  ;;  %vm1024_vm0 = vcmp.eq.s32.totalorder %v1005_v28, %v4892_v12 }
 0x162   : > { %4367 = vmatpush3.bf16.msk.msra.mxu0 %vm4950_vm6, %v4696_v16  ;;  %4118 = vmatprep.mubr.msk.f32.mxu0 %vm5675_vm3, %v4676_v0  ;;  %vm1023_vm3 = vcmp.eq.s32.totalorder %v1004_v27, %v4892_v12 }
 0x163   : > { %4368 = vmatprep.subr.bf16.mxu0 %v4690_v5  ;;  %vm4357_vm11 = vmpackc.low %vm1024_vm0, %vm1023_vm3  ;;  %vm1075_vm0 = vcmp.eq.s32.totalorder %v1007_v30, %v4940_v63  ;;  %v910_v33 = vpop.permute.xlu1 %909 }
 0x164   : > { %4358 = vmatpush3.bf16.msk.msra.mxu1 %vm4357_vm11, %v4696_v16  ;;  %vm1028_vm11 = vcmp.eq.s32.totalorder %v1009_v32, %v4892_v12 }
 0x165   : > { %4359 = vmatprep.subr.bf16.mxu1 %v4690_v5 }
 0x166   : > { %4370 = vmatpush3.bf16.msk.msra.mxu0 %vm4965_vm4, %v4696_v16 }
 0x167   : > { %4371 = vmatprep.subr.bf16.mxu0 %v4690_v5 }
 0x16a   : > { %4373 = vmatpush3.bf16.msk.msra.mxu0 %vm4994_vm14, %v4696_v16 }
 0x16b   : > { %4374 = vmatprep.subr.bf16.mxu0 %v4690_v5 }
 0x16e   : > { %4376 = vmatpush3.bf16.msk.msra.mxu0 %vm5024_vm12, %v4696_v16  ;;  %vm1072_vm12 = vcmp.eq.s32.totalorder %v1004_v27, %v4940_v63 }
 0x16f   : > { %4377 = vmatprep.subr.bf16.mxu0 %v4690_v5  ;;  %vm4381_vm8 = vmpackc.low %vm1073_vm1, %vm1072_vm12  ;;  %vm1027_vm1 = vcmp.eq.s32.totalorder %v1008_v31, %v4892_v12 }
 0x170   : > { %vm4384_vm12 = vmpackc.low %vm1075_vm0, %vm1074_vm5 }
 0x172   : > { %4379 = vmatpush3.bf16.msk.msra.mxu0 %vm4378_vm10, %v4696_v16  ;;  %vm1025_vm10 = vcmp.eq.s32.totalorder %v1006_v29, %v4892_v12 }
 0x173   : > { %4380 = vmatprep.subr.bf16.mxu0 %v4690_v5  ;;  %vm4360_vm3 = vmpackc.low %vm1026_vm2, %vm1025_vm10  ;;  %vm1077_vm10 = vcmp.eq.s32.totalorder %v1009_v32, %v4940_v63 }
 0x174   : > { %4361 = vmatpush3.bf16.msk.msra.mxu1 %vm4360_vm3, %v4696_v16  ;;  %vm4363_vm2 = vmpackc.low %vm1028_vm11, %vm1027_vm1  ;;  %vm5765_vm3 = vmmov 0   ;;  %vm1650_vm1 = vcmask 261120   ;;  %vm2105_vm11 = vcmask 64512  }
 0x175   : > { %4362 = vmatprep.subr.bf16.mxu1 %v4690_v5 }
 0x176   : > { %4382 = vmatpush3.bf16.msk.msra.mxu0 %vm4381_vm8, %v4696_v16  ;;  %vm1076_vm8 = vcmp.eq.s32.totalorder %v1008_v31, %v4940_v63 }
 0x177   : > { %4383 = vmatprep.subr.bf16.mxu0 %v4690_v5  ;;  %vm4387_vm5 = vmpackc.low %vm1077_vm10, %vm1076_vm8  ;;  %vm2198_vm8 = vcmask 195584  }
 0x178   : > { %4364 = vmatpush3.bf16.msk.msra.mxu1 %vm4363_vm2, %v4696_v16 }
 0x17a   : > { %4385 = vmatpush3.bf16.msk.msra.mxu0 %vm4384_vm12, %v4696_v16  ;;  %vm1645_vm12 = vcmask 318520  }
 0x17b   : > { %4386 = vmatprep.subr.bf16.mxu0 %v4690_v5 }
 0x17e   : > { %4388 = vmatpush3.bf16.msk.msra.mxu0 %vm4387_vm5, %v4696_v16 }
 0x17f   : > { %4422 = vmatprep.subr.msk.bf16.mxu0 %vm4906_vm7, %v4696_v16 }
 0x234   : > { %v981_v34 = vpop.f32.mrb[0].mxu0 }
 0x235   : > { %v982_v35 = vadd.f32 %v981_v34, %v910_v33  ;;  %v4050_v36 = vpop.f32.mrb[1].mxu0 }
 0x237   : > { %v986_v37 = vmin.f32 %v982_v35, 0.0  ;;  %vm985_vm0 = vcmp.gt.f32.partialorder %v982_v35, 0.0 }
 0x239   : > { %v987_v12 = vmul.f32 1.442695, %v986_v37 }
 0x23b   : > { %4634 = vpow2.f32 %v987_v12 }
 0x245   : > { %v4635_v38 = vpop.eup %4634 }
 0x246   : > { %v3668_v39 = vadd.f32 -1.0, %v4635_v38 }
 0x248   : > { %v990_v40 = vmul.f32 1.6732632, %v3668_v39 }
 0x24a   : > { %v991_v41 = vsel %vm985_vm0, %v982_v35, %v990_v40 }
 0x24b   : > { %v5074_v42 = vmul.f32 1.050701, %v991_v41 }
 0x24d   : > { %4084 = vmatmul.mubr.f32.vlgmr.msra.gmra.mrb[0].mxu1 %v5074_v42  ;;  %4119 = vmatmul.mubr.f32.vlgmr.msra.gmra.mrb[2].mxu0 %v5074_v42 }
 0x24e   : > { %4424 = vmatpush3.bf16.msk.msra.mxu0 %vm4906_vm7, %v4696_v16  ;;  %vm1259_vm7 = vcmask 580664  }
 0x24f   : > { %4426 = vmatprep.subr.msk.bf16.mxu0 %vm4916_vm9, %v4696_v16 }
 0x252   : > { %4428 = vmatpush3.bf16.msk.msra.mxu0 %vm4916_vm9, %v4696_v16  ;;  %vm1262_vm9 = vcmask 523264  }
 0x253   : > { %4430 = vmatprep.subr.msk.bf16.mxu0 %vm4987_vm15, %v4696_v16 }
 0x256   : > { %4432 = vmatpush3.bf16.msk.msra.mxu0 %vm4987_vm15, %v4696_v16 }
 0x257   : > { %4434 = vmatprep.subr.msk.bf16.mxu0 %vm5017_vm13, %v4696_v16 }
 0x25a   : > { %4436 = vmatpush3.bf16.msk.msra.mxu0 %vm5017_vm13, %v4696_v16 }
 0x25b   : > { %4438 = vmatprep.subr.msk.bf16.mxu0 %vm4950_vm6, %v4696_v16 }
 0x320   : > { %v1176_v15 = vpop.f32.mrb[0].mxu1  ;;  %v1246_v17 = vpop.f32.mrb[2].mxu0 }
 0x321   : > { %v1250_v43 = vmax.f32 %v1176_v15, %v1246_v17  ;;  %v4085_v44 = vpop.f32.mrb[1].mxu1  ;;  %v4120_v45 = vpop.f32.mrb[3].mxu0 }
 0x323   : > { %1256 = vrot.lane.b32.xlu0 %v1250_v43, %s5690_s26  ;;  %s5758_s26 = sld [smem:[#allocation9_spill]] }
 0x329   : > { %v1354_v48 = vld [vmem:[%s5758_s26] sm:$0xff]  ;;  %v1355_v43 = vld [vmem:[%s5758_s26 + $0x8] sm:$0xff]  ;;  %s5774_s26 = smov 113  }
 0x32a   : > { %4153 = vmatprep.mubr.f32.mxu1 %v1354_v48 }
 0x395   : > { %v1257_v46 = vpop.permute.xlu0 %1256 }
 0x396   : > { %1260 = vst.msk [vmem:[#allocation2] sm:$0xff] %vm1259_vm7, %v1257_v46 }
 0x39d   : > { %v1261_v47 = vld [vmem:[#allocation2] sm:$0xff] }
 0x39e   : > { %1272 = vrot.lane.b32.xlu0 %v1261_v47, %s5680_s6  ;;  %1266 = vrot.lane.b32.xlu1 %v1261_v47, %s5682_s2  ;;  %1633 = vst [vmem:[#allocation2] sm:$0xff] %v4676_v0  ;;  %1263 = vst.msk [vmem:[#allocation3] sm:$0xff] %vm1262_vm9, %v1261_v47  ;;  %s5755_s6 = smov 116   ;;  %s5756_s2 = smov 117  }
 0x3a2   : > { %1284 = vrot.lane.b32.xlu0 %v1261_v47, %s5684_s7  ;;  %1278 = vrot.lane.b32.xlu1 %v1261_v47, %s5686_s27  ;;  %s5757_s7 = smov 115   ;;  %s5769_s27 = smov 126  }
 0x3a5   : > { %v1356_v57 = vld [vmem:[#allocation3] sm:$0xff] }
 0x3a6   : > { %1296 = vrot.lane.b32.xlu0 %v1261_v47, %s5688_s29  ;;  %1290 = vrot.lane.b32.xlu1 %v1261_v47, %s5692_s28  ;;  %s5762_s28 = sld [smem:[#allocation13_spill]]  ;;  %s5770_s29 = smov 125  }
 0x3aa   : > { %1308 = vrot.lane.b32.xlu0 %v1261_v47, %s5694_s0  ;;  %1302 = vrot.lane.b32.xlu1 %v1261_v47, %s5752_s3  ;;  %s5771_s0 = smov 124  }
 0x3ac   : > { %v1993_v6 = vld [vmem:[%s5762_s28] sm:$0xff]  ;;  %v1994_v7 = vld [vmem:[%s5762_s28 + $0x8] sm:$0xff] }
 0x3ae   : > { %1320 = vrot.lane.b32.xlu0 %v1261_v47, %s5753_s24  ;;  %1314 = vrot.lane.b32.xlu1 %v1261_v47, %s5754_s1 }
 0x3b2   : > { %1332 = vrot.lane.b32.xlu0 %v1261_v47, %s5755_s6  ;;  %1326 = vrot.lane.b32.xlu1 %v1261_v47, %s5756_s2 }
 0x3b6   : > { %1344 = vrot.lane.b32.xlu0 %v1261_v47, %s5703_s25  ;;  %1338 = vrot.lane.b32.xlu1 %v1261_v47, %s5757_s7 }
 0x3ba   : > { %1350 = vrot.lane.b32.xlu1 %v1261_v47, %s5698_s5  ;;  %1376 = vperm.xlu0 %4633, %v1372_v50   ;;  %s5772_s5 = smov 123  }
 0x3be   : > { %1381 = vperm.xlu1 %4632, %v1373_v49  }
 0x410   : > { %v1273_v51 = vpop.permute.xlu0 %1272  ;;  %v1267_v52 = vpop.permute.xlu1 %1266 }
 0x411   : > { %1275 = vst.msk [vmem:[#allocation3 + $0x10] sm:$0xff] %vm1262_vm9, %v1273_v51  ;;  %1269 = vst.msk [vmem:[#allocation3 + $0x8] sm:$0xff] %vm1262_vm9, %v1267_v52 }
 0x414   : > { %v1285_v53 = vpop.permute.xlu0 %1284  ;;  %v1279_v54 = vpop.permute.xlu1 %1278 }
 0x415   : > { %1287 = vst.msk [vmem:[#allocation3 + $0x20] sm:$0xff] %vm1262_vm9, %v1285_v53  ;;  %1281 = vst.msk [vmem:[#allocation3 + $0x18] sm:$0xff] %vm1262_vm9, %v1279_v54 }
 0x418   : > { %v1297_v55 = vpop.permute.xlu0 %1296  ;;  %v1291_v56 = vpop.permute.xlu1 %1290  ;;  %v1357_v58 = vld [vmem:[#allocation3 + $0x8] sm:$0xff]  ;;  %v1358_v62 = vld [vmem:[#allocation3 + $0x10] sm:$0xff] }
 0x419   : > { %1299 = vst.msk [vmem:[#allocation3 + $0x30] sm:$0xff] %vm1262_vm9, %v1297_v55  ;;  %1293 = vst.msk [vmem:[#allocation3 + $0x28] sm:$0xff] %vm1262_vm9, %v1291_v56  ;;  %v4389_v59 = vpack.c.bf16 %v1357_v58, %v1356_v57 }
 0x41b   : > { %4390 = vmatprep.subr.bf16.mxu1 %v4389_v59 }
 0x41c   : > { %v1309_v60 = vpop.permute.xlu0 %1308  ;;  %v1303_v61 = vpop.permute.xlu1 %1302  ;;  %4392 = vmatpush3.bf16.msra.mxu1 %v4389_v59  ;;  %v1359_v63 = vld [vmem:[#allocation3 + $0x18] sm:$0xff]  ;;  %v1360_v4 = vld [vmem:[#allocation3 + $0x20] sm:$0xff] }
 0x41d   : > { %1311 = vst.msk [vmem:[#allocation3 + $0x40] sm:$0xff] %vm1262_vm9, %v1309_v60  ;;  %1305 = vst.msk [vmem:[#allocation3 + $0x38] sm:$0xff] %vm1262_vm9, %v1303_v61  ;;  %v4393_v1 = vpack.c.bf16 %v1359_v63, %v1358_v62 }
 0x41f   : > { %4394 = vmatprep.subr.bf16.mxu1 %v4393_v1 }
 0x420   : > { %v1321_v2 = vpop.permute.xlu0 %1320  ;;  %v1315_v3 = vpop.permute.xlu1 %1314  ;;  %4396 = vmatpush3.bf16.msra.mxu1 %v4393_v1  ;;  %v1361_v19 = vld [vmem:[#allocation3 + $0x28] sm:$0xff]  ;;  %v1362_v27 = vld [vmem:[#allocation3 + $0x30] sm:$0xff] }
 0x421   : > { %1323 = vst.msk [vmem:[#allocation3 + $0x50] sm:$0xff] %vm1262_vm9, %v1321_v2  ;;  %1317 = vst.msk [vmem:[#allocation3 + $0x48] sm:$0xff] %vm1262_vm9, %v1315_v3  ;;  %v4397_v23 = vpack.c.bf16 %v1361_v19, %v1360_v4 }
 0x423   : > { %4398 = vmatprep.subr.bf16.mxu1 %v4397_v23 }
 0x424   : > { %v1333_v25 = vpop.permute.xlu0 %1332  ;;  %v1327_v26 = vpop.permute.xlu1 %1326  ;;  %4400 = vmatpush3.bf16.msra.mxu1 %v4397_v23  ;;  %v1363_v28 = vld [vmem:[#allocation3 + $0x38] sm:$0xff]  ;;  %v1364_v32 = vld [vmem:[#allocation3 + $0x40] sm:$0xff] }
 0x425   : > { %1335 = vst.msk [vmem:[#allocation3 + $0x60] sm:$0xff] %vm1262_vm9, %v1333_v25  ;;  %1329 = vst.msk [vmem:[#allocation3 + $0x58] sm:$0xff] %vm1262_vm9, %v1327_v26  ;;  %v4401_v29 = vpack.c.bf16 %v1363_v28, %v1362_v27  ;;  %v1834_v27 = vld [vmem:[%s5775_s22 + $0x8] sm:$0xff] }
 0x427   : > { %4402 = vmatprep.subr.bf16.mxu1 %v4401_v29 }
 0x428   : > { %v1345_v30 = vpop.permute.xlu0 %1344  ;;  %v1339_v31 = vpop.permute.xlu1 %1338  ;;  %4404 = vmatpush3.bf16.msra.mxu1 %v4401_v29  ;;  %v1365_v33 = vld [vmem:[#allocation3 + $0x48] sm:$0xff]  ;;  %v1366_v36 = vld [vmem:[#allocation3 + $0x50] sm:$0xff] }
 0x429   : > { %1347 = vst.msk [vmem:[#allocation3 + $0x70] sm:$0xff] %vm1262_vm9, %v1345_v30  ;;  %1341 = vst.msk [vmem:[#allocation3 + $0x68] sm:$0xff] %vm1262_vm9, %v1339_v31  ;;  %v4405_v34 = vpack.c.bf16 %v1365_v33, %v1364_v32  ;;  %v2186_v30 = vld [vmem:[%s5777_s13] sm:$0xff]  ;;  %v2187_v32 = vld [vmem:[%s5777_s13 + $0x8] sm:$0xff] }
 0x42b   : > { %4406 = vmatprep.subr.bf16.mxu1 %v4405_v34 }
 0x42c   : > { %v1351_v35 = vpop.permute.xlu1 %1350  ;;  %4408 = vmatpush3.bf16.msra.mxu1 %v4405_v34  ;;  %v1367_v37 = vld [vmem:[#allocation3 + $0x58] sm:$0xff]  ;;  %v1368_v38 = vld [vmem:[#allocation3 + $0x60] sm:$0xff] }
 0x42d   : > { %1353 = vst.msk [vmem:[#allocation3 + $0x78] sm:$0xff] %vm1262_vm9, %v1351_v35  ;;  %v4409_v12 = vpack.c.bf16 %v1367_v37, %v1366_v36 }
 0x42f   : > { %4410 = vmatprep.subr.bf16.mxu1 %v4409_v12 }
 0x430   : > { %4412 = vmatpush3.bf16.msra.mxu1 %v4409_v12  ;;  %v1369_v39 = vld [vmem:[#allocation3 + $0x68] sm:$0xff]  ;;  %v1370_v41 = vld [vmem:[#allocation3 + $0x70] sm:$0xff] }
 0x431   : > { %v4413_v40 = vpack.c.bf16 %v1369_v39, %v1368_v38 }
 0x433   : > { %4414 = vmatprep.subr.bf16.mxu1 %v4413_v40 }
 0x434   : > { %4416 = vmatpush3.bf16.msra.mxu1 %v4413_v40  ;;  %v1371_v15 = vld [vmem:[#allocation3 + $0x78] sm:$0xff] }
 0x435   : > { %v4417_v17 = vpack.c.bf16 %v1371_v15, %v1370_v41 }
 0x437   : > { %4418 = vmatprep.subr.bf16.mxu1 %v4417_v17 }
 0x438   : > { %4420 = vmatpush3.bf16.msra.mxu1 %v4417_v17 }
 0x439   : > { %v1377_v44 = vpop.permute.xlu0 %1376 }
 0x43b   : > { %4154 = vmatmul.mubr.f32.vlgmr.msra.gmra.mrb[2].mxu1 %v1355_v43 }
 0x43c   : > { %1953 = vmatprep.mubr.f32.mxu1 %v1834_v27 }
 0x43d   : > { %v1382_v45 = vpop.permute.xlu1 %1381 }
 0x50e   : > { %v4155_v46 = vpop.f32.mrb[2].mxu1 }
 0x50f   : > { %v1456_v47 = vadd.f32 %v4155_v46, %v1382_v45  ;;  %v1450_v48 = vpop.f32.mrb[3].mxu1 }
 0x510   : > { %v1451_v49 = vadd.f32 %v1450_v48, %v1377_v44 }
 0x511   : > { %v1462_v50 = vmin.f32 %v1456_v47, 0.0  ;;  %vm1460_vm13 = vcmp.gt.f32.partialorder %v1456_v47, 0.0 }
 0x512   : > { %v1461_v51 = vmin.f32 %v1451_v49, 0.0  ;;  %vm1459_vm15 = vcmp.gt.f32.partialorder %v1451_v49, 0.0 }
 0x513   : > { %v1465_v52 = vmul.f32 1.442695, %v1462_v50 }
 0x514   : > { %v1463_v53 = vmul.f32 1.442695, %v1461_v51 }
 0x515   : > { %4636 = vpow2.f32 %v1465_v52 }
 0x516   : > { %4638 = vpow2.f32 %v1463_v53 }
 0x51f   : > { %v4637_v54 = vpop.eup %4636 }
 0x520   : > { %v4639_v55 = vpop.eup %4638  ;;  %v3734_v56 = vadd.f32 -1.0, %v4637_v54 }
 0x521   : > { %v3733_v57 = vadd.f32 -1.0, %v4639_v55 }
 0x522   : > { %v1470_v58 = vmul.f32 1.6732632, %v3734_v56 }
 0x523   : > { %v1469_v59 = vmul.f32 1.6732632, %v3733_v57 }
 0x524   : > { %v1472_v60 = vsel %vm1460_vm13, %v1456_v47, %v1470_v58 }
 0x525   : > { %v1474_v61 = vmul.f32 1.050701, %v1472_v60  ;;  %v1471_v62 = vsel %vm1459_vm15, %v1451_v49, %v1469_v59 }
 0x526   : > { %v1473_v63 = vmul.f32 1.050701, %v1471_v62 }
 0x528   : > { %4172 = vmatprep.mubr.msk.f32.mxu0 %vm1262_vm9, %v1473_v63  ;;  %v4485_v1 = vpack.c.bf16 %v1474_v61, %v1473_v63 }
 0x529   : > { %4173 = vmatmul.mubr.msk.f32.vlgmr.msra.gmra.mrb[4].mxu0 %vm1262_vm9, %v1474_v61 }
 0x52a   : > { %4440 = vmatpush3.bf16.msk.msra.mxu0 %vm4950_vm6, %v4696_v16  ;;  %4191 = vmatprep.mubr.msk.f32.mxu0 %vm1262_vm9, %v1473_v63  ;;  %vm5761_vm6 = vnez %v5751_v24 }
 0x52b   : > { %4442 = vmatprep.subr.msk.bf16.mxu0 %vm4965_vm4, %v4696_v16 }
 0x52e   : > { %4444 = vmatpush3.bf16.msk.msra.mxu0 %vm4965_vm4, %v4696_v16  ;;  %vm5763_vm4 = vcmask 130048  }
 0x52f   : > { %4446 = vmatprep.subr.msk.bf16.mxu0 %vm4994_vm14, %v4696_v16 }
 0x532   : > { %4448 = vmatpush3.bf16.msk.msra.mxu0 %vm4994_vm14, %v4696_v16  ;;  %vm5764_vm14 = vmmov %vm5763_vm4 }
 0x533   : > { %4450 = vmatprep.subr.msk.bf16.mxu0 %vm5761_vm6, %v4696_v16 }
 0x536   : > { %4452 = vmatpush3.bf16.msk.msra.mxu0 %vm5761_vm6, %v4696_v16 }
 0x537   : > { %4486 = vmatprep.subr.bf16.mxu0 %v4485_v1 }
 0x539   : > { %4192 = vmatmul.mubr.msk.f32.vlgmr.msra.gmra.mrb[6].mxu0 %vm1262_vm9, %v1474_v61 }
 0x53a   : > { %4488 = vmatpush3.bf16.msra.mxu0 %v4485_v1  ;;  %4198 = vmatprep.mubr.msk.f32.mxu0 %vm5763_vm4, %v1993_v6 }
 0x53b   : > { %4201 = vmatprep.subr.mxu0 %v4676_v0 }
 0x53d   : > { %4199 = vmatmul.mubr.msk.f32.vlgmr.msra.gmra.mrb[8].mxu0 %vm5764_vm14, %v1994_v7 }
 0x53e   : > { %4202 = vmatpush3.msra.mxu0 %v5074_v42  ;;  %4203 = vmatprep.mubr.msk.f32.mxu0 %vm5765_vm3, %v4676_v0 }
 0x5fc   : > { %v4174_v20 = vpop.f32.mrb[4].mxu0 }
 0x5fd   : > { %v1547_v24 = vpop.f32.mrb[5].mxu0 }
 0x60c   : > { %v4193_v2 = vpop.f32.mrb[6].mxu0 }
 0x60d   : > { %v1632_v3 = vmax.f32 %v4174_v20, %v4193_v2  ;;  %v1622_v4 = vpop.f32.mrb[7].mxu0 }
 0x60e   : > { %v1631_v19 = vmax.f32 %v1547_v24, %v1622_v4 }
 0x60f   : > { %1641 = vrot.lane.b32.xlu0 %v1632_v3, %s5766_s21 }
 0x610   : > { %1639 = vrot.lane.b32.xlu1 %v1631_v19, %s5766_s21 }
 0x681   : > { %v1642_v23 = vpop.permute.xlu0 %1641 }
 0x682   : > { %1647 = vst.msk [vmem:[#allocation2 + $0x10] sm:$0xff] %vm1645_vm12, %v1642_v23  ;;  %v1640_v25 = vpop.permute.xlu1 %1639 }
 0x683   : > { %1646 = vst.msk [vmem:[#allocation2] sm:$0xff] %vm1645_vm12, %v1640_v25 }
 0x689   : > { %v1649_v42 = vld [vmem:[#allocation2 + $0x10] sm:$0xff] }
 0x68a   : > { %1652 = vst.msk [vmem:[#allocation3 + $0x8] sm:$0xff] %vm1650_vm1, %v1649_v42  ;;  %v1648_v26 = vld [vmem:[#allocation2] sm:$0xff]  ;;  %1743 = vrot.lane.b32.xlu0 %v1649_v42, %s5767_s4  ;;  %2559 = vst [vmem:[#allocation2 + $0x10] sm:$0xff] %v4676_v0 }
 0x68b   : > { %1651 = vst.msk [vmem:[#allocation3] sm:$0xff] %vm1650_vm1, %v1648_v26  ;;  %1741 = vrot.lane.b32.xlu1 %v1648_v26, %s5767_s4  ;;  %2557 = vst [vmem:[#allocation2] sm:$0xff] %v4676_v0 }
 0x68e   : > { %1755 = vrot.lane.b32.xlu0 %v1649_v42, %s5754_s1 }
 0x68f   : > { %1753 = vrot.lane.b32.xlu1 %v1648_v26, %s5754_s1 }
 0x691   : > { %v1840_v39 = vld [vmem:[#allocation3 + $0x8] sm:$0xff] }
 0x692   : > { %1659 = vrot.lane.b32.xlu0 %v1649_v42, %s5768_s30  ;;  %v1839_v38 = vld [vmem:[#allocation3] sm:$0xff] }
 0x693   : > { %1657 = vrot.lane.b32.xlu1 %v1648_v26, %s5768_s30  ;;  %v4455_v17 = vpack.c.bf16 %v1840_v39, %v1839_v38 }
 0x696   : > { %1767 = vrot.lane.b32.xlu0 %v1649_v42, %s5753_s24 }
 0x697   : > { %1765 = vrot.lane.b32.xlu1 %v1648_v26, %s5753_s24 }
 0x69a   : > { %1671 = vrot.lane.b32.xlu0 %v1649_v42, %s5769_s27 }
 0x69b   : > { %1669 = vrot.lane.b32.xlu1 %v1648_v26, %s5769_s27 }
 0x69e   : > { %1779 = vrot.lane.b32.xlu0 %v1649_v42, %s5756_s2 }
 0x69f   : > { %1777 = vrot.lane.b32.xlu1 %v1648_v26, %s5756_s2 }
 0x6a2   : > { %1683 = vrot.lane.b32.xlu0 %v1649_v42, %s5770_s29 }
 0x6a3   : > { %1681 = vrot.lane.b32.xlu1 %v1648_v26, %s5770_s29 }
 0x6a6   : > { %1791 = vrot.lane.b32.xlu0 %v1649_v42, %s5755_s6 }
 0x6a7   : > { %1789 = vrot.lane.b32.xlu1 %v1648_v26, %s5755_s6 }
 0x6aa   : > { %1695 = vrot.lane.b32.xlu0 %v1649_v42, %s5771_s0 }
 0x6ab   : > { %1693 = vrot.lane.b32.xlu1 %v1648_v26, %s5771_s0 }
 0x6ae   : > { %1803 = vrot.lane.b32.xlu0 %v1649_v42, %s5757_s7 }
 0x6af   : > { %1801 = vrot.lane.b32.xlu1 %v1648_v26, %s5757_s7 }
 0x6b2   : > { %1707 = vrot.lane.b32.xlu0 %v1649_v42, %s5772_s5 }
 0x6b3   : > { %1705 = vrot.lane.b32.xlu1 %v1648_v26, %s5772_s5 }
 0x6b6   : > { %1815 = vrot.lane.b32.xlu0 %v1649_v42, %s5703_s25 }
 0x6b7   : > { %1813 = vrot.lane.b32.xlu1 %v1648_v26, %s5703_s25  ;;  %s5776_s25 = sld [smem:[#allocation12_spill]] }
 0x6ba   : > { %1719 = vrot.lane.b32.xlu0 %v1649_v42, %s5773_s23 }
 0x6bb   : > { %1717 = vrot.lane.b32.xlu1 %v1648_v26, %s5773_s23 }
 0x6bd   : > { %v1872_v28 = vld [vmem:[%s5776_s25 + $0x8] sm:$0xff]  ;;  %v1871_v29 = vld [vmem:[%s5776_s25] sm:$0xff]  ;;  %v1873_v31 = vld [vmem:[%s5776_s25 + $0x10] sm:$0xff] }
 0x6be   : > { %1827 = vrot.lane.b32.xlu0 %v1649_v42, %s5774_s26 }
 0x6bf   : > { %1825 = vrot.lane.b32.xlu1 %v1648_v26, %s5774_s26 }
 0x6c2   : > { %1731 = vrot.lane.b32.xlu0 %v1649_v42, %s5752_s3 }
 0x6c3   : > { %1729 = vrot.lane.b32.xlu1 %v1648_v26, %s5752_s3 }
 0x6c6   : > { %1881 = vperm.xlu0 %4633, %v1872_v28  }
 0x6c7   : > { %1876 = vperm.xlu1 %4632, %v1871_v29  }
 0x6ca   : > { %2190 = vperm.xlu0 %4633, %v2186_v30  }
 0x6cb   : > { %1886 = vperm.xlu1 %4632, %v1873_v31  }
 0x6cf   : > { %2195 = vperm.xlu1 %4632, %v2187_v32  }
 0x6fc   : > { %v1744_v33 = vpop.permute.xlu0 %1743 }
 0x6fd   : > { %1748 = vst.msk [vmem:[#allocation3 + $0x88] sm:$0xff] %vm1650_vm1, %v1744_v33  ;;  %v1742_v34 = vpop.permute.xlu1 %1741 }
 0x6fe   : > { %1747 = vst.msk [vmem:[#allocation3 + $0x80] sm:$0xff] %vm1650_vm1, %v1742_v34 }
 0x700   : > { %v1756_v35 = vpop.permute.xlu0 %1755 }
 0x701   : > { %1760 = vst.msk [vmem:[#allocation3 + $0x98] sm:$0xff] %vm1650_vm1, %v1756_v35  ;;  %v1754_v36 = vpop.permute.xlu1 %1753 }
 0x702   : > { %1759 = vst.msk [vmem:[#allocation3 + $0x90] sm:$0xff] %vm1650_vm1, %v1754_v36 }
 0x704   : > { %v1660_v37 = vpop.permute.xlu0 %1659  ;;  %v1856_v12 = vld [vmem:[#allocation3 + $0x88] sm:$0xff] }
 0x705   : > { %1664 = vst.msk [vmem:[#allocation3 + $0x18] sm:$0xff] %vm1650_vm1, %v1660_v37  ;;  %v1658_v40 = vpop.permute.xlu1 %1657  ;;  %v1855_v41 = vld [vmem:[#allocation3 + $0x80] sm:$0xff] }
 0x706   : > { %1663 = vst.msk [vmem:[#allocation3 + $0x10] sm:$0xff] %vm1650_vm1, %v1658_v40  ;;  %v4453_v15 = vpack.c.bf16 %v1856_v12, %v1855_v41 }
 0x708   : > { %v1768_v43 = vpop.permute.xlu0 %1767  ;;  %4454 = vmatprep.subr.bf16.mxu1 %v4453_v15  ;;  %v1858_v44 = vld [vmem:[#allocation3 + $0x98] sm:$0xff] }
 0x709   : > { %1772 = vst.msk [vmem:[#allocation3 + $0xa8] sm:$0xff] %vm1650_vm1, %v1768_v43  ;;  %v1766_v45 = vpop.permute.xlu1 %1765  ;;  %4456 = vmatpush3.bf16.msra.mxu1 %v4455_v17  ;;  %v1857_v46 = vld [vmem:[#allocation3 + $0x90] sm:$0xff] }
 0x70a   : > { %1771 = vst.msk [vmem:[#allocation3 + $0xa0] sm:$0xff] %vm1650_vm1, %v1766_v45  ;;  %v4457_v47 = vpack.c.bf16 %v1858_v44, %v1857_v46 }
 0x70c   : > { %v1672_v48 = vpop.permute.xlu0 %1671  ;;  %4458 = vmatprep.subr.bf16.mxu1 %v4457_v47  ;;  %v1842_v49 = vld [vmem:[#allocation3 + $0x18] sm:$0xff] }
 0x70d   : > { %1676 = vst.msk [vmem:[#allocation3 + $0x28] sm:$0xff] %vm1650_vm1, %v1672_v48  ;;  %v1670_v50 = vpop.permute.xlu1 %1669  ;;  %v1841_v51 = vld [vmem:[#allocation3 + $0x10] sm:$0xff] }
 0x70e   : > { %1675 = vst.msk [vmem:[#allocation3 + $0x20] sm:$0xff] %vm1650_vm1, %v1670_v50  ;;  %v4459_v52 = vpack.c.bf16 %v1842_v49, %v1841_v51 }
 0x710   : > { %v1780_v53 = vpop.permute.xlu0 %1779  ;;  %4460 = vmatpush3.bf16.msra.mxu1 %v4459_v52  ;;  %v1860_v54 = vld [vmem:[#allocation3 + $0xa8] sm:$0xff] }
 0x711   : > { %1784 = vst.msk [vmem:[#allocation3 + $0xb8] sm:$0xff] %vm1650_vm1, %v1780_v53  ;;  %v1778_v55 = vpop.permute.xlu1 %1777  ;;  %v1859_v56 = vld [vmem:[#allocation3 + $0xa0] sm:$0xff] }
 0x712   : > { %1783 = vst.msk [vmem:[#allocation3 + $0xb0] sm:$0xff] %vm1650_vm1, %v1778_v55  ;;  %v4461_v57 = vpack.c.bf16 %v1860_v54, %v1859_v56 }
 0x714   : > { %v1684_v58 = vpop.permute.xlu0 %1683  ;;  %4462 = vmatprep.subr.bf16.mxu1 %v4461_v57  ;;  %v1844_v59 = vld [vmem:[#allocation3 + $0x28] sm:$0xff]  ;;  %v1833_v57 = vld [vmem:[%s5775_s22] sm:$0xff] }
 0x715   : > { %1688 = vst.msk [vmem:[#allocation3 + $0x38] sm:$0xff] %vm1650_vm1, %v1684_v58  ;;  %v1682_v60 = vpop.permute.xlu1 %1681  ;;  %v1843_v61 = vld [vmem:[#allocation3 + $0x20] sm:$0xff]  ;;  %v1836_v58 = vld [vmem:[%s5775_s22 + $0x18] sm:$0xff] }
 0x716   : > { %1687 = vst.msk [vmem:[#allocation3 + $0x30] sm:$0xff] %vm1650_vm1, %v1682_v60  ;;  %v4463_v62 = vpack.c.bf16 %v1844_v59, %v1843_v61  ;;  %v1835_v59 = vld [vmem:[%s5775_s22 + $0x10] sm:$0xff]  ;;  %v1838_v60 = vld [vmem:[%s5775_s22 + $0x28] sm:$0xff]  ;;  %v1837_v61 = vld [vmem:[%s5775_s22 + $0x20] sm:$0xff] }
 0x718   : > { %v1792_v63 = vpop.permute.xlu0 %1791  ;;  %4464 = vmatpush3.bf16.msra.mxu1 %v4463_v62  ;;  %v1862_v1 = vld [vmem:[#allocation3 + $0xb8] sm:$0xff]  ;;  %v2098_v62 = vld [vmem:[%s5778_s9] sm:$0xff] }
 0x719   : > { %1796 = vst.msk [vmem:[#allocation3 + $0xc8] sm:$0xff] %vm1650_vm1, %v1792_v63  ;;  %v1790_v6 = vpop.permute.xlu1 %1789  ;;  %v1861_v7 = vld [vmem:[#allocation3 + $0xb0] sm:$0xff]  ;;  %4204 = vmatmul.mubr.msk.f32.vlgmr.msra.gmra.mrb[10].mxu0 %vm2105_vm11, %v2098_v62  ;;  %v2184_v63 = vld [vmem:[%s5779_s11] sm:$0xff] }
 0x71a   : > { %1795 = vst.msk [vmem:[#allocation3 + $0xc0] sm:$0xff] %vm1650_vm1, %v1790_v6  ;;  %v4465_v20 = vpack.c.bf16 %v1862_v1, %v1861_v7  ;;  %4212 = vmatprep.mubr.msk.f32.mxu0 %vm2198_vm8, %v2184_v63  ;;  %v5292_v1 = vpop.f32.mrb[8].mxu0 }
 0x71b   : > { %v5294_v6 = vpop.f32.mrb[9].mxu0 }
 0x71c   : > { %v1696_v24 = vpop.permute.xlu0 %1695  ;;  %4466 = vmatprep.subr.bf16.mxu1 %v4465_v20  ;;  %v1846_v2 = vld [vmem:[#allocation3 + $0x38] sm:$0xff] }
 0x71d   : > { %1700 = vst.msk [vmem:[#allocation3 + $0x48] sm:$0xff] %vm1650_vm1, %v1696_v24  ;;  %v1694_v3 = vpop.permute.xlu1 %1693  ;;  %v1845_v4 = vld [vmem:[#allocation3 + $0x30] sm:$0xff] }
 0x71e   : > { %1699 = vst.msk [vmem:[#allocation3 + $0x40] sm:$0xff] %vm1650_vm1, %v1694_v3  ;;  %v4467_v19 = vpack.c.bf16 %v1846_v2, %v1845_v4 }
 0x720   : > { %v1804_v23 = vpop.permute.xlu0 %1803  ;;  %4468 = vmatpush3.bf16.msra.mxu1 %v4467_v19  ;;  %v1864_v25 = vld [vmem:[#allocation3 + $0xc8] sm:$0xff] }
 0x721   : > { %1808 = vst.msk [vmem:[#allocation3 + $0xd8] sm:$0xff] %vm1650_vm1, %v1804_v23  ;;  %v1802_v42 = vpop.permute.xlu1 %1801  ;;  %v1863_v26 = vld [vmem:[#allocation3 + $0xc0] sm:$0xff] }
 0x722   : > { %1807 = vst.msk [vmem:[#allocation3 + $0xd0] sm:$0xff] %vm1650_vm1, %v1802_v42  ;;  %v4469_v27 = vpack.c.bf16 %v1864_v25, %v1863_v26 }
 0x724   : > { %v1708_v28 = vpop.permute.xlu0 %1707  ;;  %4470 = vmatprep.subr.bf16.mxu1 %v4469_v27  ;;  %v1848_v29 = vld [vmem:[#allocation3 + $0x48] sm:$0xff] }
 0x725   : > { %1712 = vst.msk [vmem:[#allocation3 + $0x58] sm:$0xff] %vm1650_vm1, %v1708_v28  ;;  %v1706_v30 = vpop.permute.xlu1 %1705  ;;  %v1847_v31 = vld [vmem:[#allocation3 + $0x40] sm:$0xff] }
 0x726   : > { %1711 = vst.msk [vmem:[#allocation3 + $0x50] sm:$0xff] %vm1650_vm1, %v1706_v30  ;;  %v4471_v32 = vpack.c.bf16 %v1848_v29, %v1847_v31 }
 0x728   : > { %v1816_v33 = vpop.permute.xlu0 %1815  ;;  %4472 = vmatpush3.bf16.msra.mxu1 %v4471_v32  ;;  %v1866_v34 = vld [vmem:[#allocation3 + $0xd8] sm:$0xff] }
 0x729   : > { %1820 = vst.msk [vmem:[#allocation3 + $0xe8] sm:$0xff] %vm1650_vm1, %v1816_v33  ;;  %v1814_v35 = vpop.permute.xlu1 %1813  ;;  %v1865_v36 = vld [vmem:[#allocation3 + $0xd0] sm:$0xff] }
 0x72a   : > { %1819 = vst.msk [vmem:[#allocation3 + $0xe0] sm:$0xff] %vm1650_vm1, %v1814_v35  ;;  %v4473_v37 = vpack.c.bf16 %v1866_v34, %v1865_v36 }
 0x72c   : > { %v1720_v12 = vpop.permute.xlu0 %1719  ;;  %4474 = vmatprep.subr.bf16.mxu1 %v4473_v37  ;;  %v1850_v38 = vld [vmem:[#allocation3 + $0x58] sm:$0xff] }
 0x72d   : > { %1724 = vst.msk [vmem:[#allocation3 + $0x68] sm:$0xff] %vm1650_vm1, %v1720_v12  ;;  %v1718_v39 = vpop.permute.xlu1 %1717  ;;  %v1849_v40 = vld [vmem:[#allocation3 + $0x50] sm:$0xff] }
 0x72e   : > { %1723 = vst.msk [vmem:[#allocation3 + $0x60] sm:$0xff] %vm1650_vm1, %v1718_v39  ;;  %v4475_v41 = vpack.c.bf16 %v1850_v38, %v1849_v40 }
 0x730   : > { %v1828_v15 = vpop.permute.xlu0 %1827  ;;  %4476 = vmatpush3.bf16.msra.mxu1 %v4475_v41  ;;  %v1868_v17 = vld [vmem:[#allocation3 + $0xe8] sm:$0xff] }
 0x731   : > { %1832 = vst.msk [vmem:[#allocation3 + $0xf8] sm:$0xff] %vm1650_vm1, %v1828_v15  ;;  %v1826_v43 = vpop.permute.xlu1 %1825  ;;  %v1867_v44 = vld [vmem:[#allocation3 + $0xe0] sm:$0xff] }
 0x732   : > { %1831 = vst.msk [vmem:[#allocation3 + $0xf0] sm:$0xff] %vm1650_vm1, %v1826_v43  ;;  %v4477_v45 = vpack.c.bf16 %v1868_v17, %v1867_v44 }
 0x734   : > { %v1732_v46 = vpop.permute.xlu0 %1731  ;;  %4478 = vmatprep.subr.bf16.mxu1 %v4477_v45  ;;  %v1852_v47 = vld [vmem:[#allocation3 + $0x68] sm:$0xff] }
 0x735   : > { %1736 = vst.msk [vmem:[#allocation3 + $0x78] sm:$0xff] %vm1650_vm1, %v1732_v46  ;;  %v1730_v48 = vpop.permute.xlu1 %1729  ;;  %v1851_v49 = vld [vmem:[#allocation3 + $0x60] sm:$0xff] }
 0x736   : > { %1735 = vst.msk [vmem:[#allocation3 + $0x70] sm:$0xff] %vm1650_vm1, %v1730_v48  ;;  %v4479_v50 = vpack.c.bf16 %v1852_v47, %v1851_v49 }
 0x738   : > { %4480 = vmatpush3.bf16.msra.mxu1 %v4479_v50  ;;  %v1870_v51 = vld [vmem:[#allocation3 + $0xf8] sm:$0xff] }
 0x739   : > { %v1869_v52 = vld [vmem:[#allocation3 + $0xf0] sm:$0xff] }
 0x73a   : > { %v4481_v53 = vpack.c.bf16 %v1870_v51, %v1869_v52  ;;  %v2185_v51 = vld [vmem:[%s5779_s11 + $0x8] sm:$0xff]  ;;  %v2280_v52 = vld [vmem:[%s5780_s12] sm:$0xff]  ;;  %s5792_s11 = sld [smem:[#allocation20_spill]] }
 0x73c   : > { %4482 = vmatprep.subr.bf16.mxu1 %v4481_v53  ;;  %v1854_v54 = vld [vmem:[#allocation3 + $0x78] sm:$0xff]  ;;  %v2281_v53 = vld [vmem:[%s5780_s12 + $0x8] sm:$0xff]  ;;  %s5796_s12 = sld [smem:[#allocation22_spill]] }
 0x73d   : > { %v1853_v55 = vld [vmem:[#allocation3 + $0x70] sm:$0xff] }
 0x73e   : > { %v4483_v56 = vpack.c.bf16 %v1854_v54, %v1853_v55 }
 0x740   : > { %4484 = vmatpush3.bf16.msra.mxu1 %v4483_v56  ;;  %v2363_v56 = vmul.u32 2, %v4884_v9 }
 0x742   : > { %vm2367_vm12 = vcmp.eq.s32.totalorder %v4886_v10, %v2363_v56 }
 0x743   : > { %1954 = vmatmul.mubr.f32.vlgmr.msra.gmra.mrb[4].mxu1 %v1833_v57  ;;  %v2364_v57 = vmul.u32 2, %v4889_v11 }
 0x744   : > { %1958 = vmatprep.mubr.f32.mxu1 %v1836_v58  ;;  %v2379_v58 = vadd.s32 1, %v2363_v56 }
 0x745   : > { %v1882_v42 = vpop.permute.xlu0 %1881 }
 0x746   : > { %v1877_v2 = vpop.permute.xlu1 %1876  ;;  %vm2383_vm0 = vcmp.eq.s32.totalorder %v4886_v10, %v2379_v58 }
 0x747   : > { %1959 = vmatmul.mubr.f32.gmra.mrb[6].mxu1 %v1835_v59  ;;  %v2380_v59 = vadd.s32 1, %v2364_v57 }
 0x748   : > { %1963 = vmatprep.mubr.f32.mxu1 %v1838_v60  ;;  %v2365_v60 = vmul.u32 2, %v4895_v13 }
 0x749   : > { %vm2384_vm13 = vcmp.eq.s32.totalorder %v4886_v10, %v2380_v59 }
 0x74a   : > { %v1887_v32 = vpop.permute.xlu1 %1886  ;;  %vm5316_vm15 = vmpackc.low %vm2384_vm13, %vm2383_vm0  ;;  %v2381_v9 = vadd.s32 1, %v2365_v60  ;;  %vm5795_vm13 = vcmask 130048  }
 0x74b   : > { %1964 = vmatmul.mubr.f32.gmra.mrb[8].mxu1 %v1837_v61  ;;  %v2366_v61 = vmul.u32 2, %v4898_v14 }
 0x74c   : > { %vm2385_vm6 = vcmp.eq.s32.totalorder %v4886_v10, %v2381_v9 }
 0x74d   : > { %v2382_v11 = vadd.s32 1, %v2366_v61 }
 0x74f   : > { %vm2386_vm4 = vcmp.eq.s32.totalorder %v4886_v10, %v2382_v11 }
 0x750   : > { %vm5328_vm14 = vmpackc.low %vm2386_vm4, %vm2385_vm6 }
 0x751   : > { %vm5797_vm6 = vmmov %vm5795_vm13 }
 0x7ec   : > { %v5308_v54 = vpop.f32.mrb[10].mxu0 }
 0x7ed   : > { %v4205_v55 = vpop.f32.mrb[11].mxu0 }
 0x816   : > { %v3926_v7 = vpop.f32.mrb[4].mxu1 }
 0x817   : > { %v3927_v20 = vpop.f32.mrb[5].mxu1 }
 0x818   : > { %v3928_v24 = vadd.f32 %v3927_v20, %v3926_v7 }
 0x81a   : > { %v1956_v3 = vadd.f32 %v3928_v24, %v1877_v2  ;;  %v3929_v4 = vpop.f32.mrb[6].mxu1  ;;  %v2191_v2 = vpop.permute.xlu0 %2190 }
 0x81b   : > { %v3930_v19 = vpop.f32.mrb[7].mxu1 }
 0x81c   : > { %v1972_v23 = vmin.f32 %v1956_v3, 0.0  ;;  %v3931_v25 = vadd.f32 %v3930_v19, %v3929_v4  ;;  %vm1969_vm10 = vcmp.gt.f32.partialorder %v1956_v3, 0.0  ;;  %v2196_v4 = vpop.permute.xlu1 %2195 }
 0x81e   : > { %v1975_v26 = vmul.f32 1.442695, %v1972_v23  ;;  %v1961_v27 = vadd.f32 %v3931_v25, %v1882_v42  ;;  %v3932_v28 = vpop.f32.mrb[8].mxu1 }
 0x81f   : > { %v3933_v29 = vpop.f32.mrb[9].mxu1 }
 0x820   : > { %4640 = vpow2.f32 %v1975_v26  ;;  %v1973_v30 = vmin.f32 %v1961_v27, 0.0  ;;  %v3934_v31 = vadd.f32 %v3933_v29, %v3932_v28  ;;  %vm1970_vm2 = vcmp.gt.f32.partialorder %v1961_v27, 0.0 }
 0x822   : > { %v1977_v33 = vmul.f32 1.442695, %v1973_v30  ;;  %v1966_v34 = vadd.f32 %v3934_v31, %v1887_v32  ;;  %v2756_v32 = vld [vmem:[%s5633_s14 + $0x8] sm:$0xff] }
 0x823   : > { %2867 = vmatprep.mubr.f32.mxu1 %v2756_v32 }
 0x824   : > { %4642 = vpow2.f32 %v1977_v33  ;;  %v1974_v35 = vmin.f32 %v1966_v34, 0.0  ;;  %vm1971_vm5 = vcmp.gt.f32.partialorder %v1966_v34, 0.0  ;;  %v1996_v33 = vld [vmem:[%s5791_s20 + $0x8] sm:$0xff] }
 0x826   : > { %v1979_v36 = vmul.f32 1.442695, %v1974_v35  ;;  %v2792_v35 = vld [vmem:[%s5792_s11 + $0x8] sm:$0xff] }
 0x828   : > { %4644 = vpow2.f32 %v1979_v36  ;;  %v2791_v36 = vld [vmem:[%s5792_s11] sm:$0xff] }
 0x82a   : > { %v4641_v37 = vpop.eup %4640 }
 0x82b   : > { %v3755_v12 = vadd.f32 -1.0, %v4641_v37  ;;  %v2897_v37 = vld [vmem:[%s5793_s17] sm:$0xff] }
 0x82d   : > { %v1984_v38 = vmul.f32 1.6732632, %v3755_v12 }
 0x82e   : > { %v4643_v39 = vpop.eup %4642 }
 0x82f   : > { %v3756_v40 = vadd.f32 -1.0, %v4643_v39  ;;  %v1987_v41 = vsel %vm1969_vm10, %v1956_v3, %v1984_v38 }
 0x830   : > { %v1990_v45 = vmul.f32 1.050701, %v1987_v41 }
 0x831   : > { %v1985_v15 = vmul.f32 1.6732632, %v3756_v40 }
 0x832   : > { %v4645_v17 = vpop.eup %4644 }
 0x833   : > { %v1988_v43 = vsel %vm1970_vm2, %v1961_v27, %v1985_v15  ;;  %v3757_v44 = vadd.f32 -1.0, %v4645_v17  ;;  %vm2369_vm2 = vcmp.eq.s32.totalorder %v4886_v10, %v2365_v60 }
 0x834   : > { %v1991_v46 = vmul.f32 1.050701, %v1988_v43 }
 0x835   : > { %v1986_v47 = vmul.f32 1.6732632, %v3757_v44 }
 0x836   : > { %v4489_v48 = vpack.c.bf16 %v1991_v46, %v1990_v45 }
 0x837   : > { %v1989_v49 = vsel %vm1971_vm5, %v1966_v34, %v1986_v47  ;;  %vm2370_vm5 = vcmp.eq.s32.totalorder %v4886_v10, %v2366_v61  ;;  %v1995_v34 = vld [vmem:[%s5791_s20] sm:$0xff] }
 0x838   : > { %v1992_v50 = vmul.f32 1.050701, %v1989_v49  ;;  %4490 = vmatprep.subr.bf16.mxu0 %v4489_v48  ;;  %vm5349_vm0 = vmpackc.low %vm2370_vm5, %vm2369_vm2 }
 0x839   : > { %4492 = vmatpush3.bf16.msra.mxu0 %v4489_v48 }
 0x83a   : > { %4210 = vmatprep.subr.mxu0 %v1992_v50 }
 0x83d   : > { %4211 = vmatpush3.msra.mxu0 %v1992_v50 }
 0x83e   : > { %4213 = vmatmul.mubr.msk.f32.vlgmr.msra.gmra.mrb[12].mxu0 %vm2198_vm8, %v2185_v51  ;;  %4494 = vmatprep.subr.bf16.mxu0 %v4489_v48 }
 0x83f   : > { %4496 = vmatpush3.bf16.msra.mxu0 %v4489_v48  ;;  %4221 = vmatprep.mubr.msk.f32.mxu0 %vm2198_vm8, %v2280_v52 }
 0x840   : > { %4219 = vmatprep.subr.mxu0 %v1992_v50 }
 0x843   : > { %4220 = vmatpush3.msra.mxu0 %v1992_v50 }
 0x844   : > { %4222 = vmatmul.mubr.msk.f32.vlgmr.msra.gmra.mrb[14].mxu0 %vm2198_vm8, %v2281_v53  ;;  %4498 = vmatprep.subr.msk.bf16.mxu0 %vm5316_vm15, %v4696_v16  ;;  %vm2368_vm8 = vcmp.eq.s32.totalorder %v4886_v10, %v2364_v57 }
 0x845   : > { %4500 = vmatpush3.bf16.msk.msra.mxu0 %vm5316_vm15, %v4696_v16  ;;  %vm5340_vm10 = vmpackc.low %vm2368_vm8, %vm2367_vm12 }
 0x846   : > { %4502 = vmatprep.subr.msk.bf16.mxu0 %vm5328_vm14, %v4696_v16 }
 0x849   : > { %4504 = vmatpush3.bf16.msk.msra.mxu0 %vm5328_vm14, %v4696_v16 }
 0x84a   : > { %4506 = vmatprep.subr.msk.bf16.mxu0 %vm5340_vm10, %v4696_v16 }
 0x911   : > { %v4214_v7 = vpop.f32.mrb[12].mxu0 }
 0x912   : > { %v2271_v20 = vpop.f32.mrb[13].mxu0  ;;  %v2277_v42 = vadd.f32 %v4214_v7, %v2196_v4 }
 0x913   : > { %v2272_v25 = vadd.f32 %v2271_v20, %v2191_v2 }
 0x917   : > { %v4223_v24 = vpop.f32.mrb[14].mxu0 }
 0x918   : > { %v2354_v3 = vpop.f32.mrb[15].mxu0  ;;  %v2360_v23 = vadd.f32 %v4223_v24, %v2196_v4 }
 0x919   : > { %v2355_v19 = vadd.f32 %v2354_v3, %v2191_v2 }
 0x91b   : > { %4232 = vmatprep.mubr.msk.f32.mxu0 %vm1650_vm1, %v2355_v19 }
 0x91c   : > { %4233 = vmatmul.mubr.msk.f32.vlgmr.msra.gmra.mrb[16].mxu0 %vm1650_vm1, %v2360_v23 }
 0x91d   : > { %4508 = vmatpush3.bf16.msk.msra.mxu0 %vm5340_vm10, %v4696_v16  ;;  %4243 = vmatprep.mubr.msk.f32.mxu0 %vm1650_vm1, %v2272_v25 }
 0x91e   : > { %4510 = vmatprep.subr.msk.bf16.mxu0 %vm5349_vm0, %v4696_v16 }
 0x921   : > { %4512 = vmatpush3.bf16.msk.msra.mxu0 %vm5349_vm0, %v4696_v16 }
 0x922   : > { %4545 = vmatprep.subr.bf16.mxu0 %v4690_v5 }
 0x924   : > { %4244 = vmatmul.mubr.msk.f32.vlgmr.msra.gmra.mrb[16].mxu0 %vm1650_vm1, %v2277_v42 }
 0x925   : > { %4250 = vmatprep.mubr.msk.f32.mxu0 %vm5765_vm3, %v4676_v0 }
 0x9f7   : > { %v4245_v26 = vpop.f32.mrb[16].mxu0 }
 0x9f8   : > { %2565 = vrot.lane.b32.xlu1 %v4245_v26, %s5766_s21  ;;  %v2548_v27 = vpop.f32.mrb[17].mxu0 }
 0x9f9   : > { %2563 = vrot.lane.b32.xlu0 %v2548_v27, %s5766_s21 }
 0xa6a   : > { %v2566_v28 = vpop.permute.xlu1 %2565 }
 0xa6b   : > { %2570 = vst.msk [vmem:[#allocation2 + $0x10] sm:$0xff] %vm1259_vm7, %v2566_v28  ;;  %v2564_v29 = vpop.permute.xlu0 %2563 }
 0xa6c   : > { %2569 = vst.msk [vmem:[#allocation2] sm:$0xff] %vm1259_vm7, %v2564_v29 }
 0xa72   : > { %v2572_v30 = vld [vmem:[#allocation2 + $0x10] sm:$0xff] }
 0xa73   : > { %2574 = vst.msk [vmem:[#allocation3 + $0x8] sm:$0xff] %vm1262_vm9, %v2572_v30  ;;  %v2571_v31 = vld [vmem:[#allocation2] sm:$0xff]  ;;  %2665 = vrot.lane.b32.xlu1 %v2572_v30, %s5767_s4  ;;  %3230 = vst [vmem:[#allocation2 + $0x10] sm:$0xff] %v4676_v0 }
 0xa74   : > { %2573 = vst.msk [vmem:[#allocation3] sm:$0xff] %vm1262_vm9, %v2571_v31  ;;  %2663 = vrot.lane.b32.xlu0 %v2571_v31, %s5767_s4  ;;  %3228 = vst [vmem:[#allocation2] sm:$0xff] %v4676_v0 }
 0xa77   : > { %2677 = vrot.lane.b32.xlu1 %v2572_v30, %s5754_s1 }
 0xa78   : > { %2675 = vrot.lane.b32.xlu0 %v2571_v31, %s5754_s1 }
 0xa7a   : > { %v2760_v43 = vld [vmem:[#allocation3 + $0x8] sm:$0xff] }
 0xa7b   : > { %2581 = vrot.lane.b32.xlu1 %v2572_v30, %s5768_s30  ;;  %v2759_v17 = vld [vmem:[#allocation3] sm:$0xff] }
 0xa7c   : > { %2579 = vrot.lane.b32.xlu0 %v2571_v31, %s5768_s30  ;;  %v4515_v47 = vpack.c.bf16 %v2760_v43, %v2759_v17 }
 0xa7f   : > { %2689 = vrot.lane.b32.xlu1 %v2572_v30, %s5753_s24 }
 0xa80   : > { %2687 = vrot.lane.b32.xlu0 %v2571_v31, %s5753_s24 }
 0xa83   : > { %2593 = vrot.lane.b32.xlu1 %v2572_v30, %s5769_s27 }
 0xa84   : > { %2591 = vrot.lane.b32.xlu0 %v2571_v31, %s5769_s27 }
 0xa87   : > { %2701 = vrot.lane.b32.xlu1 %v2572_v30, %s5756_s2 }
 0xa88   : > { %2699 = vrot.lane.b32.xlu0 %v2571_v31, %s5756_s2 }
 0xa8b   : > { %2605 = vrot.lane.b32.xlu1 %v2572_v30, %s5770_s29 }
 0xa8c   : > { %2603 = vrot.lane.b32.xlu0 %v2571_v31, %s5770_s29 }
 0xa8f   : > { %2713 = vrot.lane.b32.xlu1 %v2572_v30, %s5755_s6 }
 0xa90   : > { %2711 = vrot.lane.b32.xlu0 %v2571_v31, %s5755_s6 }
 0xa93   : > { %2617 = vrot.lane.b32.xlu1 %v2572_v30, %s5771_s0 }
 0xa94   : > { %2615 = vrot.lane.b32.xlu0 %v2571_v31, %s5771_s0 }
 0xa97   : > { %2725 = vrot.lane.b32.xlu1 %v2572_v30, %s5757_s7 }
 0xa98   : > { %2723 = vrot.lane.b32.xlu0 %v2571_v31, %s5757_s7 }
 0xa9b   : > { %2629 = vrot.lane.b32.xlu1 %v2572_v30, %s5772_s5 }
 0xa9c   : > { %2627 = vrot.lane.b32.xlu0 %v2571_v31, %s5772_s5 }
 0xa9f   : > { %2737 = vrot.lane.b32.xlu1 %v2572_v30, %s5789_s8 }
 0xaa0   : > { %2735 = vrot.lane.b32.xlu0 %v2571_v31, %s5789_s8 }
 0xaa3   : > { %2641 = vrot.lane.b32.xlu1 %v2572_v30, %s5773_s23 }
 0xaa4   : > { %2639 = vrot.lane.b32.xlu0 %v2571_v31, %s5773_s23 }
 0xaa7   : > { %2749 = vrot.lane.b32.xlu1 %v2572_v30, %s5774_s26 }
 0xaa8   : > { %2747 = vrot.lane.b32.xlu0 %v2571_v31, %s5774_s26 }
 0xaab   : > { %2653 = vrot.lane.b32.xlu1 %v2572_v30, %s5790_s16 }
 0xaac   : > { %2651 = vrot.lane.b32.xlu0 %v2571_v31, %s5790_s16 }
 0xaaf   : > { %2004 = vperm.xlu1 %4632, %v1996_v33  }
 0xab0   : > { %1999 = vperm.xlu0 %4633, %v1995_v34  }
 0xab3   : > { %2800 = vperm.xlu1 %4632, %v2792_v35  }
 0xab4   : > { %2795 = vperm.xlu0 %4633, %v2791_v36  }
 0xab8   : > { %2900 = vperm.xlu0 %4633, %v2897_v37  }
 0xae5   : > { %v2666_v12 = vpop.permute.xlu1 %2665 }
 0xae6   : > { %2670 = vst.msk [vmem:[#allocation3 + $0x88] sm:$0xff] %vm1262_vm9, %v2666_v12  ;;  %v2664_v38 = vpop.permute.xlu0 %2663 }
 0xae7   : > { %2669 = vst.msk [vmem:[#allocation3 + $0x80] sm:$0xff] %vm1262_vm9, %v2664_v38 }
 0xae9   : > { %v2678_v39 = vpop.permute.xlu1 %2677 }
 0xaea   : > { %2682 = vst.msk [vmem:[#allocation3 + $0x98] sm:$0xff] %vm1262_vm9, %v2678_v39  ;;  %v2676_v40 = vpop.permute.xlu0 %2675 }
 0xaeb   : > { %2681 = vst.msk [vmem:[#allocation3 + $0x90] sm:$0xff] %vm1262_vm9, %v2676_v40 }
 0xaed   : > { %v2582_v41 = vpop.permute.xlu1 %2581  ;;  %v2776_v15 = vld [vmem:[#allocation3 + $0x88] sm:$0xff] }
 0xaee   : > { %2586 = vst.msk [vmem:[#allocation3 + $0x18] sm:$0xff] %vm1262_vm9, %v2582_v41  ;;  %v2580_v44 = vpop.permute.xlu0 %2579  ;;  %v2775_v45 = vld [vmem:[#allocation3 + $0x80] sm:$0xff] }
 0xaef   : > { %2585 = vst.msk [vmem:[#allocation3 + $0x10] sm:$0xff] %vm1262_vm9, %v2580_v44  ;;  %v4513_v46 = vpack.c.bf16 %v2776_v15, %v2775_v45 }
 0xaf1   : > { %v2690_v48 = vpop.permute.xlu1 %2689  ;;  %4514 = vmatprep.subr.bf16.mxu1 %v4513_v46  ;;  %v2778_v49 = vld [vmem:[#allocation3 + $0x98] sm:$0xff] }
 0xaf2   : > { %2694 = vst.msk [vmem:[#allocation3 + $0xa8] sm:$0xff] %vm1262_vm9, %v2690_v48  ;;  %v2688_v50 = vpop.permute.xlu0 %2687  ;;  %4516 = vmatpush3.bf16.msra.mxu1 %v4515_v47  ;;  %v2777_v51 = vld [vmem:[#allocation3 + $0x90] sm:$0xff] }
 0xaf3   : > { %2693 = vst.msk [vmem:[#allocation3 + $0xa0] sm:$0xff] %vm1262_vm9, %v2688_v50  ;;  %v4517_v52 = vpack.c.bf16 %v2778_v49, %v2777_v51 }
 0xaf5   : > { %v2594_v53 = vpop.permute.xlu1 %2593  ;;  %4518 = vmatprep.subr.bf16.mxu1 %v4517_v52  ;;  %v2762_v55 = vld [vmem:[#allocation3 + $0x18] sm:$0xff] }
 0xaf6   : > { %2598 = vst.msk [vmem:[#allocation3 + $0x28] sm:$0xff] %vm1262_vm9, %v2594_v53  ;;  %v2592_v56 = vpop.permute.xlu0 %2591  ;;  %v2761_v57 = vld [vmem:[#allocation3 + $0x10] sm:$0xff] }
 0xaf7   : > { %2597 = vst.msk [vmem:[#allocation3 + $0x20] sm:$0xff] %vm1262_vm9, %v2592_v56  ;;  %v4519_v58 = vpack.c.bf16 %v2762_v55, %v2761_v57 }
 0xaf9   : > { %v2702_v59 = vpop.permute.xlu1 %2701  ;;  %4520 = vmatpush3.bf16.msra.mxu1 %v4519_v58  ;;  %v2780_v60 = vld [vmem:[#allocation3 + $0xa8] sm:$0xff] }
 0xafa   : > { %2706 = vst.msk [vmem:[#allocation3 + $0xb8] sm:$0xff] %vm1262_vm9, %v2702_v59  ;;  %v2700_v61 = vpop.permute.xlu0 %2699  ;;  %v2779_v9 = vld [vmem:[#allocation3 + $0xa0] sm:$0xff] }
 0xafb   : > { %2705 = vst.msk [vmem:[#allocation3 + $0xb0] sm:$0xff] %vm1262_vm9, %v2700_v61  ;;  %v4521_v11 = vpack.c.bf16 %v2780_v60, %v2779_v9 }
 0xafd   : > { %v2606_v7 = vpop.permute.xlu1 %2605  ;;  %4522 = vmatprep.subr.bf16.mxu1 %v4521_v11  ;;  %v2764_v20 = vld [vmem:[#allocation3 + $0x28] sm:$0xff] }
 0xafe   : > { %2610 = vst.msk [vmem:[#allocation3 + $0x38] sm:$0xff] %vm1262_vm9, %v2606_v7  ;;  %v2604_v24 = vpop.permute.xlu0 %2603  ;;  %v2763_v2 = vld [vmem:[#allocation3 + $0x20] sm:$0xff] }
 0xaff   : > { %2609 = vst.msk [vmem:[#allocation3 + $0x30] sm:$0xff] %vm1262_vm9, %v2604_v24  ;;  %v4523_v3 = vpack.c.bf16 %v2764_v20, %v2763_v2  ;;  %v2755_v24 = vld [vmem:[%s5633_s14] sm:$0xff]  ;;  %v2758_v2 = vld [vmem:[%s5633_s14 + $0x18] sm:$0xff] }
 0xb01   : > { %v2714_v4 = vpop.permute.xlu1 %2713  ;;  %4524 = vmatpush3.bf16.msra.mxu1 %v4523_v3  ;;  %v2782_v19 = vld [vmem:[#allocation3 + $0xb8] sm:$0xff]  ;;  %v2757_v3 = vld [vmem:[%s5633_s14 + $0x10] sm:$0xff] }
 0xb02   : > { %2718 = vst.msk [vmem:[#allocation3 + $0xc8] sm:$0xff] %vm1262_vm9, %v2714_v4  ;;  %v2712_v23 = vpop.permute.xlu0 %2711  ;;  %v2781_v25 = vld [vmem:[#allocation3 + $0xb0] sm:$0xff] }
 0xb03   : > { %2717 = vst.msk [vmem:[#allocation3 + $0xc0] sm:$0xff] %vm1262_vm9, %v2712_v23  ;;  %v4525_v42 = vpack.c.bf16 %v2782_v19, %v2781_v25 }
 0xb05   : > { %v2618_v26 = vpop.permute.xlu1 %2617  ;;  %4526 = vmatprep.subr.bf16.mxu1 %v4525_v42  ;;  %v2766_v27 = vld [vmem:[#allocation3 + $0x38] sm:$0xff] }
 0xb06   : > { %2622 = vst.msk [vmem:[#allocation3 + $0x48] sm:$0xff] %vm1262_vm9, %v2618_v26  ;;  %v2616_v28 = vpop.permute.xlu0 %2615  ;;  %v2765_v29 = vld [vmem:[#allocation3 + $0x30] sm:$0xff] }
 0xb07   : > { %2621 = vst.msk [vmem:[#allocation3 + $0x40] sm:$0xff] %vm1262_vm9, %v2616_v28  ;;  %v4527_v30 = vpack.c.bf16 %v2766_v27, %v2765_v29 }
 0xb09   : > { %v2726_v31 = vpop.permute.xlu1 %2725  ;;  %4528 = vmatpush3.bf16.msra.mxu1 %v4527_v30  ;;  %v2784_v32 = vld [vmem:[#allocation3 + $0xc8] sm:$0xff] }
 0xb0a   : > { %2730 = vst.msk [vmem:[#allocation3 + $0xd8] sm:$0xff] %vm1262_vm9, %v2726_v31  ;;  %v2724_v33 = vpop.permute.xlu0 %2723  ;;  %v2783_v34 = vld [vmem:[#allocation3 + $0xc0] sm:$0xff] }
 0xb0b   : > { %2729 = vst.msk [vmem:[#allocation3 + $0xd0] sm:$0xff] %vm1262_vm9, %v2724_v33  ;;  %v4529_v35 = vpack.c.bf16 %v2784_v32, %v2783_v34 }
 0xb0d   : > { %v2630_v36 = vpop.permute.xlu1 %2629  ;;  %4530 = vmatprep.subr.bf16.mxu1 %v4529_v35  ;;  %v2768_v37 = vld [vmem:[#allocation3 + $0x48] sm:$0xff] }
 0xb0e   : > { %2634 = vst.msk [vmem:[#allocation3 + $0x58] sm:$0xff] %vm1262_vm9, %v2630_v36  ;;  %v2628_v12 = vpop.permute.xlu0 %2627  ;;  %v2767_v38 = vld [vmem:[#allocation3 + $0x40] sm:$0xff] }
 0xb0f   : > { %2633 = vst.msk [vmem:[#allocation3 + $0x50] sm:$0xff] %vm1262_vm9, %v2628_v12  ;;  %v4531_v39 = vpack.c.bf16 %v2768_v37, %v2767_v38 }
 0xb11   : > { %v2738_v40 = vpop.permute.xlu1 %2737  ;;  %4532 = vmatpush3.bf16.msra.mxu1 %v4531_v39  ;;  %v2786_v41 = vld [vmem:[#allocation3 + $0xd8] sm:$0xff] }
 0xb12   : > { %2742 = vst.msk [vmem:[#allocation3 + $0xe8] sm:$0xff] %vm1262_vm9, %v2738_v40  ;;  %v2736_v15 = vpop.permute.xlu0 %2735  ;;  %v2785_v17 = vld [vmem:[#allocation3 + $0xd0] sm:$0xff] }
 0xb13   : > { %2741 = vst.msk [vmem:[#allocation3 + $0xe0] sm:$0xff] %vm1262_vm9, %v2736_v15  ;;  %v4533_v43 = vpack.c.bf16 %v2786_v41, %v2785_v17 }
 0xb15   : > { %v2642_v44 = vpop.permute.xlu1 %2641  ;;  %4534 = vmatprep.subr.bf16.mxu1 %v4533_v43  ;;  %v2770_v45 = vld [vmem:[#allocation3 + $0x58] sm:$0xff] }
 0xb16   : > { %2646 = vst.msk [vmem:[#allocation3 + $0x68] sm:$0xff] %vm1262_vm9, %v2642_v44  ;;  %v2640_v46 = vpop.permute.xlu0 %2639  ;;  %v2769_v47 = vld [vmem:[#allocation3 + $0x50] sm:$0xff] }
 0xb17   : > { %2645 = vst.msk [vmem:[#allocation3 + $0x60] sm:$0xff] %vm1262_vm9, %v2640_v46  ;;  %v4535_v48 = vpack.c.bf16 %v2770_v45, %v2769_v47 }
 0xb19   : > { %v2750_v49 = vpop.permute.xlu1 %2749  ;;  %4536 = vmatpush3.bf16.msra.mxu1 %v4535_v48  ;;  %v2788_v50 = vld [vmem:[#allocation3 + $0xe8] sm:$0xff] }
 0xb1a   : > { %2754 = vst.msk [vmem:[#allocation3 + $0xf8] sm:$0xff] %vm1262_vm9, %v2750_v49  ;;  %v2748_v51 = vpop.permute.xlu0 %2747  ;;  %v2787_v52 = vld [vmem:[#allocation3 + $0xe0] sm:$0xff] }
 0xb1b   : > { %2753 = vst.msk [vmem:[#allocation3 + $0xf0] sm:$0xff] %vm1262_vm9, %v2748_v51  ;;  %v4537_v53 = vpack.c.bf16 %v2788_v50, %v2787_v52 }
 0xb1d   : > { %v2654_v55 = vpop.permute.xlu1 %2653  ;;  %4538 = vmatprep.subr.bf16.mxu1 %v4537_v53  ;;  %v2772_v56 = vld [vmem:[#allocation3 + $0x68] sm:$0xff] }
 0xb1e   : > { %2658 = vst.msk [vmem:[#allocation3 + $0x78] sm:$0xff] %vm1262_vm9, %v2654_v55  ;;  %v2652_v57 = vpop.permute.xlu0 %2651  ;;  %v2771_v58 = vld [vmem:[#allocation3 + $0x60] sm:$0xff] }
 0xb1f   : > { %2657 = vst.msk [vmem:[#allocation3 + $0x70] sm:$0xff] %vm1262_vm9, %v2652_v57  ;;  %v4539_v59 = vpack.c.bf16 %v2772_v56, %v2771_v58 }
 0xb21   : > { %4540 = vmatpush3.bf16.msra.mxu1 %v4539_v59  ;;  %v2790_v60 = vld [vmem:[#allocation3 + $0xf8] sm:$0xff]  ;;  %v2896_v59 = vld [vmem:[%s5794_s15] sm:$0xff] }
 0xb22   : > { %v2789_v61 = vld [vmem:[#allocation3 + $0xf0] sm:$0xff] }
 0xb23   : > { %v4541_v9 = vpack.c.bf16 %v2790_v60, %v2789_v61  ;;  %v3050_v60 = vmul.u32 2, %v4974_v8  ;;  %v3051_v61 = vmul.u32 2, %v4977_v18 }
 0xb24   : > { %v3052_v8 = vmul.u32 2, %v4999_v21  ;;  %v3053_v18 = vmul.u32 2, %v5002_v22 }
 0xb25   : > { %4542 = vmatprep.subr.bf16.mxu1 %v4541_v9  ;;  %v2774_v11 = vld [vmem:[#allocation3 + $0x78] sm:$0xff]  ;;  %v2976_v9 = vld [vmem:[%s5796_s12] sm:$0xff] }
 0xb26   : > { %v2773_v7 = vld [vmem:[#allocation3 + $0x70] sm:$0xff]  ;;  %v3068_v62 = vadd.s32 1, %v3052_v8 }
 0xb27   : > { %v4543_v20 = vpack.c.bf16 %v2774_v11, %v2773_v7  ;;  %v3066_v11 = vadd.s32 1, %v3050_v60  ;;  %v3067_v7 = vadd.s32 1, %v3051_v61 }
 0xb29   : > { %4544 = vmatpush3.bf16.msra.mxu1 %v4543_v20  ;;  %vm3070_vm4 = vcmp.eq.s32.totalorder %v4886_v10, %v3066_v11  ;;  %vm3071_vm12 = vcmp.eq.s32.totalorder %v4886_v10, %v3067_v7  ;;  %v3069_v20 = vadd.s32 1, %v3053_v18 }
 0xb2a   : > { %4575 = vmatprep.subr.bf16.mxu1 %v4690_v5  ;;  %vm4558_vm8 = vmpackc.low %vm3071_vm12, %vm3070_vm4  ;;  %vm5807_vm12 = vcmask 1022976  }
 0xb2b   : > { %vm3073_vm2 = vcmp.eq.s32.totalorder %v4886_v10, %v3069_v20 }
 0xb2c   : > { %2868 = vmatmul.mubr.f32.vlgmr.msra.gmra.mrb[10].mxu1 %v2755_v24 }
 0xb2d   : > { %2872 = vmatprep.mubr.f32.mxu1 %v2758_v2 }
 0xb2e   : > { %v2005_v23 = vpop.permute.xlu1 %2004 }
 0xb2f   : > { %v2000_v4 = vpop.permute.xlu0 %1999  ;;  %v2085_v25 = vadd.f32 %v5292_v1, %v2005_v23 }
 0xb30   : > { %2873 = vmatmul.mubr.f32.gmra.mrb[12].mxu1 %v2757_v3  ;;  %v2080_v19 = vadd.f32 %v5294_v6, %v2000_v4 }
 0xb31   : > { %4330 = vmatprep.mubr.msk.f32.mxu1 %vm5765_vm3, %v4676_v0  ;;  %v2089_v26 = vsub.f32 0.0, %v2085_v25 }
 0xb32   : > { %v2088_v42 = vsub.f32 0.0, %v2080_v19  ;;  %v2801_v12 = vpop.permute.xlu1 %2800 }
 0xb33   : > { %v2092_v28 = vmul.f32 1.442695, %v2089_v26  ;;  %v2796_v32 = vpop.permute.xlu0 %2795 }
 0xb34   : > { %v2090_v27 = vmul.f32 1.442695, %v2088_v42 }
 0xb36   : > { %4646 = vpow2.f32 %v2090_v27 }
 0xb37   : > { %4648 = vpow2.f32 %v2092_v28  ;;  %v2901_v2 = vpop.permute.xlu0 %2900 }
 0xb40   : > { %v4647_v39 = vpop.eup %4646 }
 0xb41   : > { %v2094_v41 = vadd.f32 1.0, %v4647_v39  ;;  %v4649_v15 = vpop.eup %4648 }
 0xb42   : > { %v2095_v17 = vadd.f32 1.0, %v4649_v15 }
 0xbff   : > { %v3995_v29 = vpop.f32.mrb[10].mxu1 }
 0xc00   : > { %v3996_v30 = vpop.f32.mrb[11].mxu1 }
 0xc01   : > { %v3997_v31 = vadd.f32 %v3996_v30, %v3995_v29 }
 0xc03   : > { %v2870_v33 = vadd.f32 %v3997_v31, %v2796_v32  ;;  %v3998_v34 = vpop.f32.mrb[12].mxu1 }
 0xc04   : > { %v3999_v35 = vpop.f32.mrb[13].mxu1 }
 0xc05   : > { %v2880_v36 = vmin.f32 %v2870_v33, 0.0  ;;  %v4000_v37 = vadd.f32 %v3999_v35, %v3998_v34  ;;  %vm2878_vm7 = vcmp.gt.f32.partialorder %v2870_v33, 0.0 }
 0xc07   : > { %v2882_v6 = vmul.f32 1.442695, %v2880_v36  ;;  %v2875_v38 = vadd.f32 %v4000_v37, %v2801_v12 }
 0xc09   : > { %4650 = vpow2.f32 %v2882_v6  ;;  %v2881_v1 = vmin.f32 %v2875_v38, 0.0  ;;  %vm2879_vm1 = vcmp.gt.f32.partialorder %v2875_v38, 0.0 }
 0xc0b   : > { %v2884_v40 = vmul.f32 1.442695, %v2881_v1 }
 0xc0d   : > { %4652 = vpow2.f32 %v2884_v40 }
 0xc0e   : > { %4654 = vrcp.f32 %v2094_v41 }
 0xc0f   : > { %4656 = vrcp.f32 %v2095_v17 }
 0xc13   : > { %v4651_v43 = vpop.eup %4650 }
 0xc14   : > { %v3785_v44 = vadd.f32 -1.0, %v4651_v43 }
 0xc16   : > { %v2888_v45 = vmul.f32 1.6732632, %v3785_v44 }
 0xc17   : > { %v4653_v46 = vpop.eup %4652 }
 0xc18   : > { %v2890_v47 = vsel %vm2878_vm7, %v2870_v33, %v2888_v45  ;;  %v3786_v48 = vadd.f32 -1.0, %v4653_v46  ;;  %v4655_v50 = vpop.eup %4654  ;;  %vm5509_vm7 = vcmp.eq.s32.totalorder %v4886_v10, %v3053_v18 }
 0xc19   : > { %v2892_v49 = vmul.f32 1.050701, %v2890_v47  ;;  %v4657_v56 = vpop.eup %4656 }
 0xc1a   : > { %v2889_v51 = vmul.f32 1.6732632, %v3786_v48 }
 0xc1b   : > { %v2894_v52 = vmul.f32 %v4655_v50, %v2892_v49 }
 0xc1c   : > { %v2891_v53 = vsel %vm2879_vm1, %v2875_v38, %v2889_v51 }
 0xc1d   : > { %v2893_v55 = vmul.f32 1.050701, %v2891_v53 }
 0xc1f   : > { %v2895_v57 = vmul.f32 %v4657_v56, %v2893_v55 }
 0xc21   : > { %v4546_v58 = vpack.c.bf16 %v2895_v57, %v2894_v52 }
 0xc23   : > { %4547 = vmatpush3.bf16.msra.mxu0 %v4546_v58 }
 0xc24   : > { %4548 = vmatprep.subr.bf16.mxu0 %v4690_v5 }
 0xc26   : > { %4251 = vmatmul.mubr.msk.f32.vlgmr.msra.gmra.mrb[18].mxu0 %vm5795_vm13, %v2896_v59  ;;  %vm3054_vm13 = vcmp.eq.s32.totalorder %v4886_v10, %v3050_v60 }
 0xc27   : > { %4550 = vmatpush3.bf16.msra.mxu0 %v4546_v58  ;;  %4257 = vmatprep.mubr.msk.f32.mxu0 %vm5765_vm3, %v4676_v0 }
 0xc28   : > { %4551 = vmatprep.subr.bf16.mxu0 %v4690_v5 }
 0xc2a   : > { %4258 = vmatmul.mubr.msk.f32.vlgmr.msra.gmra.mrb[20].mxu0 %vm5797_vm6, %v2976_v9  ;;  %vm3055_vm6 = vcmp.eq.s32.totalorder %v4886_v10, %v3051_v61 }
 0xc2b   : > { %4553 = vmatpush3.bf16.msk.msra.mxu0 %vm5316_vm15, %v4696_v16  ;;  %4276 = vmatprep.mubr.msk.f32.mxu0 %vm5765_vm3, %v4676_v0  ;;  %vm3072_vm15 = vcmp.eq.s32.totalorder %v4886_v10, %v3068_v62  ;;  %vm4570_vm4 = vmpackc.low %vm3055_vm6, %vm3054_vm13  ;;  %vm5815_vm13 = vcmask 957440   ;;  %vm5816_vm6 = vcmask 949248  }
 0xc2c   : > { %4554 = vmatprep.subr.bf16.mxu0 %v4690_v5  ;;  %vm4561_vm5 = vmpackc.low %vm3073_vm2, %vm3072_vm15  ;;  %vm5809_vm15 = vcmask 1006592   ;;  %vm5810_vm2 = vcmask 998400  }
 0xc2f   : > { %4556 = vmatpush3.bf16.msk.msra.mxu0 %vm5328_vm14, %v4696_v16  ;;  %vm5504_vm14 = vcmp.eq.s32.totalorder %v4886_v10, %v3052_v8 }
 0xc30   : > { %4557 = vmatprep.subr.bf16.mxu0 %v4690_v5  ;;  %vm4573_vm1 = vmpackc.low %vm5509_vm7, %vm5504_vm14  ;;  %vm5812_vm14 = vcmask 982016   ;;  %vm5813_vm7 = vcmask 973824  }
 0xc33   : > { %4559 = vmatpush3.bf16.msk.msra.mxu0 %vm4558_vm8, %v4696_v16  ;;  %vm5808_vm8 = vcmask 1014784  }
 0xc34   : > { %4560 = vmatprep.subr.bf16.mxu0 %v4690_v5 }
 0xc37   : > { %4562 = vmatpush3.bf16.msk.msra.mxu0 %vm4561_vm5, %v4696_v16  ;;  %vm5811_vm5 = vcmask 990208  }
 0xc38   : > { %4563 = vmatprep.subr.bf16.mxu0 %v4690_v5 }
 0xcf9   : > { %v2972_v22 = vpop.f32.mrb[18].mxu0 }
 0xcfa   : > { %v4252_v24 = vpop.f32.mrb[19].mxu0  ;;  %v2973_v14 = vadd.f32 %v2972_v22, %v2901_v2 }
 0xcfd   : > { %v3046_v3 = vpop.f32.mrb[20].mxu0 }
 0xcfe   : > { %v3047_v4 = vadd.f32 %v3046_v3, %v2901_v2  ;;  %v4259_v19 = vpop.f32.mrb[21].mxu0 }
 0xd00   : > { %4277 = vmatmul.mubr.msk.f32.vlgmr.msra.gmra.mrb[22].mxu0 %vm1262_vm9, %v3047_v4 }
 0xd01   : > { %4565 = vmatpush3.bf16.msk.msra.mxu0 %vm5340_vm10, %v4696_v16  ;;  %4295 = vmatprep.mubr.msk.f32.mxu0 %vm5765_vm3, %v4676_v0  ;;  %vm3236_vm10 = vcmask 1047608  }
 0xd02   : > { %4566 = vmatprep.subr.bf16.mxu0 %v4690_v5 }
 0xd05   : > { %4568 = vmatpush3.bf16.msk.msra.mxu0 %vm5349_vm0, %v4696_v16  ;;  %vm3238_vm0 = vcmask 56320  }
 0xd06   : > { %4569 = vmatprep.subr.bf16.mxu0 %v4690_v5 }
 0xd09   : > { %4571 = vmatpush3.bf16.msk.msra.mxu0 %vm4570_vm4, %v4696_v16  ;;  %vm5817_vm4 = vcmask 941056  }
 0xd0a   : > { %4572 = vmatprep.subr.bf16.mxu0 %v4690_v5 }
 0xd0d   : > { %4574 = vmatpush3.bf16.msk.msra.mxu0 %vm4573_vm1, %v4696_v16  ;;  %vm5814_vm1 = vcmask 965632  }
 0xd0e   : > { %4333 = vmatprep.subr.mxu0 %v4676_v0 }
 0xd10   : > { %4296 = vmatmul.mubr.msk.f32.vlgmr.msra.gmra.mrb[22].mxu0 %vm1262_vm9, %v2973_v14  ;;  %vm5805_vm9 = vcmask 1039360  }
 0xd11   : > { %4335 = vmatprep.mubr.msk.f32.mxu0 %vm5765_vm3, %v4676_v0  ;;  %vm5806_vm3 = vcmask 1031168  }
 0xde3   : > { %v3224_v10 = vpop.f32.mrb[22].mxu0 }
 0xde4   : > { %3233 = vrot.lane.b32.xlu1 %v3224_v10, %s5766_s21  ;;  %v4297_v63 = vpop.f32.mrb[23].mxu0  ;;  %s5803_s21 = sld [smem:[#allocation16_spill]] }
 0xdea   : > { %v2099_v16 = vld [vmem:[%s5803_s21] sm:$0xff] }
 0xe56   : > { %v3234_v23 = vpop.permute.xlu1 %3233 }
 0xe57   : > { %3237 = vst.msk [vmem:[#allocation2] sm:$0xff] %vm3236_vm10, %v3234_v23  ;;  %vm5818_vm10 = vcmask 932864  }
 0xe58   : > { %3239 = vst.msk [vmem:[#allocation2 + $0x8] sm:$0xff] %vm3238_vm0, %v3234_v23  ;;  %vm5819_vm0 = vcmask 924672  }
 0xe5e   : > { %v3240_v25 = vld [vmem:[#allocation2] sm:$0xff] }
 0xe5f   : > { %v3243_v42 = vld [vmem:[#allocation2 + $0x8] sm:$0xff]  ;;  %3241 = vst [vmem:[#allocation3] sm:$0xff] %v3240_v25  ;;  %3246 = vrot.lane.b32.xlu0 %v3240_v25, %s5768_s30 }
 0xe60   : > { %3248 = vrot.lane.b32.xlu1 %v3243_v42, %s5768_s30 }
 0xe63   : > { %3257 = vrot.lane.b32.xlu0 %v3240_v25, %s5769_s27 }
 0xe64   : > { %3259 = vrot.lane.b32.xlu1 %v3243_v42, %s5769_s27  ;;  %s5820_s27 = sld [smem:[#allocation24_spill]] }
 0xe67   : > { %3268 = vrot.lane.b32.xlu0 %v3240_v25, %s5770_s29 }
 0xe68   : > { %3270 = vrot.lane.b32.xlu1 %v3243_v42, %s5770_s29 }
 0xe6a   : > { %v3407_v14 = vld [vmem:[%s5820_s27] sm:$0xff] }
 0xe6b   : > { %3279 = vrot.lane.b32.xlu0 %v3240_v25, %s5771_s0 }
 0xe6c   : > { %3281 = vrot.lane.b32.xlu1 %v3243_v42, %s5771_s0 }
 0xe6f   : > { %3290 = vrot.lane.b32.xlu0 %v3240_v25, %s5772_s5 }
 0xe70   : > { %3292 = vrot.lane.b32.xlu1 %v3243_v42, %s5772_s5 }
 0xe73   : > { %3301 = vrot.lane.b32.xlu0 %v3240_v25, %s5773_s23 }
 0xe74   : > { %3303 = vrot.lane.b32.xlu1 %v3243_v42, %s5773_s23 }
 0xe77   : > { %3312 = vrot.lane.b32.xlu0 %v3240_v25, %s5790_s16 }
 0xe78   : > { %3314 = vrot.lane.b32.xlu1 %v3243_v42, %s5790_s16  ;;  %s5822_s16 = sld [smem:[#allocation5_spill]] }
 0xe7b   : > { %3323 = vrot.lane.b32.xlu0 %v3240_v25, %s5767_s4 }
 0xe7c   : > { %3325 = vrot.lane.b32.xlu1 %v3243_v42, %s5767_s4  ;;  %s5804_s4 = sld [smem:[#allocation27_spill]] }
 0xe7e   : > { %s3665_s13 = sshll.u32 %s5822_s16, 2 }
 0xe7f   : > { %3334 = vrot.lane.b32.xlu0 %v3240_v25, %s5754_s1  ;;  %s702_s28 = scalar_lea.vmem %s5823_s19, %s3665_s13 }
 0xe80   : > { %3336 = vrot.lane.b32.xlu1 %v3243_v42, %s5754_s1 }
 0xe82   : > { %v3510_v26 = vld [vmem:[%s5804_s4] sm:$0x7] }
 0xe83   : > { %3345 = vrot.lane.b32.xlu0 %v3240_v25, %s5753_s24 }
 0xe84   : > { %3347 = vrot.lane.b32.xlu1 %v3243_v42, %s5753_s24  ;;  %s5802_s24 = sld [smem:[#allocation25_spill]] }
 0xe87   : > { %3356 = vrot.lane.b32.xlu0 %v3240_v25, %s5756_s2 }
 0xe88   : > { %3358 = vrot.lane.b32.xlu1 %v3243_v42, %s5756_s2 }
 0xe8a   : > { %v3424_v0 = vld [vmem:[%s5802_s24] sm:$0xff] }
 0xe8b   : > { %3367 = vrot.lane.b32.xlu0 %v3240_v25, %s5755_s6 }
 0xe8c   : > { %3369 = vrot.lane.b32.xlu1 %v3243_v42, %s5755_s6 }
 0xe8f   : > { %3378 = vrot.lane.b32.xlu0 %v3240_v25, %s5757_s7 }
 0xe90   : > { %3380 = vrot.lane.b32.xlu1 %v3243_v42, %s5757_s7 }
 0xe93   : > { %3389 = vrot.lane.b32.xlu0 %v3240_v25, %s5789_s8 }
 0xe94   : > { %3391 = vrot.lane.b32.xlu1 %v3243_v42, %s5789_s8  ;;  %s5821_s8 = sld [smem:[#allocation26_spill]] }
 0xe97   : > { %3400 = vrot.lane.b32.xlu0 %v3240_v25, %s5774_s26 }
 0xe98   : > { %3402 = vrot.lane.b32.xlu1 %v3243_v42, %s5774_s26 }
 0xe9b   : > { %2102 = vperm.xlu0 %4633, %v2099_v16  }
 0xe9c   : > { %3427 = vperm.xlu1 %4632, %v3424_v0  }
 0xe9f   : > { %3513 = vperm.xlu0 %4633, %v3510_v26  }
 0xed1   : > { %v3247_v28 = vpop.permute.xlu0 %3246 }
 0xed2   : > { %v3249_v27 = vpop.permute.xlu1 %3248 }
 0xed3   : > { %v3250_v29 = vsel %vm5805_vm9, %v3247_v28, %v3249_v27 }
 0xed4   : > { %3252 = vst [vmem:[#allocation3 + $0x8] sm:$0xff] %v3250_v29  ;;  %v4576_v30 = vpack.c.bf16 %v3250_v29, %v3240_v25 }
 0xed5   : > { %v3258_v32 = vpop.permute.xlu0 %3257 }
 0xed6   : > { %v3260_v31 = vpop.permute.xlu1 %3259  ;;  %4577 = vmatpush3.bf16.msra.mxu1 %v4576_v30 }
 0xed7   : > { %v3261_v33 = vsel %vm5806_vm3, %v3258_v32, %v3260_v31  ;;  %4578 = vmatprep.subr.bf16.mxu1 %v4690_v5  ;;  %vm3589_vm3 = vcmask 1042432  }
 0xed8   : > { %3263 = vst [vmem:[#allocation3 + $0x10] sm:$0xff] %v3261_v33 }
 0xed9   : > { %v3269_v35 = vpop.permute.xlu0 %3268 }
 0xeda   : > { %v3271_v34 = vpop.permute.xlu1 %3270 }
 0xedb   : > { %v3272_v36 = vsel %vm5807_vm12, %v3269_v35, %v3271_v34 }
 0xedc   : > { %3274 = vst [vmem:[#allocation3 + $0x18] sm:$0xff] %v3272_v36  ;;  %v4579_v37 = vpack.c.bf16 %v3272_v36, %v3261_v33  ;;  %v3509_v36 = vld [vmem:[%s5821_s8] sm:$0x7] }
 0xedd   : > { %v3280_v6 = vpop.permute.xlu0 %3279 }
 0xede   : > { %v3282_v12 = vpop.permute.xlu1 %3281  ;;  %4580 = vmatpush3.bf16.msra.mxu1 %v4579_v37 }
 0xedf   : > { %v3283_v38 = vsel %vm5808_vm8, %v3280_v6, %v3282_v12  ;;  %4581 = vmatprep.subr.bf16.mxu1 %v4690_v5 }
 0xee0   : > { %3285 = vst [vmem:[#allocation3 + $0x20] sm:$0xff] %v3283_v38 }
 0xee1   : > { %v3291_v1 = vpop.permute.xlu0 %3290 }
 0xee2   : > { %v3293_v39 = vpop.permute.xlu1 %3292 }
 0xee3   : > { %v3294_v40 = vsel %vm5809_vm15, %v3291_v1, %v3293_v39 }
 0xee4   : > { %3296 = vst [vmem:[#allocation3 + $0x28] sm:$0xff] %v3294_v40  ;;  %v4582_v41 = vpack.c.bf16 %v3294_v40, %v3283_v38 }
 0xee5   : > { %v3302_v17 = vpop.permute.xlu0 %3301 }
 0xee6   : > { %v3304_v15 = vpop.permute.xlu1 %3303  ;;  %4583 = vmatpush3.bf16.msra.mxu1 %v4582_v41 }
 0xee7   : > { %v3305_v43 = vsel %vm5810_vm2, %v3302_v17, %v3304_v15  ;;  %4584 = vmatprep.subr.bf16.mxu1 %v4690_v5 }
 0xee8   : > { %3307 = vst [vmem:[#allocation3 + $0x30] sm:$0xff] %v3305_v43 }
 0xee9   : > { %v3313_v45 = vpop.permute.xlu0 %3312 }
 0xeea   : > { %v3315_v44 = vpop.permute.xlu1 %3314 }
 0xeeb   : > { %v3316_v46 = vsel %vm5811_vm5, %v3313_v45, %v3315_v44 }
 0xeec   : > { %3318 = vst [vmem:[#allocation3 + $0x38] sm:$0xff] %v3316_v46  ;;  %v4585_v47 = vpack.c.bf16 %v3316_v46, %v3305_v43 }
 0xeed   : > { %v3324_v49 = vpop.permute.xlu0 %3323 }
 0xeee   : > { %v3326_v48 = vpop.permute.xlu1 %3325  ;;  %4586 = vmatpush3.bf16.msra.mxu1 %v4585_v47 }
 0xeef   : > { %v3327_v50 = vsel %vm5812_vm14, %v3324_v49, %v3326_v48  ;;  %4587 = vmatprep.subr.bf16.mxu1 %v4690_v5 }
 0xef0   : > { %3329 = vst [vmem:[#allocation3 + $0x40] sm:$0xff] %v3327_v50 }
 0xef1   : > { %v3335_v52 = vpop.permute.xlu0 %3334 }
 0xef2   : > { %v3337_v51 = vpop.permute.xlu1 %3336 }
 0xef3   : > { %v3338_v53 = vsel %vm5813_vm7, %v3335_v52, %v3337_v51 }
 0xef4   : > { %3340 = vst [vmem:[#allocation3 + $0x48] sm:$0xff] %v3338_v53  ;;  %v4588_v55 = vpack.c.bf16 %v3338_v53, %v3327_v50 }
 0xef5   : > { %v3346_v57 = vpop.permute.xlu0 %3345 }
 0xef6   : > { %v3348_v56 = vpop.permute.xlu1 %3347  ;;  %4589 = vmatpush3.bf16.msra.mxu1 %v4588_v55 }
 0xef7   : > { %v3349_v58 = vsel %vm5814_vm1, %v3346_v57, %v3348_v56  ;;  %4590 = vmatprep.subr.bf16.mxu1 %v4690_v5 }
 0xef8   : > { %3351 = vst [vmem:[#allocation3 + $0x50] sm:$0xff] %v3349_v58 }
 0xef9   : > { %v3357_v60 = vpop.permute.xlu0 %3356 }
 0xefa   : > { %v3359_v59 = vpop.permute.xlu1 %3358 }
 0xefb   : > { %v3360_v61 = vsel %vm5815_vm13, %v3357_v60, %v3359_v59 }
 0xefc   : > { %3362 = vst [vmem:[#allocation3 + $0x58] sm:$0xff] %v3360_v61  ;;  %v4591_v9 = vpack.c.bf16 %v3360_v61, %v3349_v58 }
 0xefd   : > { %v3368_v7 = vpop.permute.xlu0 %3367 }
 0xefe   : > { %v3370_v11 = vpop.permute.xlu1 %3369  ;;  %4592 = vmatpush3.bf16.msra.mxu1 %v4591_v9 }
 0xeff   : > { %v3371_v8 = vsel %vm5816_vm6, %v3368_v7, %v3370_v11  ;;  %4593 = vmatprep.subr.bf16.mxu1 %v4690_v5 }
 0xf00   : > { %3373 = vst [vmem:[#allocation3 + $0x60] sm:$0xff] %v3371_v8 }
 0xf01   : > { %v3379_v62 = vpop.permute.xlu0 %3378 }
 0xf02   : > { %v3381_v18 = vpop.permute.xlu1 %3380 }
 0xf03   : > { %v3382_v20 = vsel %vm5817_vm4, %v3379_v62, %v3381_v18 }
 0xf04   : > { %3384 = vst [vmem:[#allocation3 + $0x68] sm:$0xff] %v3382_v20  ;;  %v4594_v13 = vpack.c.bf16 %v3382_v20, %v3371_v8 }
 0xf05   : > { %v3390_v22 = vpop.permute.xlu0 %3389 }
 0xf06   : > { %v3392_v21 = vpop.permute.xlu1 %3391  ;;  %4595 = vmatpush3.bf16.msra.mxu1 %v4594_v13 }
 0xf07   : > { %v3393_v24 = vsel %vm5818_vm10, %v3390_v22, %v3392_v21  ;;  %4596 = vmatprep.subr.bf16.mxu1 %v4690_v5 }
 0xf08   : > { %3395 = vst [vmem:[#allocation3 + $0x70] sm:$0xff] %v3393_v24 }
 0xf09   : > { %v3401_v3 = vpop.permute.xlu0 %3400 }
 0xf0a   : > { %v3403_v2 = vpop.permute.xlu1 %3402 }
 0xf0b   : > { %v3404_v4 = vsel %vm5819_vm0, %v3401_v3, %v3403_v2 }
 0xf0c   : > { %3406 = vst [vmem:[#allocation3 + $0x78] sm:$0xff] %v3404_v4  ;;  %v4597_v19 = vpack.c.bf16 %v3404_v4, %v3393_v24 }
 0xf0e   : > { %4598 = vmatpush3.bf16.msra.mxu1 %v4597_v19 }
 0xf11   : > { %4331 = vmatmul.mubr.f32.vlgmr.msra.gmra.mrb[14].mxu1 %v3407_v14 }
 0xf1a   : > { %v2103_v10 = vpop.permute.xlu0 %2102 }
 0xf1b   : > { %v2176_v63 = vadd.f32 %v5308_v54, %v2103_v10  ;;  %v3428_v5 = vpop.permute.xlu1 %3427 }
 0xf1d   : > { %v2179_v23 = vsub.f32 0.0, %v2176_v63 }
 0xf1e   : > { %v3514_v37 = vpop.permute.xlu0 %3513 }
 0xf1f   : > { %v2180_v25 = vmul.f32 1.442695, %v2179_v23 }
 0xf21   : > { %4658 = vpow2.f32 %v2180_v25 }
 0xf2b   : > { %v4659_v28 = vpop.eup %4658 }
 0xf2c   : > { %v2182_v29 = vadd.f32 1.0, %v4659_v28 }
 0xfe4   : > { %v3496_v42 = vpop.f32.mrb[14].mxu1 }
 0xfe5   : > { %v3497_v0 = vadd.f32 %v3496_v42, %v3428_v5  ;;  %v4332_v16 = vpop.f32.mrb[15].mxu1 }
 0xfe7   : > { %v3501_v26 = vmin.f32 %v3497_v0, 0.0  ;;  %vm3500_vm9 = vcmp.gt.f32.partialorder %v3497_v0, 0.0 }
 0xfe9   : > { %v3502_v27 = vmul.f32 1.442695, %v3501_v26 }
 0xfeb   : > { %4660 = vpow2.f32 %v3502_v27 }
 0xfec   : > { %4662 = vrcp.f32 %v2182_v29 }
 0xff5   : > { %v4661_v30 = vpop.eup %4660 }
 0xff6   : > { %v3815_v31 = vadd.f32 -1.0, %v4661_v30  ;;  %v4663_v54 = vpop.eup %4662 }
 0xff8   : > { %v3505_v32 = vmul.f32 1.6732632, %v3815_v31 }
 0xffa   : > { %v3506_v33 = vsel %vm3500_vm9, %v3497_v0, %v3505_v32 }
 0xffb   : > { %v3507_v34 = vmul.f32 1.050701, %v3506_v33 }
 0xffd   : > { %v3508_v35 = vmul.f32 %v4663_v54, %v3507_v34 }
 0xfff   : > { %4334 = vmatpush3.msra.mxu0 %v3508_v35 }
0x1000   : > { %4336 = vmatmul.mubr.msk.f32.vlgmr.msra.gmra.mrb[24].mxu0 %vm2105_vm11, %v3509_v36 }
0x10d3   : > { %v3585_v12 = vpop.f32.mrb[24].mxu0 }
0x10d4   : > { %v3586_v6 = vadd.f32 %v3585_v12, %v3514_v37  ;;  %v4337_v38 = vpop.f32.mrb[25].mxu0 }
0x10d6   : > { %v3590_v39 = vsel %vm3589_vm3, %v3586_v6, -inf }
0x10d7   : > { %v3591_v1 = vrot.slane %v3590_v39, 4 }
0x10d9   : > { %v3592_v40 = vmax.f32 %v3590_v39, %v3591_v1 }
0x10db   : > { %v3593_v41 = vrot.slane %v3592_v40, 2 }
0x10dd   : > { %v3594_v15 = vmax.f32 %v3592_v40, %v3593_v41 }
0x10df   : > { %v3595_v17 = vrot.slane %v3594_v15, 1 }
0x10e1   : > { %v3596_v43 = vmax.f32 %v3594_v15, %v3595_v17 }
0x10e3   : > { %v3597_v44 = vsub.f32 %v3586_v6, %v3596_v43 }
0x10e5   : > { %v3598_v45 = vmul.f32 1.442695, %v3597_v44 }
0x10e7   : > { %4664 = vpow2.f32 %v3598_v45 }
0x10f1   : > { %v4665_v46 = vpop.eup %4664 }
0x10f2   : > { %v3600_v47 = vsel %vm3589_vm3, %v4665_v46, 0.0 }
0x10f3   : > { %v3601_v48 = vrot.slane %v3600_v47, 4 }
0x10f5   : > { %v3602_v49 = vadd.f32 %v3601_v48, %v3600_v47 }
0x10f7   : > { %v3603_v50 = vrot.slane %v3602_v49, 2 }
0x10f9   : > { %v3604_v51 = vadd.f32 %v3603_v50, %v3602_v49 }
0x10fb   : > { %v3605_v52 = vrot.slane %v3604_v51, 1 }
0x10fd   : > { %v3606_v53 = vadd.f32 %v3605_v52, %v3604_v51 }
0x10ff   : > { %4666 = vrcp.f32 %v3606_v53 }
0x1109   : > { %v4667_v55 = vpop.eup %4666 }
0x110a   : > { %v3608_v56 = vmul.f32 %v4667_v55, %v4665_v46 }
0x110c   : > { %3609 = vst [vmem:[%s702_s28] sm:$0x7] %v3608_v56 }
0x110d PF: > { %s5824_s10 = sld [smem:[#allocation4_spill]] }
0x1113   : > { %s33_s4 = sadd.s32 1, %s5824_s10  }
0x1114   : > { %p30_p4 = scmp.ge.s32.totalorder %s33_s4, 4  }
0x1116   :  { %32 = sbr.rel (!%p30_p4) target bundleno = 24 (0x18), region = 142 }

</bundles_post_ra>
